<compile_context>
chip_gen: v7x
topology: tpu7x:2x2x1
jax: 0.10.0
libtpu: 0.0.40
codegen_flags: <defaults>
</compile_context>

<pallas_src>
import functools

import jax
import jax.numpy as jnp
import numpy as np
from jax import lax
from jax.experimental import pallas as pl
from jax.experimental.pallas import tpu as pltpu


def _round_up(x: int, m: int) -> int:
    return ((x + m - 1) // m) * m


def _elu(x):
    return jnp.where(x > 0, x, jnp.expm1(x))


def gat_edge_kernel(
    xn_ref,       # [Np, Fn]  node features (resident)
    xe_ref,       # [TE, Fe]  edge-feature tile
    wn_ref,       # [Fn, Hp]  node weight (attention columns folded in)
    bn_ref,       # [1,  Hp]
    we_ref,       # [Fe, Hp]  edge weight (attention column folded in)
    be_ref,       # [1,  Hp]
    eidx_ref,     # [TE, 2]   int32, cols = (target, neighbor)
    tgt_row_ref,  # [1,  TE]  int32, target indices in row layout
    out_n_ref,    # [Np, Hp]  resident output (written on last step)
    out_e_ref,    # [TE, Hp]  per-tile edge output
    h_sc,         # [Np, Hp] f32  transformed node features (+ folded score cols)
    hg_sc,        # [Np, Hp] gdt  copy of h for the MXU gather
    si_sc,        # [Np, 1]  f32  per-node target score  h @ wa_i
    m_sc,         # [Np, 1]  f32  running per-node max
    acc_sc,       # [Np, Hp] f32  running unnormalized weighted sum (+denom col)
    *,
    scaling: float,
    apply_act: bool,
    col_si: int,
    col_sj: int,
    col_se: int,
    col_den: int,
    gather_dtype,
):
    f32 = jnp.float32
    gdt = gather_dtype
    n_nodes_p = acc_sc.shape[0]
    n_edges_t = out_e_ref.shape[0]
    neg_big = f32(-1e30)          # finite sentinel: no inf/nan propagation

    # ---------------- step 0: node linear + state init ----------------------
    @pl.when(pl.program_id(0) == 0)
    def _init():
        h = jnp.dot(xn_ref[...], wn_ref[...], preferred_element_type=f32) + bn_ref[...]
        h_sc[...] = h
        hg_sc[...] = h.astype(gdt)                 # one-hot gather operand
        si_sc[...] = h[:, col_si:col_si + 1]       # per-node target score
        m_sc[...] = jnp.full(m_sc.shape, neg_big, dtype=m_sc.dtype)
        acc_sc[...] = jnp.zeros_like(acc_sc)

    # ---------------- every step: edge linear + this edge tile --------------
    edge_h = jnp.dot(xe_ref[...], we_ref[...], preferred_element_type=f32) + be_ref[...]
    out_e_ref[...] = (_elu(edge_h) if apply_act else edge_h).astype(out_e_ref.dtype)

    tgt_col = eidx_ref[:, 0:1]                     # [TE,1] int32 (-1 = padding)
    nbr_col = eidx_ref[:, 1:2]                     # [TE,1]
    tgt_row = tgt_row_ref[...]                     # [1,TE]

    # One-hot edge<->node maps built in-kernel, directly in consumption dtype.
    iota_en = lax.broadcasted_iota(jnp.int32, (n_edges_t, n_nodes_p), 1)
    iota_ne = lax.broadcasted_iota(jnp.int32, (n_nodes_p, n_edges_t), 0)
    a_tgt_b = iota_en == tgt_col                   # [TE,Np] bool (mask + f32 gathers)
    a_tgt_f = a_tgt_b.astype(f32)                  # f32: score / max gathers only
    a_nbr_g = (iota_en == nbr_col).astype(gdt)     # gather one-hot (exact in bf16)
    a_tgt_t_g = (iota_ne == tgt_row).astype(gdt)   # scatter one-hot (transposed)
    # TODO(synk): check via pl.lower_as_mlir whether dot_general contracting on
    # axis 0 of a_tgt avoids an XLU transpose; if so a_tgt_t_g can be dropped.

    # Gather transformed neighbor features (columns col_sj carries s_j, col_den=1).
    h_j = jnp.dot(a_nbr_g, hg_sc[...], preferred_element_type=f32)     # [TE,Hp]
    # TODO(synk): for large N replace this one-hot matmul (O(E*N*H)) with a
    # scalar-prefetch-driven row gather (PrefetchScalarGridSpec + pl.Element).

    # Attention logits; projections live in the folded weight columns.
    s_i = jnp.dot(a_tgt_f, si_sc[...], preferred_element_type=f32)     # [TE,1]
    eij = s_i + h_j[:, col_sj:col_sj + 1] + edge_h[:, col_se:col_se + 1]
    eij = jnp.where(eij > 0, eij, f32(scaling) * eij)                  # LeakyReLU
    eij = jnp.where(tgt_col >= 0, eij, neg_big)                        # padded edges inert

    # -------- online (flash-style) softmax over edges grouped by target -----
    m_old = m_sc[...]                                                  # [Np,1]
    m_tile = jnp.max(jnp.where(a_tgt_b, eij, neg_big),
                     axis=0, keepdims=True)                            # [1,Np]
    # lane->sublane move of the per-node tile max via iota/where/max (small
    # [Np,Np] temp; avoids an unaligned 2-D transpose in the lowering).
    iota_r = lax.broadcasted_iota(jnp.int32, (n_nodes_p, n_nodes_p), 0)
    iota_c = lax.broadcasted_iota(jnp.int32, (n_nodes_p, n_nodes_p), 1)
    m_tile_col = jnp.max(jnp.where(iota_r == iota_c, m_tile, neg_big),
                         axis=1, keepdims=True)                        # [Np,1]
    m_new = jnp.maximum(m_old, m_tile_col)                             # [Np,1]
    corr = jnp.exp(m_old - m_new)                                      # [Np,1]
    m_e = jnp.dot(a_tgt_f, m_new, preferred_element_type=f32)          # [TE,1] gather (MXU)
    p = jnp.exp(eij - m_e)                                             # [TE,1], <= 1

    # Message + scatter-add; the all-ones column of h makes acc[:, col_den]
    # accumulate the softmax denominator for free in the same matmul.
    msg = (p * h_j).astype(gdt)                                        # [TE,Hp]
    acc_sc[...] = corr * acc_sc[...] + jnp.dot(a_tgt_t_g, msg,
                                               preferred_element_type=f32)
    m_sc[...] = m_new

    # ---------------- last step: normalize, residual, store -----------------
    @pl.when(pl.program_id(0) == pl.num_programs(0) - 1)
    def _finalize():
        acc = acc_sc[...]
        denom = jnp.maximum(acc[:, col_den:col_den + 1], f32(1e-30))   # isolated nodes
        r = pl.reciprocal(denom, approx=True)
        r = r * (f32(2.0) - denom * r)                                 # one Newton step
        out = acc * r + h_sc[...]
        if apply_act:
            out = _elu(out)
        out_n_ref[...] = out.astype(out_n_ref.dtype)


def gat_edge_forward(node_features, edge_features, edge_index, params,
                     scaling=0.2, apply_act=False, mxu_bf16=True, edge_tile=256):
    n_nodes, n_nf = node_features.shape
    n_edges, n_ef = edge_features.shape
    hidden = params["wn"].shape[1]
    f32 = jnp.float32

    te = max(128, _round_up(edge_tile, 128))               # lane/K dim of scatter
    np_nodes = _round_up(max(n_nodes, 128), 128)           # lane/K dim of gather
    np_edges = _round_up(max(n_edges, te), te)
    hp = _round_up(max(hidden + 3, 128), 128)              # 3 folded attention cols
    col_si, col_sj, col_den = hidden, hidden + 1, hidden + 2
    col_se = hidden
    n_tiles = np_edges // te

    wa = params["wa"].astype(f32)                          # [3H, 1]
    wa_i, wa_j, wa_e = wa[:hidden], wa[hidden:2 * hidden], wa[2 * hidden:]
    wn = params["wn"].astype(f32)
    bn = params["bn"].astype(f32).reshape(1, hidden)
    we = params["we"].astype(f32)
    be = params["be"].astype(f32).reshape(1, hidden)
    ba = params["ba"].astype(f32).reshape(1, 1)

    # Node weight columns: [orig | wa_i fold | wa_j fold | ones | 0 ...]
    wn_p = jnp.zeros((n_nf, hp), f32)
    wn_p = wn_p.at[:, :hidden].set(wn)
    wn_p = wn_p.at[:, col_si:col_si + 1].set(wn @ wa_i)
    wn_p = wn_p.at[:, col_sj:col_sj + 1].set(wn @ wa_j)
    bn_p = jnp.zeros((1, hp), f32)
    bn_p = bn_p.at[:, :hidden].set(bn)
    bn_p = bn_p.at[:, col_si:col_si + 1].set(bn @ wa_i)
    bn_p = bn_p.at[:, col_sj:col_sj + 1].set(bn @ wa_j)
    bn_p = bn_p.at[:, col_den].set(1.0)                    # denominator carrier

    # Edge weight columns: [orig | wa_e fold (+ ba in bias) | 0 ...]
    we_p = jnp.zeros((n_ef, hp), f32)
    we_p = we_p.at[:, :hidden].set(we)
    we_p = we_p.at[:, col_se:col_se + 1].set(we @ wa_e)
    be_p = jnp.zeros((1, hp), f32)
    be_p = be_p.at[:, :hidden].set(be)
    be_p = be_p.at[:, col_se:col_se + 1].set(be @ wa_e + ba)

    xn = jnp.zeros((np_nodes, n_nf), f32).at[:n_nodes].set(node_features.astype(f32))
    xe = jnp.zeros((np_edges, n_ef), f32).at[:n_edges].set(edge_features.astype(f32))

    tgt = edge_index[0].astype(jnp.int32)
    nbr = edge_index[1].astype(jnp.int32)
    fill = jnp.full((np_edges - n_edges,), -1, jnp.int32)  # -1 matches no node -> inert
    tgt_p = jnp.concatenate([tgt, fill])
    nbr_p = jnp.concatenate([nbr, fill])
    eidx = jnp.stack([tgt_p, nbr_p], axis=1)               # [Ep, 2]
    tgt_row = tgt_p.reshape(1, np_edges)                   # [1, Ep]

    gdt = jnp.bfloat16 if mxu_bf16 else jnp.float32
    kernel = functools.partial(
        gat_edge_kernel, scaling=float(scaling), apply_act=bool(apply_act),
        col_si=col_si, col_sj=col_sj, col_se=col_se, col_den=col_den,
        gather_dtype=gdt)

    grid_spec = pltpu.PrefetchScalarGridSpec(
        num_scalar_prefetch=0,
        grid=(n_tiles,),
        in_specs=[
            pl.BlockSpec((np_nodes, n_nf), lambda e: (0, 0)),   # xn (resident)
            pl.BlockSpec((te, n_ef), lambda e: (e, 0)),         # xe tile
            pl.BlockSpec((n_nf, hp), lambda e: (0, 0)),         # wn (resident)
            pl.BlockSpec((1, hp), lambda e: (0, 0)),            # bn
            pl.BlockSpec((n_ef, hp), lambda e: (0, 0)),         # we
            pl.BlockSpec((1, hp), lambda e: (0, 0)),            # be
            pl.BlockSpec((te, 2), lambda e: (e, 0)),            # edge index tile
            pl.BlockSpec((1, te), lambda e: (0, e)),            # target row tile
        ],
        out_specs=(
            pl.BlockSpec((np_nodes, hp), lambda e: (0, 0)),     # node out (resident)
            pl.BlockSpec((te, hp), lambda e: (e, 0)),           # edge out tile
        ),
        scratch_shapes=[
            pltpu.VMEM((np_nodes, hp), f32),    # h
            pltpu.VMEM((np_nodes, hp), gdt),    # h (gather dtype)
            pltpu.VMEM((np_nodes, 1), f32),     # s_i per node
            pltpu.VMEM((np_nodes, 1), f32),     # running max
            pltpu.VMEM((np_nodes, hp), f32),    # running accumulator (+denom col)
        ],
    )

    out_n, out_e = pl.pallas_call(
        kernel,
        out_shape=(jax.ShapeDtypeStruct((np_nodes, hp), f32),
                   jax.ShapeDtypeStruct((np_edges, hp), f32)),
        grid_spec=grid_spec,
        compiler_params=pltpu.CompilerParams(
            dimension_semantics=("arbitrary",),       # edge axis carries the reduction
            vmem_limit_bytes=32 * 1024 * 1024),
    )(xn, xe, wn_p, bn_p, we_p, be_p, eidx, tgt_row)

    # TODO(synk): batch multiple graphs per pallas_call behind a leading
    # "parallel" grid axis to use both v7x TensorCores / amortize launch cost.
    return out_n[:n_nodes, :hidden], out_e[:n_edges, :hidden]


def reference_forward(node_features, edge_features, edge_index, params,
                      scaling=0.2, apply_act=False):
    """Pure-JAX reference using segment ops (mirrors torch_scatter semantics)."""
    n_nodes = node_features.shape[0]
    hidden = params["wn"].shape[1]
    tgt, nbr = edge_index[0], edge_index[1]

    h = node_features @ params["wn"] + params["bn"]
    edge_h = edge_features @ params["we"] + params["be"]
    h_i = h[tgt]
    h_j = h[nbr]
    wa = params["wa"]
    eij = (h_i @ wa[:hidden] + h_j @ wa[hidden:2 * hidden]
           + edge_h @ wa[2 * hidden:] + params["ba"])[:, 0]
    eij = jnp.where(eij > 0, eij, scaling * eij)

    m = jax.ops.segment_max(eij, tgt, num_segments=n_nodes)
    p = jnp.exp(eij - m[tgt])
    denom = jax.ops.segment_sum(p, tgt, num_segments=n_nodes)
    alpha = p / denom[tgt]
    message = alpha[:, None] * h_j
    out = jax.ops.segment_sum(message, tgt, num_segments=n_nodes) + h
    if apply_act:
        out = jnp.where(out > 0, out, jnp.expm1(out))
        edge_h = jnp.where(edge_h > 0, edge_h, jnp.expm1(edge_h))
    return out, edge_h


if __name__ == "__main__":
    N_NODES = 16
    N_EDGES = 300            # > edge_tile so the multi-tile online-softmax path runs
    N_NODE_FEATURES = 16
    N_EDGE_FEATURES = 8
    N_HIDDEN = 32
    SCALING = 0.2

    key = jax.random.PRNGKey(0)
    k1, k2, k3, k4, k5, k6, k7, k8, k9, k10 = jax.random.split(key, 10)

    node_features = jax.random.normal(k1, (N_NODES, N_NODE_FEATURES), dtype=jnp.float32)
    edge_features = jax.random.normal(k2, (N_EDGES, N_EDGE_FEATURES), dtype=jnp.float32)
    target_nodes = jax.random.randint(k3, (N_EDGES,), 0, N_NODES, dtype=jnp.int32)
    neighbor_nodes = jax.random.randint(k4, (N_EDGES,), 0, N_NODES, dtype=jnp.int32)
    edge_index = jnp.stack([target_nodes, neighbor_nodes], axis=0)   # [2, E]

    # Deterministic synthetic parameters (Linear layers: y = x @ W + b).
    params = {
        "wn": jax.random.normal(k5, (N_NODE_FEATURES, N_HIDDEN), dtype=jnp.float32) * 0.1,
        "bn": jax.random.normal(k6, (1, N_HIDDEN), dtype=jnp.float32) * 0.01,
        "we": jax.random.normal(k7, (N_EDGE_FEATURES, N_HIDDEN), dtype=jnp.float32) * 0.1,
        "be": jax.random.normal(k8, (1, N_HIDDEN), dtype=jnp.float32) * 0.01,
        "wa": jax.random.normal(k9, (3 * N_HIDDEN, 1), dtype=jnp.float32) * 0.1,
        "ba": jax.random.normal(k10, (1, 1), dtype=jnp.float32) * 0.01,
    }

    ref_nodes, ref_edges = reference_forward(
        node_features, edge_features, edge_index, params,
        scaling=SCALING, apply_act=False)

    # bf16 MXU operands for the heavy gather/scatter matmuls (fast path).
    # Accuracy trade-off: message and denominator are bf16-rounded (~0.5% rel).
    out_nodes, out_edges = gat_edge_forward(
        node_features, edge_features, edge_index, params,
        scaling=SCALING, apply_act=False, mxu_bf16=True, edge_tile=128)
    jax.block_until_ready((out_nodes, out_edges))
    assert np.allclose(np.asarray(out_nodes), np.asarray(ref_nodes), rtol=2e-2, atol=2e-2)
    assert np.allclose(np.asarray(out_edges), np.asarray(ref_edges), rtol=2e-2, atol=2e-2)

    # Full-f32 path matches the reference tightly.
    out_nodes32, out_edges32 = gat_edge_forward(
        node_features, edge_features, edge_index, params,
        scaling=SCALING, apply_act=False, mxu_bf16=False, edge_tile=128)
    jax.block_until_ready((out_nodes32, out_edges32))
    assert np.allclose(np.asarray(out_nodes32), np.asarray(ref_nodes), rtol=1e-4, atol=1e-4)
    assert np.allclose(np.asarray(out_edges32), np.asarray(ref_edges), rtol=1e-4, atol=1e-4)

    print("KERNEL_OK")
</pallas_src>

<mosaic_0001>
module attributes {stable_mosaic.version = 11 : i64} {
  func.func @gat_edge_kernel(%arg0: i32, %arg1: memref<128x16xf32, #tpu.memory_space<vmem>>, %arg2: memref<128x8xf32, #tpu.memory_space<vmem>>, %arg3: memref<16x128xf32, #tpu.memory_space<vmem>>, %arg4: memref<1x128xf32, #tpu.memory_space<vmem>>, %arg5: memref<8x128xf32, #tpu.memory_space<vmem>>, %arg6: memref<1x128xf32, #tpu.memory_space<vmem>>, %arg7: memref<128x2xi32, #tpu.memory_space<vmem>>, %arg8: memref<1x128xi32, #tpu.memory_space<vmem>>, %arg9: memref<128x128xf32, #tpu.memory_space<vmem>>, %arg10: memref<128x128xf32, #tpu.memory_space<vmem>>, %arg11: memref<128x128xf32, #tpu.memory_space<vmem>>, %arg12: memref<128x128xbf16, #tpu.memory_space<vmem>>, %arg13: memref<128x1xf32, #tpu.memory_space<vmem>>, %arg14: memref<128x1xf32, #tpu.memory_space<vmem>>, %arg15: memref<128x128xf32, #tpu.memory_space<vmem>>) attributes {dimension_semantics = [#tpu.dimension_semantics<arbitrary>], iteration_bounds = array<i64: 3>, scalar_prefetch = 0 : i64, scratch_operands = 5 : i64, tpu.core_type = #tpu.core_type<tc>, window_params = [{pipeline_mode = #tpu.pipeline_mode<synchronous>, transform_indices = @transform_0, window_bounds = array<i64: 128, 16>}, {transform_indices = @transform_1, window_bounds = array<i64: 128, 8>}, {pipeline_mode = #tpu.pipeline_mode<synchronous>, transform_indices = @transform_2, window_bounds = array<i64: 16, 128>}, {pipeline_mode = #tpu.pipeline_mode<synchronous>, transform_indices = @transform_3, window_bounds = array<i64: 1, 128>}, {pipeline_mode = #tpu.pipeline_mode<synchronous>, transform_indices = @transform_4, window_bounds = array<i64: 8, 128>}, {pipeline_mode = #tpu.pipeline_mode<synchronous>, transform_indices = @transform_5, window_bounds = array<i64: 1, 128>}, {transform_indices = @transform_6, window_bounds = array<i64: 128, 2>}, {transform_indices = @transform_7, window_bounds = array<i64: 1, 128>}, {pipeline_mode = #tpu.pipeline_mode<synchronous>, transform_indices = @transform_8, window_bounds = array<i64: 128, 128>}, {transform_indices = @transform_9, window_bounds = array<i64: 128, 128>}]} {
    %c0_i32 = arith.constant 0 : i32
    %0 = arith.cmpi eq, %arg0, %c0_i32 : i32
    %1 = arith.extui %0 : i1 to i32
    %cst = arith.constant -1.000000e+30 : f32
    %c0_i32_0 = arith.constant 0 : i32
    %2 = arith.cmpi ne, %1, %c0_i32_0 : i32
    scf.if %2 {
      %c0_39 = arith.constant 0 : index
      %c0_40 = arith.constant 0 : index
      %81 = vector.load %arg1[%c0_39, %c0_40] : memref<128x16xf32, #tpu.memory_space<vmem>>, vector<128x16xf32>
      %c0_41 = arith.constant 0 : index
      %c0_42 = arith.constant 0 : index
      %82 = vector.load %arg3[%c0_41, %c0_42] : memref<16x128xf32, #tpu.memory_space<vmem>>, vector<16x128xf32>
      %cst_43 = arith.constant dense<0.000000e+00> : vector<128x128xf32>
      %83 = tpu.matmul %81, %82, %cst_43 {dimension_numbers = #tpu.dot_dimension_numbers<[1], [0], [0], [1], [0, 0, 1, 1], [], []>} : vector<128x16xf32>, vector<16x128xf32>, vector<128x128xf32> -> vector<128x128xf32>
      %c0_44 = arith.constant 0 : index
      %c0_45 = arith.constant 0 : index
      %84 = vector.load %arg4[%c0_44, %c0_45] : memref<1x128xf32, #tpu.memory_space<vmem>>, vector<1x128xf32>
      %85 = vector.broadcast %84 : vector<1x128xf32> to vector<128x128xf32>
      %86 = arith.addf %83, %85 : vector<128x128xf32>
      %c0_46 = arith.constant 0 : index
      %c0_47 = arith.constant 0 : index
      %87 = vector.load %arg11[%c0_46, %c0_47] : memref<128x128xf32, #tpu.memory_space<vmem>>, vector<128x128xf32>
      tpu.vector_store %arg11[%c0_46, %c0_47], %86 {strides = array<i32>} : memref<128x128xf32, #tpu.memory_space<vmem>>, vector<128x128xf32>,
      %88 = arith.truncf %86 : vector<128x128xf32> to vector<128x128xbf16>
      %c0_48 = arith.constant 0 : index
      %c0_49 = arith.constant 0 : index
      %89 = vector.load %arg12[%c0_48, %c0_49] : memref<128x128xbf16, #tpu.memory_space<vmem>>, vector<128x128xbf16>
      tpu.vector_store %arg12[%c0_48, %c0_49], %88 {strides = array<i32>} : memref<128x128xbf16, #tpu.memory_space<vmem>>, vector<128x128xbf16>,
      %90 = vector.extract_strided_slice %86 {offsets = [0, 32], sizes = [128, 1], strides = [1, 1]} : vector<128x128xf32> to vector<128x1xf32>
      %c0_50 = arith.constant 0 : index
      %c0_51 = arith.constant 0 : index
      %91 = vector.load %arg13[%c0_50, %c0_51] : memref<128x1xf32, #tpu.memory_space<vmem>>, vector<128x1xf32>
      tpu.vector_store %arg13[%c0_50, %c0_51], %90 {strides = array<i32>} : memref<128x1xf32, #tpu.memory_space<vmem>>, vector<128x1xf32>,
      %92 = vector.broadcast %cst : f32 to vector<128x1xf32>
      %c0_52 = arith.constant 0 : index
      %c0_53 = arith.constant 0 : index
      %93 = vector.load %arg14[%c0_52, %c0_53] : memref<128x1xf32, #tpu.memory_space<vmem>>, vector<128x1xf32>
      tpu.vector_store %arg14[%c0_52, %c0_53], %92 {strides = array<i32>} : memref<128x1xf32, #tpu.memory_space<vmem>>, vector<128x1xf32>,
      %cst_54 = arith.constant 0.000000e+00 : f32
      %94 = vector.broadcast %cst_54 : f32 to vector<128x128xf32>
      %c0_55 = arith.constant 0 : index
      %c0_56 = arith.constant 0 : index
      %95 = vector.load %arg15[%c0_55, %c0_56] : memref<128x128xf32, #tpu.memory_space<vmem>>, vector<128x128xf32>
      tpu.vector_store %arg15[%c0_55, %c0_56], %94 {strides = array<i32>} : memref<128x128xf32, #tpu.memory_space<vmem>>, vector<128x128xf32>,
    } else {
    }
    %c0 = arith.constant 0 : index
    %c0_1 = arith.constant 0 : index
    %3 = vector.load %arg2[%c0, %c0_1] : memref<128x8xf32, #tpu.memory_space<vmem>>, vector<128x8xf32>
    %c0_2 = arith.constant 0 : index
    %c0_3 = arith.constant 0 : index
    %4 = vector.load %arg5[%c0_2, %c0_3] : memref<8x128xf32, #tpu.memory_space<vmem>>, vector<8x128xf32>
    %cst_4 = arith.constant dense<0.000000e+00> : vector<128x128xf32>
    %5 = tpu.matmul %3, %4, %cst_4 {dimension_numbers = #tpu.dot_dimension_numbers<[1], [0], [0], [1], [0, 0, 1, 1], [], []>} : vector<128x8xf32>, vector<8x128xf32>, vector<128x128xf32> -> vector<128x128xf32>
    %c0_5 = arith.constant 0 : index
    %c0_6 = arith.constant 0 : index
    %6 = vector.load %arg6[%c0_5, %c0_6] : memref<1x128xf32, #tpu.memory_space<vmem>>, vector<1x128xf32>
    %7 = vector.broadcast %6 : vector<1x128xf32> to vector<128x128xf32>
    %8 = arith.addf %5, %7 : vector<128x128xf32>
    %c0_7 = arith.constant 0 : index
    %c0_8 = arith.constant 0 : index
    %9 = vector.load %arg10[%c0_7, %c0_8] : memref<128x128xf32, #tpu.memory_space<vmem>>, vector<128x128xf32>
    tpu.vector_store %arg10[%c0_7, %c0_8], %8 {strides = array<i32>} : memref<128x128xf32, #tpu.memory_space<vmem>>, vector<128x128xf32>,
    %c0_9 = arith.constant 0 : index
    %c0_10 = arith.constant 0 : index
    %10 = vector.load %arg7[%c0_9, %c0_10] : memref<128x2xi32, #tpu.memory_space<vmem>>, vector<128x1xi32>
    %c0_11 = arith.constant 0 : index
    %c1 = arith.constant 1 : index
    %11 = vector.load %arg7[%c0_11, %c1] : memref<128x2xi32, #tpu.memory_space<vmem>>, vector<128x1xi32>
    %c0_12 = arith.constant 0 : index
    %c0_13 = arith.constant 0 : index
    %12 = vector.load %arg8[%c0_12, %c0_13] : memref<1x128xi32, #tpu.memory_space<vmem>>, vector<1x128xi32>
    %13 = tpu.iota {dimensions = array<i32: 1>} : vector<128x128xi32>
    %14 = tpu.iota {dimensions = array<i32: 0>} : vector<128x128xi32>
    %15 = vector.broadcast %10 : vector<128x1xi32> to vector<128x128xi32>
    %16 = arith.cmpi eq, %13, %15 : vector<128x128xi32>
    %17 = arith.extui %16 : vector<128x128xi1> to vector<128x128xi32>
    %18 = arith.sitofp %17 : vector<128x128xi32> to vector<128x128xf32>
    %19 = vector.broadcast %11 : vector<128x1xi32> to vector<128x128xi32>
    %20 = arith.cmpi eq, %13, %19 : vector<128x128xi32>
    %21 = arith.extui %20 : vector<128x128xi1> to vector<128x128xi32>
    %22 = arith.sitofp %21 : vector<128x128xi32> to vector<128x128xf32>
    %23 = arith.truncf %22 : vector<128x128xf32> to vector<128x128xbf16>
    %24 = vector.broadcast %12 : vector<1x128xi32> to vector<128x128xi32>
    %25 = arith.cmpi eq, %14, %24 : vector<128x128xi32>
    %26 = arith.extui %25 : vector<128x128xi1> to vector<128x128xi32>
    %27 = arith.sitofp %26 : vector<128x128xi32> to vector<128x128xf32>
    %28 = arith.truncf %27 : vector<128x128xf32> to vector<128x128xbf16>
    %c0_14 = arith.constant 0 : index
    %c0_15 = arith.constant 0 : index
    %29 = vector.load %arg12[%c0_14, %c0_15] : memref<128x128xbf16, #tpu.memory_space<vmem>>, vector<128x128xbf16>
    %cst_16 = arith.constant dense<0.000000e+00> : vector<128x128xf32>
    %30 = tpu.matmul %23, %29, %cst_16 {dimension_numbers = #tpu.dot_dimension_numbers<[1], [0], [0], [1], [0, 0, 1, 1], [], []>} : vector<128x128xbf16>, vector<128x128xbf16>, vector<128x128xf32> -> vector<128x128xf32>
    %c0_17 = arith.constant 0 : index
    %c0_18 = arith.constant 0 : index
    %31 = vector.load %arg13[%c0_17, %c0_18] : memref<128x1xf32, #tpu.memory_space<vmem>>, vector<128x1xf32>
    %cst_19 = arith.constant dense<0.000000e+00> : vector<128x1xf32>
    %32 = tpu.matmul %18, %31, %cst_19 {dimension_numbers = #tpu.dot_dimension_numbers<[1], [0], [0], [1], [0, 0, 1, 1], [], []>} : vector<128x128xf32>, vector<128x1xf32>, vector<128x1xf32> -> vector<128x1xf32>
    %33 = vector.extract_strided_slice %30 {offsets = [0, 33], sizes = [128, 1], strides = [1, 1]} : vector<128x128xf32> to vector<128x1xf32>
    %34 = arith.addf %32, %33 : vector<128x1xf32>
    %35 = vector.extract_strided_slice %8 {offsets = [0, 32], sizes = [128, 1], strides = [1, 1]} : vector<128x128xf32> to vector<128x1xf32>
    %36 = arith.addf %34, %35 : vector<128x1xf32>
    %cst_20 = arith.constant 0.000000e+00 : f32
    %37 = vector.broadcast %cst_20 : f32 to vector<128x1xf32>
    %38 = arith.cmpf ogt, %36, %37 : vector<128x1xf32>
    %cst_21 = arith.constant 2.000000e-01 : f32
    %39 = vector.broadcast %cst_21 : f32 to vector<128x1xf32>
    %40 = arith.mulf %39, %36 : vector<128x1xf32>
    %41 = arith.select %38, %36, %40 : vector<128x1xi1>, vector<128x1xf32>
    %c0_i32_22 = arith.constant 0 : i32
    %42 = vector.broadcast %c0_i32_22 : i32 to vector<128x1xi32>
    %43 = arith.cmpi sge, %10, %42 : vector<128x1xi32>
    %cst_23 = arith.constant -1.000000e+30 : f32
    %44 = vector.broadcast %cst_23 : f32 to vector<128x1xf32>
    %45 = arith.select %43, %41, %44 : vector<128x1xi1>, vector<128x1xf32>
    %c0_24 = arith.constant 0 : index
    %c0_25 = arith.constant 0 : index
    %46 = vector.load %arg14[%c0_24, %c0_25] : memref<128x1xf32, #tpu.memory_space<vmem>>, vector<128x1xf32>
    %cst_26 = arith.constant -1.000000e+30 : f32
    %47 = vector.shape_cast %45 : vector<128x1xf32> to vector<128x1xf32>
    %48 = vector.broadcast %47 : vector<128x1xf32> to vector<128x128xf32>
    %49 = vector.broadcast %cst_26 : f32 to vector<128x128xf32>
    %50 = arith.select %16, %48, %49 : vector<128x128xi1>, vector<128x128xf32>
    %cst_27 = arith.constant dense<0xFF800000> : vector<128xf32>
    %51 = vector.multi_reduction <maximumf>, %50, %cst_27 [0] : vector<128x128xf32> to vector<128xf32>
    %52 = vector.shape_cast %51 : vector<128xf32> to vector<1x128xf32>
    %53 = tpu.iota {dimensions = array<i32: 0>} : vector<128x128xi32>
    %54 = tpu.iota {dimensions = array<i32: 1>} : vector<128x128xi32>
    %55 = arith.cmpi eq, %53, %54 : vector<128x128xi32>
    %cst_28 = arith.constant -1.000000e+30 : f32
    %56 = vector.shape_cast %52 : vector<1x128xf32> to vector<1x128xf32>
    %57 = vector.broadcast %56 : vector<1x128xf32> to vector<128x128xf32>
    %58 = vector.broadcast %cst_28 : f32 to vector<128x128xf32>
    %59 = arith.select %55, %57, %58 : vector<128x128xi1>, vector<128x128xf32>
    %cst_29 = arith.constant dense<0xFF800000> : vector<128xf32>
    %60 = vector.multi_reduction <maximumf>, %59, %cst_29 [1] : vector<128x128xf32> to vector<128xf32>
    %61 = vector.shape_cast %60 : vector<128xf32> to vector<128x1xf32>
    %62 = arith.maximumf %46, %61 : vector<128x1xf32>
    %63 = arith.subf %46, %62 : vector<128x1xf32>
    %64 = math.exp %63 : vector<128x1xf32>
    %cst_30 = arith.constant dense<0.000000e+00> : vector<128x1xf32>
    %65 = tpu.matmul %18, %62, %cst_30 {dimension_numbers = #tpu.dot_dimension_numbers<[1], [0], [0], [1], [0, 0, 1, 1], [], []>} : vector<128x128xf32>, vector<128x1xf32>, vector<128x1xf32> -> vector<128x1xf32>
    %66 = arith.subf %45, %65 : vector<128x1xf32>
    %67 = math.exp %66 : vector<128x1xf32>
    %68 = vector.broadcast %67 : vector<128x1xf32> to vector<128x128xf32>
    %69 = arith.mulf %68, %30 : vector<128x128xf32>
    %70 = arith.truncf %69 : vector<128x128xf32> to vector<128x128xbf16>
    %c0_31 = arith.constant 0 : index
    %c0_32 = arith.constant 0 : index
    %71 = vector.load %arg15[%c0_31, %c0_32] : memref<128x128xf32, #tpu.memory_space<vmem>>, vector<128x128xf32>
    %72 = vector.broadcast %64 : vector<128x1xf32> to vector<128x128xf32>
    %73 = arith.mulf %72, %71 : vector<128x128xf32>
    %cst_33 = arith.constant dense<0.000000e+00> : vector<128x128xf32>
    %74 = tpu.matmul %28, %70, %cst_33 {dimension_numbers = #tpu.dot_dimension_numbers<[1], [0], [0], [1], [0, 0, 1, 1], [], []>} : vector<128x128xbf16>, vector<128x128xbf16>, vector<128x128xf32> -> vector<128x128xf32>
    %75 = arith.addf %73, %74 : vector<128x128xf32>
    %c0_34 = arith.constant 0 : index
    %c0_35 = arith.constant 0 : index
    %76 = vector.load %arg15[%c0_34, %c0_35] : memref<128x128xf32, #tpu.memory_space<vmem>>, vector<128x128xf32>
    tpu.vector_store %arg15[%c0_34, %c0_35], %75 {strides = array<i32>} : memref<128x128xf32, #tpu.memory_space<vmem>>, vector<128x128xf32>,
    %c0_36 = arith.constant 0 : index
    %c0_37 = arith.constant 0 : index
    %77 = vector.load %arg14[%c0_36, %c0_37] : memref<128x1xf32, #tpu.memory_space<vmem>>, vector<128x1xf32>
    tpu.vector_store %arg14[%c0_36, %c0_37], %62 {strides = array<i32>} : memref<128x1xf32, #tpu.memory_space<vmem>>, vector<128x1xf32>,
    %c2_i32 = arith.constant 2 : i32
    %78 = arith.cmpi eq, %arg0, %c2_i32 : i32
    %79 = arith.extui %78 : i1 to i32
    %c0_i32_38 = arith.constant 0 : i32
    %80 = arith.cmpi ne, %79, %c0_i32_38 : i32
    scf.if %80 {
      %c0_39 = arith.constant 0 : index
      %c0_40 = arith.constant 0 : index
      %81 = vector.load %arg15[%c0_39, %c0_40] : memref<128x128xf32, #tpu.memory_space<vmem>>, vector<128x128xf32>
      %82 = vector.extract_strided_slice %81 {offsets = [0, 34], sizes = [128, 1], strides = [1, 1]} : vector<128x128xf32> to vector<128x1xf32>
      %cst_41 = arith.constant 1.000000e-30 : f32
      %83 = vector.broadcast %cst_41 : f32 to vector<128x1xf32>
      %84 = arith.maximumf %82, %83 : vector<128x1xf32>
      %85 = tpu.reciprocal %84 {approx = true} : vector<128x1xf32> -> vector<128x1xf32>
      %86 = arith.mulf %84, %85 : vector<128x1xf32>
      %cst_42 = arith.constant 2.000000e+00 : f32
      %87 = vector.broadcast %cst_42 : f32 to vector<128x1xf32>
      %88 = arith.subf %87, %86 : vector<128x1xf32>
      %89 = arith.mulf %85, %88 : vector<128x1xf32>
      %90 = vector.broadcast %89 : vector<128x1xf32> to vector<128x128xf32>
      %91 = arith.mulf %81, %90 : vector<128x128xf32>
      %c0_43 = arith.constant 0 : index
      %c0_44 = arith.constant 0 : index
      %92 = vector.load %arg11[%c0_43, %c0_44] : memref<128x128xf32, #tpu.memory_space<vmem>>, vector<128x128xf32>
      %93 = arith.addf %91, %92 : vector<128x128xf32>
      %c0_45 = arith.constant 0 : index
      %c0_46 = arith.constant 0 : index
      %94 = vector.load %arg9[%c0_45, %c0_46] : memref<128x128xf32, #tpu.memory_space<vmem>>, vector<128x128xf32>
      tpu.vector_store %arg9[%c0_45, %c0_46], %93 {strides = array<i32>} : memref<128x128xf32, #tpu.memory_space<vmem>>, vector<128x128xf32>,
    } else {
    }
    return
  }
  func.func @transform_0(%arg0: i32) -> (i32, i32) {
    %c0_i32 = arith.constant 0 : i32
    %c0_i32_0 = arith.constant 0 : i32
    %c0_i32_1 = arith.constant 0 : i32
    return %c0_i32, %c0_i32_0 : i32, i32
  }
  func.func @transform_1(%arg0: i32) -> (i32, i32) {
    %c0_i32 = arith.constant 0 : i32
    %c0_i32_0 = arith.constant 0 : i32
    return %arg0, %c0_i32 : i32, i32
  }
  func.func @transform_2(%arg0: i32) -> (i32, i32) {
    %c0_i32 = arith.constant 0 : i32
    %c0_i32_0 = arith.constant 0 : i32
    %c0_i32_1 = arith.constant 0 : i32
    return %c0_i32, %c0_i32_0 : i32, i32
  }
  func.func @transform_3(%arg0: i32) -> (i32, i32) {
    %c0_i32 = arith.constant 0 : i32
    %c0_i32_0 = arith.constant 0 : i32
    %c0_i32_1 = arith.constant 0 : i32
    return %c0_i32, %c0_i32_0 : i32, i32
  }
  func.func @transform_4(%arg0: i32) -> (i32, i32) {
    %c0_i32 = arith.constant 0 : i32
    %c0_i32_0 = arith.constant 0 : i32
    %c0_i32_1 = arith.constant 0 : i32
    return %c0_i32, %c0_i32_0 : i32, i32
  }
  func.func @transform_5(%arg0: i32) -> (i32, i32) {
    %c0_i32 = arith.constant 0 : i32
    %c0_i32_0 = arith.constant 0 : i32
    %c0_i32_1 = arith.constant 0 : i32
    return %c0_i32, %c0_i32_0 : i32, i32
  }
  func.func @transform_6(%arg0: i32) -> (i32, i32) {
    %c0_i32 = arith.constant 0 : i32
    %c0_i32_0 = arith.constant 0 : i32
    return %arg0, %c0_i32 : i32, i32
  }
  func.func @transform_7(%arg0: i32) -> (i32, i32) {
    %c0_i32 = arith.constant 0 : i32
    %c0_i32_0 = arith.constant 0 : i32
    return %c0_i32, %arg0 : i32, i32
  }
  func.func @transform_8(%arg0: i32) -> (i32, i32) {
    %c0_i32 = arith.constant 0 : i32
    %c0_i32_0 = arith.constant 0 : i32
    %c0_i32_1 = arith.constant 0 : i32
    return %c0_i32, %c0_i32_0 : i32, i32
  }
  func.func @transform_9(%arg0: i32) -> (i32, i32) {
    %c0_i32 = arith.constant 0 : i32
    %c0_i32_0 = arith.constant 0 : i32
    return %arg0, %c0_i32 : i32, i32
  }
}

</mosaic_0001>

<bundles_post_ra>
// kernel: tpu_custom_call.1
= control target key start
LH: loop header
LB: loop body
LE: loop exit
PB: predicated region body
PF: predicated region fallthrough
CT: control target
= control target key end

     0   :  { %15 = vsyncpa [#allocation8], 0  ;;  %s5202_s0 = inlined_call_operand.vmem [shape: f32[128,16], index: 0, kind: input, shape index: {}]   ;;  %s5203_s1 = inlined_call_operand.vmem [shape: f32[384,8], index: 1, kind: input, shape index: {}]   ;;  %s5204_s2 = inlined_call_operand.vmem [shape: f32[16,128], index: 2, kind: input, shape index: {}]   ;;  %s5205_s3 = inlined_call_operand.vmem [shape: f32[1,128], index: 3, kind: input, shape index: {}]   ;;  %s5206_s4 = inlined_call_operand.vmem [shape: f32[8,128], index: 4, kind: input, shape index: {}]   ;;  %s5207_s5 = inlined_call_operand.vmem [shape: f32[1,128], index: 5, kind: input, shape index: {}]   ;;  %s5208_s6 = inlined_call_operand.vmem [shape: s32[384,2], index: 6, kind: input, shape index: {}]   ;;  %s5209_s7 = inlined_call_operand.vmem [shape: s32[1,384], index: 7, kind: input, shape index: {}]   ;;  %s5210_s8 = inlined_call_operand.hbm [shape: f32[128,128], index: 8, kind: output, shape index: {0}]   ;;  %s5211_s9 = inlined_call_operand.hbm [shape: f32[384,128], index: 9, kind: output, shape index: {1}]  }
   0x1   :  { %16 = vsyncpa [#allocation10], 0 }
   0x2   :  { %18 = vsyncpa [#allocation10 + $0x1], 0  ;;  %s3856_s30 = smov 0   ;;  %s3858_s10 = smov 0  }
   0x3   :  { %s3860_s11 = smov 0   ;;  %s3862_s12 = smov 0  }
   0x4 LB: > { %5295 = sst [smem:[#allocation13_spill]] %s3786_s11  ;;  %s3877_s13 = sadd.s32 4294967295, %s3790_s12   ;;  %s3790_s12 = sphi %s3862_s12, %s5438_s12   ;;  %s3786_s11 = sphi %s3860_s11, %s5440_s11   ;;  %s3782_s10 = sphi %s3858_s10, %s5442_s10   ;;  %s3778_s30 = sphi %s3856_s30, %s5441_s30  }
   0x5   : > { %s2941_s14 = sadd.s32 4294967294, %s3790_s12   ;;  %s3881_s15 = sadd.s32 1, %s3790_s12  }
   0x6   : > { %5296 = sst [smem:[#allocation14_spill]] %s3881_s15  ;;  %s235_s16 = sadd.s32 1, %s3786_s11 }
   0x7   : > { %s232_s17 = ssub.s32 %s3790_s12, %s3881_s15  ;;  %p245_p0 = scmp.ne.s32.totalorder %s3786_s11, %s3782_s10 }
   0x8   : > { %p233_p1 = scmp.eq.s32.totalorder %s232_s17, 0  ;;  %p246_p2 = scmp.eq.s32.totalorder %s3877_s13, 2 }
   0x9   : > { %p251_p3 = scmp.ne.s32.totalorder %s3782_s10, %s3778_s30  ;;  %p252_p4 = scmp.eq.s32.totalorder %s2941_s14, 2 }
   0xa   : > { %s3892_s18 = scalar_select %p233_p1, %s3786_s11, %s235_s16  }
   0xb   : > { %p3896_p5 = por %p246_p2, %p245_p0  ;;  %p3900_p6 = por %p252_p4, %p251_p3 }
   0xc   : > { %5297 = sst [smem:[#allocation15_spill]] %s3892_s18  ;;  %p2944_p7 = scmp.ge.s32.totalorder %s3790_s12, 1 }
   0xd   : > { %p309_p8 = scmp.lt.s32.totalorder %s3790_s12, 4 }
   0xf   : > { %p310_p9 = pnand %p2944_p7, %p309_p8 }
  0x11   : > { %313 = sbr.rel (%p310_p9) target bundleno = 2077 (0x81d), region = 52 }
  0x18   : > { %s5212_s21 = sand.u32 1, %s3782_s10   ;;  %s2946_s22 = sshll.u32 %s3877_s13, 4 }
  0x19   : > { %s2945_s23 = sshll.u32 %s5212_s21, 7  ;;  %p354_p10 = scmp.lt.s32.totalorder %s2946_s22, 47 }
  0x1a   : > { %p365_p11 = scmp.lt.s32.totalorder %s3877_s13, 2  ;;  %s3928_s11 = scalar_lea.vmem [#allocation9], %s2945_s23 }
  0x1b   : > { %s5444_s22 = smov (!%p354_p10, %s2946_s22), 47  ;;  %p2950_p12 = scmp.ne.s32.totalorder %s3877_s13, 0 }
  0x1c   : > { %s3912_s24 = scalar_select %p365_p11, %s3877_s13, 2 }
  0x1d   : > { %s2947_s25 = sshll.u32 %s5444_s22, 3  ;;  %373 = sbr.rel (%p2950_p12) target bundleno = 395 (0x18b), region = 56  ;;  %v390_v0 = vld [vmem:[%s5204_s2] sm:$0xff] (!%p2950_p12)  ;;  %v391_v1 = vld [vmem:[%s5204_s2 + $0x8] sm:$0xff] (!%p2950_p12)  ;;  %vm399_vm0 = vcmask (!%p2950_p12), 130048   ;;  %v376_v7 = vld [vmem:[%s5202_s0 + $0x10] sm:$0xff] (!%p2950_p12) }
  0x1e   : > { %s3917_s28 = scalar_lea.vmem %s5203_s1, %s2947_s25  ;;  %s3922_s16 = scalar_lea.vmem %s5208_s6, %s2947_s25  ;;  %v374_v2 = vld [vmem:[%s5202_s0] sm:$0xff] (!%p2950_p12)  ;;  %v3468_v3 = vpack.c.bf16 (!%p2950_p12), %v391_v1, %v390_v0  ;;  %v375_v5 = vld [vmem:[%s5202_s0 + $0x8] sm:$0xff] (!%p2950_p12)  ;;  %v384_v8 = vld [vmem:[%s5202_s0 + $0x50] sm:$0xff] (!%p2950_p12)  ;;  %vm689_vm1 = vcmask (!%p2950_p12), 7168   ;;  %v3792_v19 = vmov (!%p2950_p12), -1e+30  }
  0x1f   : > { %s367_s21 = scalar_lea.vmem %s5209_s7, %s3912_s24  ;;  %3242 = vmatprep.mubr.msk.f32.mxu0 (!%p2950_p12), %vm399_vm0, %v374_v2  ;;  %v382_v4 = vld [vmem:[%s5202_s0 + $0x40] sm:$0xff] (!%p2950_p12)  ;;  %v383_v6 = vld [vmem:[%s5202_s0 + $0x48] sm:$0xff] (!%p2950_p12)  ;;  %v377_v9 = vld [vmem:[%s5202_s0 + $0x18] sm:$0xff] (!%p2950_p12)  ;;  %706 = vst.msk [vmem:[#allocation5] sm:$0xff] (!%p2950_p12), %vm689_vm1, %v3792_v19  ;;  %s3793_s15 = smov (!%p2950_p12), 96   ;;  %v3794_v61 = vmov (!%p2950_p12), 0.0  }
  0x20   : > { %3254 = vmatprep.mubr.msk.f32.mxu1 (!%p2950_p12), %vm399_vm0, %v382_v4  ;;  %3469 = vmatprep.subr.bf16.mxu0 (!%p2950_p12), %v3468_v3  ;;  %v385_v10 = vld [vmem:[%s5202_s0 + $0x58] sm:$0xff] (!%p2950_p12)  ;;  %v378_v11 = vld [vmem:[%s5202_s0 + $0x20] sm:$0xff] (!%p2950_p12)  ;;  %v379_v13 = vld [vmem:[%s5202_s0 + $0x28] sm:$0xff] (!%p2950_p12)  ;;  %707 = vst.msk [vmem:[#allocation5 + $0x8] sm:$0xff] (!%p2950_p12), %vm689_vm1, %v3792_v19 }
  0x21   : > { %3536 = vmatprep.subr.bf16.mxu1 (!%p2950_p12), %v3468_v3  ;;  %3471 = vmatpush3.bf16.msra.mxu0 (!%p2950_p12), %v3468_v3  ;;  %v386_v12 = vld [vmem:[%s5202_s0 + $0x60] sm:$0xff] (!%p2950_p12)  ;;  %v387_v14 = vld [vmem:[%s5202_s0 + $0x68] sm:$0xff] (!%p2950_p12)  ;;  %v380_v15 = vld [vmem:[%s5202_s0 + $0x30] sm:$0xff] (!%p2950_p12)  ;;  %708 = vst.msk [vmem:[#allocation5 + $0x10] sm:$0xff] (!%p2950_p12), %vm689_vm1, %v3792_v19 }
  0x22   : > { %3537 = vmatpush3.bf16.msra.mxu1 (!%p2950_p12), %v3468_v3  ;;  %v388_v16 = vld [vmem:[%s5202_s0 + $0x70] sm:$0xff] (!%p2950_p12)  ;;  %v381_v17 = vld [vmem:[%s5202_s0 + $0x38] sm:$0xff] (!%p2950_p12)  ;;  %709 = vst.msk [vmem:[#allocation5 + $0x18] sm:$0xff] (!%p2950_p12), %vm689_vm1, %v3792_v19  ;;  %710 = vst.msk [vmem:[#allocation5 + $0x20] sm:$0xff] (!%p2950_p12), %vm689_vm1, %v3792_v19 }
  0x23   : > { %v389_v18 = vld [vmem:[%s5202_s0 + $0x78] sm:$0xff] (!%p2950_p12)  ;;  %711 = vst.msk [vmem:[#allocation5 + $0x28] sm:$0xff] (!%p2950_p12), %vm689_vm1, %v3792_v19  ;;  %712 = vst.msk [vmem:[#allocation5 + $0x30] sm:$0xff] (!%p2950_p12), %vm689_vm1, %v3792_v19  ;;  %v4020_v20 = vld [vmem:[%s5205_s3] ss:$0 sm:$0xff] (!%p2950_p12) }
  0x24   : > { %3243 = vmatmul.mubr.msk.f32.vlgmr.msra.gmra.mrb[0].mxu0 %vm399_vm0, %v375_v5  ;;  %713 = vst.msk [vmem:[#allocation5 + $0x38] sm:$0xff] %vm689_vm1, %v3792_v19  ;;  %714 = vst.msk [vmem:[#allocation5 + $0x40] sm:$0xff] %vm689_vm1, %v3792_v19 }
  0x25   : > { %3255 = vmatmul.mubr.msk.f32.vlgmr.msra.gmra.mrb[0].mxu1 %vm399_vm0, %v383_v6  ;;  %3245 = vmatprep.mubr.msk.f32.mxu0 %vm399_vm0, %v376_v7  ;;  %715 = vst.msk [vmem:[#allocation5 + $0x48] sm:$0xff] %vm689_vm1, %v3792_v19  ;;  %716 = vst.msk [vmem:[#allocation5 + $0x50] sm:$0xff] %vm689_vm1, %v3792_v19 }
  0x26   : > { %3257 = vmatprep.mubr.msk.f32.mxu1 %vm399_vm0, %v384_v8  ;;  %717 = vst.msk [vmem:[#allocation5 + $0x58] sm:$0xff] %vm689_vm1, %v3792_v19  ;;  %718 = vst.msk [vmem:[#allocation5 + $0x60] sm:$0xff] %vm689_vm1, %v3792_v19 }
  0x27   : > { %719 = vst.msk [vmem:[#allocation5 + $0x68] sm:$0xff] %vm689_vm1, %v3792_v19  ;;  %720 = vst.msk [vmem:[#allocation5 + $0x70] sm:$0xff] %vm689_vm1, %v3792_v19 }
  0x28   : > { %3246 = vmatmul.mubr.msk.f32.gmra.mrb[2].mxu0 %vm399_vm0, %v377_v9  ;;  %721 = vst.msk [vmem:[#allocation5 + $0x78] sm:$0xff] %vm689_vm1, %v3792_v19  ;;  %722 = vst [vmem:[#allocation6] sm:$0xff] %v3794_v61 }
  0x29   : > { %3258 = vmatmul.mubr.msk.f32.gmra.mrb[2].mxu1 %vm399_vm0, %v385_v10  ;;  %3248 = vmatprep.mubr.msk.f32.mxu0 %vm399_vm0, %v378_v11  ;;  %723 = vst [vmem:[#allocation6 + $0x8] sm:$0xff] %v3794_v61  ;;  %724 = vst [vmem:[#allocation6 + $0x10] sm:$0xff] %v3794_v61 }
  0x2a   : > { %3260 = vmatprep.mubr.msk.f32.mxu1 %vm399_vm0, %v386_v12  ;;  %725 = vst [vmem:[#allocation6 + $0x18] sm:$0xff] %v3794_v61  ;;  %726 = vst [vmem:[#allocation6 + $0x20] sm:$0xff] %v3794_v61 }
  0x2b   : > { %727 = vst [vmem:[#allocation6 + $0x28] sm:$0xff] %v3794_v61  ;;  %728 = vst [vmem:[#allocation6 + $0x30] sm:$0xff] %v3794_v61 }
  0x2c   : > { %3249 = vmatmul.mubr.msk.f32.gmra.mrb[4].mxu0 %vm399_vm0, %v379_v13  ;;  %729 = vst [vmem:[#allocation6 + $0x38] sm:$0xff] %v3794_v61  ;;  %730 = vst [vmem:[#allocation6 + $0x40] sm:$0xff] %v3794_v61 }
  0x2d   : > { %3261 = vmatmul.mubr.msk.f32.gmra.mrb[4].mxu1 %vm399_vm0, %v387_v14  ;;  %3251 = vmatprep.mubr.msk.f32.mxu0 %vm399_vm0, %v380_v15  ;;  %731 = vst [vmem:[#allocation6 + $0x48] sm:$0xff] %v3794_v61  ;;  %732 = vst [vmem:[#allocation6 + $0x50] sm:$0xff] %v3794_v61 }
  0x2e   : > { %3263 = vmatprep.mubr.msk.f32.mxu1 %vm399_vm0, %v388_v16  ;;  %733 = vst [vmem:[#allocation6 + $0x58] sm:$0xff] %v3794_v61  ;;  %734 = vst [vmem:[#allocation6 + $0x60] sm:$0xff] %v3794_v61 }
  0x2f   : > { %735 = vst [vmem:[#allocation6 + $0x68] sm:$0xff] %v3794_v61  ;;  %736 = vst [vmem:[#allocation6 + $0x70] sm:$0xff] %v3794_v61 }
  0x30   : > { %3252 = vmatmul.mubr.msk.f32.gmra.mrb[6].mxu0 %vm399_vm0, %v381_v17  ;;  %737 = vst [vmem:[#allocation6 + $0x78] sm:$0xff] %v3794_v61 }
  0x31   : > { %3264 = vmatmul.mubr.msk.f32.gmra.mrb[6].mxu1 %vm399_vm0, %v389_v18 }
  0xf7   : > { %v3244_v21 = vpop.f32.mrb[0].mxu0 }
  0xf8   : > { %v3256_v22 = vpop.f32.mrb[0].mxu1  ;;  %v520_v23 = vadd.f32 %v3244_v21, %v4020_v20  ;;  %v514_v25 = vpop.f32.mrb[1].mxu0 }
  0xf9   : > { %v560_v24 = vadd.f32 %v3256_v22, %v4020_v20  ;;  %v554_v26 = vpop.f32.mrb[1].mxu1  ;;  %v515_v27 = vadd.f32 %v4020_v20, %v514_v25 }
  0xfa   : > { %v555_v28 = vadd.f32 %v4020_v20, %v554_v26  ;;  %594 = vst [vmem:[#allocation2 + $0x8] sm:$0xff] %v520_v23  ;;  %643 = vrot.lane.b32.xlu0 %v520_v23, %s3793_s15 }
  0xfb   : > { %602 = vst [vmem:[#allocation2 + $0x48] sm:$0xff] %v560_v24  ;;  %659 = vrot.lane.b32.xlu1 %v560_v24, %s3793_s15  ;;  %593 = vst [vmem:[#allocation2] sm:$0xff] %v515_v27  ;;  %v609_v29 = vpack.c.bf16 %v520_v23, %v515_v27  ;;  %v3247_v31 = vpop.f32.mrb[2].mxu0 }
  0xfc   : > { %601 = vst [vmem:[#allocation2 + $0x40] sm:$0xff] %v555_v28  ;;  %v613_v30 = vpack.c.bf16 %v560_v24, %v555_v28  ;;  %v3259_v32 = vpop.f32.mrb[2].mxu1  ;;  %v530_v33 = vadd.f32 %v3247_v31, %v4020_v20  ;;  %v524_v34 = vpop.f32.mrb[3].mxu0 }
  0xfd   : > { %v570_v35 = vadd.f32 %v3259_v32, %v4020_v20  ;;  %v564_v36 = vpop.f32.mrb[3].mxu1  ;;  %617 = vst [vmem:[#allocation3] sm:$0xff] %v609_v29  ;;  %v525_v37 = vadd.f32 %v4020_v20, %v524_v34 }
  0xfe   : > { %621 = vst [vmem:[#allocation3 + $0x20] sm:$0xff] %v613_v30  ;;  %v565_v38 = vadd.f32 %v4020_v20, %v564_v36  ;;  %596 = vst [vmem:[#allocation2 + $0x18] sm:$0xff] %v530_v33  ;;  %641 = vrot.lane.b32.xlu0 %v515_v27, %s3793_s15 }
  0xff   : > { %604 = vst [vmem:[#allocation2 + $0x58] sm:$0xff] %v570_v35  ;;  %647 = vrot.lane.b32.xlu1 %v530_v33, %s3793_s15  ;;  %595 = vst [vmem:[#allocation2 + $0x10] sm:$0xff] %v525_v37  ;;  %v610_v39 = vpack.c.bf16 %v530_v33, %v525_v37  ;;  %v3250_v41 = vpop.f32.mrb[4].mxu0 }
 0x100   : > { %603 = vst [vmem:[#allocation2 + $0x50] sm:$0xff] %v565_v38  ;;  %v614_v40 = vpack.c.bf16 %v570_v35, %v565_v38  ;;  %v3262_v42 = vpop.f32.mrb[4].mxu1  ;;  %v540_v43 = vadd.f32 %v3250_v41, %v4020_v20  ;;  %v534_v44 = vpop.f32.mrb[5].mxu0 }
 0x101   : > { %v580_v45 = vadd.f32 %v3262_v42, %v4020_v20  ;;  %v574_v46 = vpop.f32.mrb[5].mxu1  ;;  %618 = vst [vmem:[#allocation3 + $0x8] sm:$0xff] %v610_v39  ;;  %v535_v47 = vadd.f32 %v4020_v20, %v534_v44 }
 0x102   : > { %622 = vst [vmem:[#allocation3 + $0x28] sm:$0xff] %v614_v40  ;;  %v575_v48 = vadd.f32 %v4020_v20, %v574_v46  ;;  %657 = vrot.lane.b32.xlu0 %v555_v28, %s3793_s15  ;;  %598 = vst [vmem:[#allocation2 + $0x28] sm:$0xff] %v540_v43 }
 0x103   : > { %663 = vrot.lane.b32.xlu1 %v570_v35, %s3793_s15  ;;  %606 = vst [vmem:[#allocation2 + $0x68] sm:$0xff] %v580_v45  ;;  %597 = vst [vmem:[#allocation2 + $0x20] sm:$0xff] %v535_v47  ;;  %v611_v49 = vpack.c.bf16 %v540_v43, %v535_v47  ;;  %v3253_v51 = vpop.f32.mrb[6].mxu0 }
 0x104   : > { %605 = vst [vmem:[#allocation2 + $0x60] sm:$0xff] %v575_v48  ;;  %v615_v50 = vpack.c.bf16 %v580_v45, %v575_v48  ;;  %v3265_v52 = vpop.f32.mrb[6].mxu1  ;;  %v550_v53 = vadd.f32 %v3253_v51, %v4020_v20  ;;  %v544_v54 = vpop.f32.mrb[7].mxu0 }
 0x105   : > { %v590_v55 = vadd.f32 %v3265_v52, %v4020_v20  ;;  %v584_v56 = vpop.f32.mrb[7].mxu1  ;;  %619 = vst [vmem:[#allocation3 + $0x10] sm:$0xff] %v611_v49  ;;  %v545_v57 = vadd.f32 %v4020_v20, %v544_v54 }
 0x106   : > { %623 = vst [vmem:[#allocation3 + $0x30] sm:$0xff] %v615_v50  ;;  %v585_v58 = vadd.f32 %v4020_v20, %v584_v56  ;;  %661 = vrot.lane.b32.xlu0 %v565_v38, %s3793_s15  ;;  %600 = vst [vmem:[#allocation2 + $0x38] sm:$0xff] %v550_v53 }
 0x107   : > { %645 = vrot.lane.b32.xlu1 %v525_v37, %s3793_s15  ;;  %608 = vst [vmem:[#allocation2 + $0x78] sm:$0xff] %v590_v55  ;;  %599 = vst [vmem:[#allocation2 + $0x30] sm:$0xff] %v545_v57  ;;  %v612_v59 = vpack.c.bf16 %v550_v53, %v545_v57 }
 0x108   : > { %607 = vst [vmem:[#allocation2 + $0x70] sm:$0xff] %v585_v58  ;;  %v616_v60 = vpack.c.bf16 %v590_v55, %v585_v58 }
 0x109   : > { %620 = vst [vmem:[#allocation3 + $0x18] sm:$0xff] %v612_v59 }
 0x10a   : > { %624 = vst [vmem:[#allocation3 + $0x38] sm:$0xff] %v616_v60  ;;  %649 = vrot.lane.b32.xlu0 %v535_v47, %s3793_s15 }
 0x10b   : > { %651 = vrot.lane.b32.xlu1 %v540_v43, %s3793_s15 }
 0x10e   : > { %665 = vrot.lane.b32.xlu0 %v575_v48, %s3793_s15 }
 0x10f   : > { %667 = vrot.lane.b32.xlu1 %v580_v45, %s3793_s15 }
 0x112   : > { %653 = vrot.lane.b32.xlu0 %v545_v57, %s3793_s15 }
 0x113   : > { %655 = vrot.lane.b32.xlu1 %v550_v53, %s3793_s15 }
 0x116   : > { %669 = vrot.lane.b32.xlu0 %v585_v58, %s3793_s15 }
 0x117   : > { %671 = vrot.lane.b32.xlu1 %v590_v55, %s3793_s15 }
 0x16c   : > { %v644_v63 = vpop.permute.xlu0 %643 }
 0x16d   : > { %v660_v62 = vpop.permute.xlu1 %659  ;;  %691 = vst.msk [vmem:[#allocation4 + $0x8] sm:$0xff] %vm689_vm1, %v644_v63 }
 0x16e   : > { %699 = vst.msk [vmem:[#allocation4 + $0x48] sm:$0xff] %vm689_vm1, %v660_v62 }
 0x170   : > { %v642_v1 = vpop.permute.xlu0 %641 }
 0x171   : > { %v648_v0 = vpop.permute.xlu1 %647  ;;  %690 = vst.msk [vmem:[#allocation4] sm:$0xff] %vm689_vm1, %v642_v1 }
 0x172   : > { %693 = vst.msk [vmem:[#allocation4 + $0x18] sm:$0xff] %vm689_vm1, %v648_v0 }
 0x174   : > { %v658_v3 = vpop.permute.xlu0 %657 }
 0x175   : > { %v664_v2 = vpop.permute.xlu1 %663  ;;  %698 = vst.msk [vmem:[#allocation4 + $0x40] sm:$0xff] %vm689_vm1, %v658_v3 }
 0x176   : > { %701 = vst.msk [vmem:[#allocation4 + $0x58] sm:$0xff] %vm689_vm1, %v664_v2 }
 0x178   : > { %v662_v5 = vpop.permute.xlu0 %661 }
 0x179   : > { %v646_v4 = vpop.permute.xlu1 %645  ;;  %700 = vst.msk [vmem:[#allocation4 + $0x50] sm:$0xff] %vm689_vm1, %v662_v5 }
 0x17a   : > { %692 = vst.msk [vmem:[#allocation4 + $0x10] sm:$0xff] %vm689_vm1, %v646_v4 }
 0x17c   : > { %v650_v7 = vpop.permute.xlu0 %649 }
 0x17d   : > { %v652_v6 = vpop.permute.xlu1 %651  ;;  %694 = vst.msk [vmem:[#allocation4 + $0x20] sm:$0xff] %vm689_vm1, %v650_v7 }
 0x17e   : > { %695 = vst.msk [vmem:[#allocation4 + $0x28] sm:$0xff] %vm689_vm1, %v652_v6 }
 0x180   : > { %v666_v9 = vpop.permute.xlu0 %665 }
 0x181   : > { %v668_v8 = vpop.permute.xlu1 %667  ;;  %702 = vst.msk [vmem:[#allocation4 + $0x60] sm:$0xff] %vm689_vm1, %v666_v9 }
 0x182   : > { %703 = vst.msk [vmem:[#allocation4 + $0x68] sm:$0xff] %vm689_vm1, %v668_v8 }
 0x184   : > { %v654_v11 = vpop.permute.xlu0 %653 }
 0x185   : > { %v656_v10 = vpop.permute.xlu1 %655  ;;  %696 = vst.msk [vmem:[#allocation4 + $0x30] sm:$0xff] %vm689_vm1, %v654_v11 }
 0x186   : > { %697 = vst.msk [vmem:[#allocation4 + $0x38] sm:$0xff] %vm689_vm1, %v656_v10 }
 0x188   : > { %v670_v13 = vpop.permute.xlu0 %669 }
 0x189   : > { %v672_v12 = vpop.permute.xlu1 %671  ;;  %704 = vst.msk [vmem:[#allocation4 + $0x70] sm:$0xff] %vm689_vm1, %v670_v13 }
 0x18a   : > { %705 = vst.msk [vmem:[#allocation4 + $0x78] sm:$0xff] %vm689_vm1, %v672_v12 }
 0x18b PF: > { %v4071_v14 = vld [vmem:[%s3922_s16 + $0x10] sm:$0xff]  ;;  %v4074_v15 = vld [vmem:[%s3922_s16] sm:$0xff]  ;;  %v3795_v16 = vmov 1   ;;  %v4079_v17 = vld [vmem:[%s3922_s16 + $0x18] sm:$0xff]  ;;  %vm762_vm2 = vcmask 64512   ;;  %v3796_v54 = vmov 0  }
 0x18c   : > { %3597 = vset.pattern.permute.xlu1 %v3795_v16  ;;  %3596 = vset.pattern.permute.xlu0 %v3795_v16  ;;  %v4082_v18 = vld [vmem:[%s3922_s16 + $0x8] sm:$0xff]  ;;  %v754_v19 = vld [vmem:[%s5206_s4] sm:$0xff]  ;;  %v740_v26 = vld [vmem:[%s3917_s28 + $0x10] sm:$0xff]  ;;  %s3799_s22 = smov 96   ;;  %s3800_s26 = smov 95  }
 0x18d   : > { %1111 = vperm.xlu1 %3597, %v4071_v14   ;;  %1105 = vperm.xlu0 %3596, %v4074_v15   ;;  %v1268_v20 = vld [vmem:[#allocation3] sm:$0xff]  ;;  %v739_v22 = vld [vmem:[%s3917_s28 + $0x8] sm:$0xff]  ;;  %v741_v27 = vld [vmem:[%s3917_s28 + $0x18] sm:$0xff]  ;;  %p3098_p13 = scmp.ne.s32.totalorder %s3877_s13, 2 }
 0x18e   : > { %v738_v21 = vld [vmem:[%s3917_s28] sm:$0xff]  ;;  %v4092_v23 = vld [vmem:[%s3922_s16 + $0x28] sm:$0xff]  ;;  %3266 = vmatprep.subr.mxu0 %v754_v19  ;;  %3292 = vmatprep.subr.bf16.mxu1 %v1268_v20  ;;  %v4104_v28 = vld [vmem:[%s3922_s16 + $0x38] sm:$0xff] }
 0x18f   : > { %v4095_v24 = vld [vmem:[%s3922_s16 + $0x20] sm:$0xff]  ;;  %3267 = vmatpush3.msra.mxu0 %v754_v19  ;;  %3268 = vmatprep.mubr.msk.f32.mxu0 %vm762_vm2, %v738_v21  ;;  %v1269_v25 = vld [vmem:[#allocation3 + $0x8] sm:$0xff]  ;;  %v4107_v29 = vld [vmem:[%s3922_s16 + $0x30] sm:$0xff]  ;;  %v5220_v21 = vlaneseq }
 0x190   : > { %3293 = vmatpush3.bf16.msra.mxu1 %v1268_v20  ;;  %3269 = vmatmul.mubr.msk.f32.vlgmr.msra.gmra.mrb[0].mxu0 %vm762_vm2, %v739_v22  ;;  %v1270_v30 = vld [vmem:[#allocation3 + $0x10] sm:$0xff]  ;;  %v742_v31 = vld [vmem:[%s3917_s28 + $0x20] sm:$0xff]  ;;  %v743_v32 = vld [vmem:[%s3917_s28 + $0x28] sm:$0xff] }
 0x191   : > { %1114 = vperm.xlu1 %3597, %v4079_v17   ;;  %1108 = vperm.xlu0 %3596, %v4082_v18   ;;  %v4116_v33 = vld [vmem:[%s3922_s16 + $0x48] sm:$0xff]  ;;  %v4119_v34 = vld [vmem:[%s3922_s16 + $0x40] sm:$0xff]  ;;  %v1271_v35 = vld [vmem:[#allocation3 + $0x18] sm:$0xff] }
 0x192   : > { %3294 = vmatprep.subr.bf16.mxu1 %v1269_v25  ;;  %3271 = vmatprep.mubr.msk.f32.mxu0 %vm762_vm2, %v740_v26  ;;  %v744_v36 = vld [vmem:[%s3917_s28 + $0x30] sm:$0xff]  ;;  %v745_v37 = vld [vmem:[%s3917_s28 + $0x38] sm:$0xff]  ;;  %v1272_v40 = vld [vmem:[#allocation3 + $0x20] sm:$0xff]  ;;  %v4186_v26 = vand.u32 127, %v5220_v21 }
 0x193   : > { %v4128_v38 = vld [vmem:[%s3922_s16 + $0x58] sm:$0xff]  ;;  %v4131_v39 = vld [vmem:[%s3922_s16 + $0x50] sm:$0xff]  ;;  %v746_v41 = vld [vmem:[%s3917_s28 + $0x40] sm:$0xff] }
 0x194   : > { %3295 = vmatpush3.bf16.msra.mxu1 %v1269_v25  ;;  %3272 = vmatmul.mubr.msk.f32.gmra.mrb[2].mxu0 %vm762_vm2, %v741_v27  ;;  %v747_v42 = vld [vmem:[%s3917_s28 + $0x48] sm:$0xff]  ;;  %v4143_v44 = vld [vmem:[%s3922_s16 + $0x60] sm:$0xff]  ;;  %v748_v45 = vld [vmem:[%s3917_s28 + $0x50] sm:$0xff] }
 0x195   : > { %1120 = vperm.xlu1 %3597, %v4092_v23   ;;  %1117 = vperm.xlu0 %3596, %v4095_v24   ;;  %v4140_v43 = vld [vmem:[%s3922_s16 + $0x68] sm:$0xff]  ;;  %v749_v47 = vld [vmem:[%s3917_s28 + $0x58] sm:$0xff]  ;;  %v4155_v49 = vld [vmem:[%s3922_s16 + $0x70] sm:$0xff] }
 0x196   : > { %3296 = vmatprep.subr.bf16.mxu1 %v1270_v30  ;;  %3274 = vmatprep.mubr.msk.f32.mxu0 %vm762_vm2, %v742_v31  ;;  %v1273_v46 = vld [vmem:[#allocation3 + $0x28] sm:$0xff]  ;;  %v4152_v48 = vld [vmem:[%s3922_s16 + $0x78] sm:$0xff]  ;;  %v1274_v50 = vld [vmem:[#allocation3 + $0x30] sm:$0xff]  ;;  %v5216_v31 = vmov 1.0|1.0  }
 0x197   : > { %v750_v51 = vld [vmem:[%s3917_s28 + $0x60] sm:$0xff]  ;;  %v751_v52 = vld [vmem:[%s3917_s28 + $0x68] sm:$0xff]  ;;  %v1275_v53 = vld [vmem:[#allocation3 + $0x38] sm:$0xff] }
 0x198   : > { %3297 = vmatpush3.bf16.msra.mxu1 %v1270_v30  ;;  %3275 = vmatmul.mubr.msk.f32.gmra.mrb[4].mxu0 %vm762_vm2, %v743_v32  ;;  %v752_v55 = vld [vmem:[%s3917_s28 + $0x70] sm:$0xff]  ;;  %v753_v56 = vld [vmem:[%s3917_s28 + $0x78] sm:$0xff]  ;;  %v1373_v57 = vld [vmem:[#allocation4] sm:$0xff] }
 0x199   : > { %1126 = vperm.xlu1 %3597, %v4104_v28   ;;  %1123 = vperm.xlu0 %3596, %v4107_v29   ;;  %v1374_v58 = vld [vmem:[#allocation4 + $0x8] sm:$0xff]  ;;  %v1375_v59 = vld [vmem:[#allocation4 + $0x10] sm:$0xff]  ;;  %v1376_v60 = vld [vmem:[#allocation4 + $0x18] sm:$0xff] }
 0x19a   : > { %3298 = vmatprep.subr.bf16.mxu1 %v1271_v35  ;;  %3277 = vmatprep.mubr.msk.f32.mxu0 %vm762_vm2, %v744_v36  ;;  %v3472_v61 = vpack.c.bf16 %v1374_v58, %v1373_v57  ;;  %v3476_v62 = vpack.c.bf16 %v1376_v60, %v1375_v59  ;;  %v1377_v63 = vld [vmem:[#allocation4 + $0x20] sm:$0xff]  ;;  %v1378_v0 = vld [vmem:[#allocation4 + $0x28] sm:$0xff]  ;;  %v1379_v2 = vld [vmem:[#allocation4 + $0x30] sm:$0xff] }
 0x19b   : > { %v3480_v1 = vpack.c.bf16 %v1378_v0, %v1377_v63  ;;  %v1380_v3 = vld [vmem:[#allocation4 + $0x38] sm:$0xff]  ;;  %v1381_v5 = vld [vmem:[#allocation4 + $0x40] sm:$0xff]  ;;  %v1382_v6 = vld [vmem:[#allocation4 + $0x48] sm:$0xff] }
 0x19c   : > { %3299 = vmatpush3.bf16.msra.mxu1 %v1271_v35  ;;  %3278 = vmatmul.mubr.msk.f32.gmra.mrb[6].mxu0 %vm762_vm2, %v745_v37  ;;  %v3484_v4 = vpack.c.bf16 %v1380_v3, %v1379_v2  ;;  %v3488_v7 = vpack.c.bf16 %v1382_v6, %v1381_v5  ;;  %v1383_v8 = vld [vmem:[#allocation4 + $0x50] sm:$0xff]  ;;  %v1384_v9 = vld [vmem:[#allocation4 + $0x58] sm:$0xff]  ;;  %v1385_v11 = vld [vmem:[#allocation4 + $0x60] sm:$0xff] }
 0x19d   : > { %1132 = vperm.xlu1 %3597, %v4116_v33   ;;  %1129 = vperm.xlu0 %3596, %v4119_v34   ;;  %v3492_v10 = vpack.c.bf16 %v1384_v9, %v1383_v8  ;;  %v1386_v12 = vld [vmem:[#allocation4 + $0x68] sm:$0xff]  ;;  %v1387_v16 = vld [vmem:[#allocation4 + $0x70] sm:$0xff]  ;;  %v1388_v19 = vld [vmem:[#allocation4 + $0x78] sm:$0xff] }
 0x19e   : > { %3300 = vmatprep.subr.bf16.mxu1 %v1272_v40  ;;  %3280 = vmatprep.mubr.msk.f32.mxu0 %vm762_vm2, %v746_v41  ;;  %v3496_v13 = vpack.c.bf16 %v1386_v12, %v1385_v11  ;;  %v3500_v20 = vpack.c.bf16 %v1388_v19, %v1387_v16  ;;  %v2968_v5 = vld [vmem:[%s5207_s5] ss:$0 sm:$0xff] }
 0x19f   : > { %3473 = vmatprep.subr.bf16.mxu0 %v3472_v61 }
 0x1a0   : > { %3301 = vmatpush3.bf16.msra.mxu1 %v1272_v40  ;;  %3281 = vmatmul.mubr.msk.f32.gmra.mrb[8].mxu0 %vm762_vm2, %v747_v42 }
 0x1a1   : > { %1138 = vperm.xlu1 %3597, %v4128_v38   ;;  %1135 = vperm.xlu0 %3596, %v4131_v39  }
 0x1a2   : > { %3283 = vmatprep.mubr.msk.f32.mxu0 %vm762_vm2, %v748_v45  ;;  %3302 = vmatprep.subr.bf16.mxu1 %v1273_v46 }
 0x1a3   : > { %3475 = vmatpush3.bf16.msra.mxu0 %v3472_v61 }
 0x1a4   : > { %3284 = vmatmul.mubr.msk.f32.gmra.mrb[10].mxu0 %vm762_vm2, %v749_v47  ;;  %3303 = vmatpush3.bf16.msra.mxu1 %v1273_v46 }
 0x1a5   : > { %1144 = vperm.xlu1 %3597, %v4140_v43   ;;  %1141 = vperm.xlu0 %3596, %v4143_v44  }
 0x1a6   : > { %3304 = vmatprep.subr.bf16.mxu1 %v1274_v50  ;;  %3286 = vmatprep.mubr.msk.f32.mxu0 %vm762_vm2, %v750_v51 }
 0x1a7   : > { %3477 = vmatprep.subr.bf16.mxu0 %v3476_v62 }
 0x1a8   : > { %3287 = vmatmul.mubr.msk.f32.gmra.mrb[12].mxu0 %vm762_vm2, %v751_v52  ;;  %3305 = vmatpush3.bf16.msra.mxu1 %v1274_v50 }
 0x1a9   : > { %1150 = vperm.xlu1 %3597, %v4152_v48   ;;  %1147 = vperm.xlu0 %3596, %v4155_v49  }
 0x1aa   : > { %3306 = vmatprep.subr.bf16.mxu1 %v1275_v53  ;;  %3289 = vmatprep.mubr.msk.f32.mxu0 %vm762_vm2, %v752_v55 }
 0x1ab   : > { %3479 = vmatpush3.bf16.msra.mxu0 %v3476_v62 }
 0x1ac   : > { %3307 = vmatpush3.bf16.msra.mxu1 %v1275_v53  ;;  %3290 = vmatmul.mubr.msk.f32.gmra.mrb[14].mxu0 %vm762_vm2, %v753_v56 }
 0x1ad   : > { %3599 = vset.pattern.permute.xlu1 %v3796_v54  ;;  %3598 = vset.pattern.permute.xlu0 %v3796_v54  ;;  %v5218_v54 = vmov 1.0  }
 0x1ae   : > { %1012 = vperm.xlu1 %3599, %v4082_v18   ;;  %1009 = vperm.xlu0 %3598, %v4074_v15  }
 0x1af   : > { %3481 = vmatprep.subr.bf16.mxu0 %v3480_v1 }
 0x1b0   : > { %3483 = vmatpush3.bf16.msra.mxu0 %v3480_v1 }
 0x1b1   : > { %3485 = vmatprep.subr.bf16.mxu0 %v3484_v4 }
 0x1b2   : > { %1015 = vperm.xlu1 %3599, %v4071_v14   ;;  %1018 = vperm.xlu0 %3598, %v4079_v17  }
 0x1b4   : > { %3487 = vmatpush3.bf16.msra.mxu0 %v3484_v4 }
 0x1b5   : > { %3489 = vmatprep.subr.bf16.mxu0 %v3488_v7 }
 0x1b6   : > { %1021 = vperm.xlu1 %3599, %v4095_v24   ;;  %1024 = vperm.xlu0 %3598, %v4092_v23  }
 0x1b8   : > { %3491 = vmatpush3.bf16.msra.mxu0 %v3488_v7 }
 0x1b9   : > { %3493 = vmatprep.subr.bf16.mxu0 %v3492_v10 }
 0x1ba   : > { %1027 = vperm.xlu1 %3599, %v4107_v29   ;;  %1030 = vperm.xlu0 %3598, %v4104_v28  }
 0x1bc   : > { %3495 = vmatpush3.bf16.msra.mxu0 %v3492_v10 }
 0x1bd   : > { %3497 = vmatprep.subr.bf16.mxu0 %v3496_v13 }
 0x1be   : > { %1033 = vperm.xlu1 %3599, %v4119_v34   ;;  %1036 = vperm.xlu0 %3598, %v4116_v33  }
 0x1c0   : > { %3499 = vmatpush3.bf16.msra.mxu0 %v3496_v13 }
 0x1c1   : > { %3501 = vmatprep.subr.bf16.mxu0 %v3500_v20 }
 0x1c2   : > { %1039 = vperm.xlu1 %3599, %v4131_v39   ;;  %1042 = vperm.xlu0 %3598, %v4128_v38  }
 0x1c4   : > { %3503 = vmatpush3.bf16.msra.mxu0 %v3500_v20 }
 0x1c6   : > { %1045 = vperm.xlu1 %3599, %v4143_v44   ;;  %1048 = vperm.xlu0 %3598, %v4140_v43  }
 0x1ca   : > { %1051 = vperm.xlu1 %3599, %v4155_v49   ;;  %1054 = vperm.xlu0 %3598, %v4152_v48  }
 0x20c   : > { %v1112_v22 = vpop.permute.xlu1 %1111  ;;  %v1106_v25 = vpop.permute.xlu0 %1105 }
 0x20d   : > { %vm1154_vm3 = vcmp.eq.s32.totalorder %v4186_v26, %v1112_v22  ;;  %vm1152_vm7 = vcmp.eq.s32.totalorder %v4186_v26, %v1106_v25 }
 0x210   : > { %v1115_v27 = vpop.permute.xlu1 %1114  ;;  %v1109_v30 = vpop.permute.xlu0 %1108 }
 0x211   : > { %vm1155_vm4 = vcmp.eq.s32.totalorder %v4186_v26, %v1115_v27  ;;  %vm1153_vm5 = vcmp.eq.s32.totalorder %v4186_v26, %v1109_v30 }
 0x212   : > { %vm3036_vm6 = vmpackc.low %vm1155_vm4, %vm1154_vm3 }
 0x213   : > { %vm3034_vm8 = vmpackc.low %vm1153_vm5, %vm1152_vm7 }
 0x214   : > { %3308 = vmatprep.mubr.msk.bf16.mxu1 %vm3034_vm8, %v5216_v31  ;;  %v1121_v32 = vpop.permute.xlu1 %1120  ;;  %v1118_v35 = vpop.permute.xlu0 %1117 }
 0x215   : > { %vm1157_vm9 = vcmp.eq.s32.totalorder %v4186_v26, %v1121_v32  ;;  %3309 = vmatmul.mubr.msk.bf16.vlgmr.msra.gmra.mrb[0].mxu1 %vm3036_vm6, %v5216_v31  ;;  %vm1156_vm10 = vcmp.eq.s32.totalorder %v4186_v26, %v1118_v35 }
 0x216   : > { %vm3038_vm11 = vmpackc.low %vm1157_vm9, %vm1156_vm10 }
 0x217   : > { %3312 = vmatprep.mubr.msk.bf16.mxu1 %vm3038_vm11, %v5216_v31 }
 0x218   : > { %v1127_v36 = vpop.permute.xlu1 %1126  ;;  %v1124_v37 = vpop.permute.xlu0 %1123 }
 0x219   : > { %vm1159_vm12 = vcmp.eq.s32.totalorder %v4186_v26, %v1127_v36  ;;  %vm1158_vm13 = vcmp.eq.s32.totalorder %v4186_v26, %v1124_v37 }
 0x21a   : > { %vm3040_vm14 = vmpackc.low %vm1159_vm12, %vm1158_vm13 }
 0x21c   : > { %v1133_v40 = vpop.permute.xlu1 %1132  ;;  %v1130_v41 = vpop.permute.xlu0 %1129 }
 0x21d   : > { %vm1161_vm15 = vcmp.eq.s32.totalorder %v4186_v26, %v1133_v40  ;;  %3313 = vmatmul.mubr.msk.bf16.gmra.mrb[4].mxu1 %vm3040_vm14, %v5216_v31  ;;  %vm1160_vm0 = vcmp.eq.s32.totalorder %v4186_v26, %v1130_v41 }
 0x21e   : > { %vm3042_vm1 = vmpackc.low %vm1161_vm15, %vm1160_vm0 }
 0x21f   : > { %3316 = vmatprep.mubr.msk.bf16.mxu1 %vm3042_vm1, %v5216_v31 }
 0x220   : > { %v1139_v42 = vpop.permute.xlu1 %1138  ;;  %v1136_v45 = vpop.permute.xlu0 %1135 }
 0x221   : > { %vm1163_vm2 = vcmp.eq.s32.totalorder %v4186_v26, %v1139_v42  ;;  %vm1162_vm3 = vcmp.eq.s32.totalorder %v4186_v26, %v1136_v45 }
 0x222   : > { %vm3044_vm4 = vmpackc.low %vm1163_vm2, %vm1162_vm3 }
 0x224   : > { %v1145_v46 = vpop.permute.xlu1 %1144  ;;  %v1142_v47 = vpop.permute.xlu0 %1141 }
 0x225   : > { %vm1165_vm5 = vcmp.eq.s32.totalorder %v4186_v26, %v1145_v46  ;;  %3317 = vmatmul.mubr.msk.bf16.gmra.mrb[8].mxu1 %vm3044_vm4, %v5216_v31  ;;  %vm1164_vm6 = vcmp.eq.s32.totalorder %v4186_v26, %v1142_v47 }
 0x226   : > { %vm3046_vm7 = vmpackc.low %vm1165_vm5, %vm1164_vm6 }
 0x227   : > { %3320 = vmatprep.mubr.msk.bf16.mxu1 %vm3046_vm7, %v5216_v31 }
 0x228   : > { %v1151_v50 = vpop.permute.xlu1 %1150  ;;  %v1148_v51 = vpop.permute.xlu0 %1147 }
 0x229   : > { %vm1167_vm8 = vcmp.eq.s32.totalorder %v4186_v26, %v1151_v50  ;;  %vm1166_vm9 = vcmp.eq.s32.totalorder %v4186_v26, %v1148_v51 }
 0x22a   : > { %vm3048_vm10 = vmpackc.low %vm1167_vm8, %vm1166_vm9 }
 0x22d   : > { %3321 = vmatmul.mubr.msk.bf16.gmra.mrb[12].mxu1 %vm3048_vm10, %v5216_v31  ;;  %v4212_v52 = vpop.permute.xlu1 %1012  ;;  %v4214_v53 = vpop.permute.xlu0 %1009 }
 0x22e   : > { %5300 = vst [vmem:[#allocation16_spill] sm:$0xff] %v4212_v52  ;;  %5301 = vst [vmem:[#allocation17_spill] sm:$0xff] %v4214_v53  ;;  %vm1057_vm11 = vcmp.eq.s32.totalorder %v4186_v26, %v4212_v52  ;;  %vm1056_vm12 = vcmp.eq.s32.totalorder %v4186_v26, %v4214_v53 }
 0x22f   : > { %3356 = vmatprep.mubr.msk.f32.mxu0 %vm1056_vm12, %v5218_v54  ;;  %3412 = vmatprep.mubr.msk.f32.mxu1 %vm1056_vm12, %v5218_v54 }
 0x230   : > { %3357 = vmatmul.mubr.msk.f32.vlgmr.msra.gmra.mrb[16].mxu0 %vm1057_vm11, %v5218_v54 }
 0x231   : > { %v4232_v55 = vpop.permute.xlu1 %1015  ;;  %v4234_v56 = vpop.permute.xlu0 %1018 }
 0x232   : > { %5302 = vst [vmem:[#allocation18_spill] sm:$0xff] %v4232_v55  ;;  %5303 = vst [vmem:[#allocation19_spill] sm:$0xff] %v4234_v56  ;;  %vm1058_vm13 = vcmp.eq.s32.totalorder %v4186_v26, %v4232_v55  ;;  %vm1059_vm14 = vcmp.eq.s32.totalorder %v4186_v26, %v4234_v56 }
 0x233   : > { %3359 = vmatprep.mubr.msk.f32.mxu0 %vm1058_vm13, %v5218_v54 }
 0x234   : > { %3360 = vmatmul.mubr.msk.f32.gmra.mrb[18].mxu0 %vm1059_vm14, %v5218_v54 }
 0x235   : > { %v4248_v57 = vpop.permute.xlu1 %1021  ;;  %v4250_v58 = vpop.permute.xlu0 %1024 }
 0x236   : > { %5304 = vst [vmem:[#allocation20_spill] sm:$0xff] %v4248_v57  ;;  %vm1060_vm15 = vcmp.eq.s32.totalorder %v4186_v26, %v4248_v57  ;;  %vm1061_vm0 = vcmp.eq.s32.totalorder %v4186_v26, %v4250_v58 }
 0x237   : > { %3362 = vmatprep.mubr.msk.f32.mxu0 %vm1060_vm15, %v5218_v54 }
 0x238   : > { %3363 = vmatmul.mubr.msk.f32.gmra.mrb[20].mxu0 %vm1061_vm0, %v5218_v54 }
 0x239   : > { %v4264_v59 = vpop.permute.xlu1 %1027  ;;  %v4266_v60 = vpop.permute.xlu0 %1030 }
 0x23a   : > { %5305 = vst [vmem:[#allocation21_spill] sm:$0xff] %v4264_v59  ;;  %5306 = vst [vmem:[#allocation22_spill] sm:$0xff] %v4266_v60  ;;  %vm1062_vm1 = vcmp.eq.s32.totalorder %v4186_v26, %v4264_v59  ;;  %vm1063_vm2 = vcmp.eq.s32.totalorder %v4186_v26, %v4266_v60 }
 0x23b   : > { %3365 = vmatprep.mubr.msk.f32.mxu0 %vm1062_vm1, %v5218_v54 }
 0x23c   : > { %3366 = vmatmul.mubr.msk.f32.gmra.mrb[22].mxu0 %vm1063_vm2, %v5218_v54 }
 0x23d   : > { %v4280_v61 = vpop.permute.xlu1 %1033  ;;  %v4282_v62 = vpop.permute.xlu0 %1036 }
 0x23e   : > { %5307 = vst [vmem:[#allocation23_spill] sm:$0xff] %v4280_v61  ;;  %5308 = vst [vmem:[#allocation24_spill] sm:$0xff] %v4282_v62  ;;  %vm5270_vm3 = vcmp.eq.s32.totalorder %v4186_v26, %v4280_v61  ;;  %vm1065_vm4 = vcmp.eq.s32.totalorder %v4186_v26, %v4282_v62 }
 0x23f   : > { %3368 = vmatprep.mubr.msk.f32.mxu0 %vm5270_vm3, %v5218_v54  ;;  %vm1726_vm3 = vcmp.ge.s32.totalorder %v4074_v15, 0 }
 0x240   : > { %3369 = vmatmul.mubr.msk.f32.gmra.mrb[24].mxu0 %vm1065_vm4, %v5218_v54 }
 0x241   : > { %v4296_v63 = vpop.permute.xlu1 %1039  ;;  %v4298_v0 = vpop.permute.xlu0 %1042 }
 0x242   : > { %5309 = vst [vmem:[#allocation25_spill] sm:$0xff] %v4296_v63  ;;  %5310 = vst [vmem:[#allocation26_spill] sm:$0xff] %v4298_v0  ;;  %vm5272_vm5 = vcmp.eq.s32.totalorder %v4186_v26, %v4296_v63  ;;  %vm5271_vm6 = vcmp.eq.s32.totalorder %v4186_v26, %v4298_v0 }
 0x243   : > { %3371 = vmatprep.mubr.msk.f32.mxu0 %vm5272_vm5, %v5218_v54  ;;  %vm1727_vm5 = vcmp.ge.s32.totalorder %v4082_v18, 0 }
 0x244   : > { %3372 = vmatmul.mubr.msk.f32.gmra.mrb[26].mxu0 %vm5271_vm6, %v5218_v54 }
 0x245   : > { %v4312_v1 = vpop.permute.xlu1 %1045  ;;  %v4314_v2 = vpop.permute.xlu0 %1048 }
 0x246   : > { %5311 = vst [vmem:[#allocation27_spill] sm:$0xff] %v4312_v1  ;;  %5312 = vst [vmem:[#allocation28_spill] sm:$0xff] %v4314_v2  ;;  %vm5256_vm7 = vcmp.eq.s32.totalorder %v4186_v26, %v4312_v1  ;;  %vm5269_vm8 = vcmp.eq.s32.totalorder %v4186_v26, %v4314_v2 }
 0x247   : > { %3374 = vmatprep.mubr.msk.f32.mxu0 %vm5256_vm7, %v5218_v54  ;;  %vm1729_vm7 = vcmp.ge.s32.totalorder %v4079_v17, 0 }
 0x248   : > { %3375 = vmatmul.mubr.msk.f32.gmra.mrb[28].mxu0 %vm5269_vm8, %v5218_v54 }
 0x249   : > { %v4328_v3 = vpop.permute.xlu1 %1051  ;;  %v4330_v4 = vpop.permute.xlu0 %1054 }
 0x24a   : > { %5313 = vst [vmem:[#allocation29_spill] sm:$0xff] %v4328_v3  ;;  %5314 = vst [vmem:[#allocation30_spill] sm:$0xff] %v4330_v4  ;;  %vm5253_vm9 = vcmp.eq.s32.totalorder %v4186_v26, %v4328_v3  ;;  %vm5247_vm10 = vcmp.eq.s32.totalorder %v4186_v26, %v4330_v4 }
 0x24b   : > { %3377 = vmatprep.mubr.msk.f32.mxu0 %vm5253_vm9, %v5218_v54 }
 0x24c   : > { %3378 = vmatmul.mubr.msk.f32.gmra.mrb[30].mxu0 %vm5247_vm10, %v5218_v54  ;;  %vm1728_vm10 = vcmp.ge.s32.totalorder %v4071_v14, 0 }
 0x263   : > { %v3270_v6 = vpop.f32.mrb[0].mxu0 }
 0x264   : > { %v883_v7 = vadd.f32 %v3270_v6, %v2968_v5  ;;  %v877_v8 = vpop.f32.mrb[1].mxu0 }
 0x265   : > { %v878_v9 = vadd.f32 %v2968_v5, %v877_v8 }
 0x266   : > { %957 = vst [vmem:[%s3928_s11 + $0x8] sm:$0xff] %v883_v7  ;;  %1616 = vrot.lane.b32.xlu0 %v883_v7, %s3799_s22 }
 0x267   : > { %956 = vst [vmem:[%s3928_s11] sm:$0xff] %v878_v9  ;;  %v3273_v10 = vpop.f32.mrb[2].mxu0  ;;  %1614 = vrot.lane.b32.xlu1 %v878_v9, %s3799_s22 }
 0x268   : > { %v893_v11 = vadd.f32 %v3273_v10, %v2968_v5  ;;  %v887_v12 = vpop.f32.mrb[3].mxu0 }
 0x269   : > { %v888_v13 = vadd.f32 %v2968_v5, %v887_v12 }
 0x26a   : > { %959 = vst [vmem:[%s3928_s11 + $0x18] sm:$0xff] %v893_v11  ;;  %1620 = vrot.lane.b32.xlu0 %v893_v11, %s3799_s22 }
 0x26b   : > { %958 = vst [vmem:[%s3928_s11 + $0x10] sm:$0xff] %v888_v13  ;;  %v3276_v16 = vpop.f32.mrb[4].mxu0  ;;  %1618 = vrot.lane.b32.xlu1 %v888_v13, %s3799_s22 }
 0x26c   : > { %v903_v19 = vadd.f32 %v3276_v16, %v2968_v5  ;;  %v897_v20 = vpop.f32.mrb[5].mxu0 }
 0x26d   : > { %v898_v22 = vadd.f32 %v2968_v5, %v897_v20 }
 0x26e   : > { %961 = vst [vmem:[%s3928_s11 + $0x28] sm:$0xff] %v903_v19  ;;  %1624 = vrot.lane.b32.xlu0 %v903_v19, %s3799_s22 }
 0x26f   : > { %960 = vst [vmem:[%s3928_s11 + $0x20] sm:$0xff] %v898_v22  ;;  %v3279_v25 = vpop.f32.mrb[6].mxu0  ;;  %1622 = vrot.lane.b32.xlu1 %v898_v22, %s3799_s22 }
 0x270   : > { %v913_v27 = vadd.f32 %v3279_v25, %v2968_v5  ;;  %v907_v30 = vpop.f32.mrb[7].mxu0 }
 0x271   : > { %v908_v32 = vadd.f32 %v2968_v5, %v907_v30 }
 0x272   : > { %963 = vst [vmem:[%s3928_s11 + $0x38] sm:$0xff] %v913_v27  ;;  %1628 = vrot.lane.b32.xlu0 %v913_v27, %s3799_s22 }
 0x273   : > { %962 = vst [vmem:[%s3928_s11 + $0x30] sm:$0xff] %v908_v32  ;;  %v3282_v35 = vpop.f32.mrb[8].mxu0  ;;  %1626 = vrot.lane.b32.xlu1 %v908_v32, %s3799_s22 }
 0x274   : > { %v923_v36 = vadd.f32 %v3282_v35, %v2968_v5  ;;  %v917_v37 = vpop.f32.mrb[9].mxu0 }
 0x275   : > { %v918_v40 = vadd.f32 %v2968_v5, %v917_v37 }
 0x276   : > { %965 = vst [vmem:[%s3928_s11 + $0x48] sm:$0xff] %v923_v36  ;;  %1632 = vrot.lane.b32.xlu0 %v923_v36, %s3799_s22 }
 0x277   : > { %964 = vst [vmem:[%s3928_s11 + $0x40] sm:$0xff] %v918_v40  ;;  %v3285_v41 = vpop.f32.mrb[10].mxu0  ;;  %1630 = vrot.lane.b32.xlu1 %v918_v40, %s3799_s22 }
 0x278   : > { %v933_v42 = vadd.f32 %v3285_v41, %v2968_v5  ;;  %v927_v45 = vpop.f32.mrb[11].mxu0 }
 0x279   : > { %v928_v46 = vadd.f32 %v2968_v5, %v927_v45 }
 0x27a   : > { %967 = vst [vmem:[%s3928_s11 + $0x58] sm:$0xff] %v933_v42  ;;  %1636 = vrot.lane.b32.xlu0 %v933_v42, %s3799_s22 }
 0x27b   : > { %966 = vst [vmem:[%s3928_s11 + $0x50] sm:$0xff] %v928_v46  ;;  %v3288_v47 = vpop.f32.mrb[12].mxu0  ;;  %1634 = vrot.lane.b32.xlu1 %v928_v46, %s3799_s22 }
 0x27c   : > { %v943_v50 = vadd.f32 %v3288_v47, %v2968_v5  ;;  %v937_v51 = vpop.f32.mrb[13].mxu0 }
 0x27d   : > { %v938_v6 = vadd.f32 %v2968_v5, %v937_v51 }
 0x27e   : > { %969 = vst [vmem:[%s3928_s11 + $0x68] sm:$0xff] %v943_v50  ;;  %1640 = vrot.lane.b32.xlu0 %v943_v50, %s3799_s22 }
 0x27f   : > { %968 = vst [vmem:[%s3928_s11 + $0x60] sm:$0xff] %v938_v6  ;;  %1638 = vrot.lane.b32.xlu1 %v938_v6, %s3799_s22  ;;  %v3291_v7 = vpop.f32.mrb[14].mxu0 }
 0x280   : > { %v953_v8 = vadd.f32 %v3291_v7, %v2968_v5  ;;  %v947_v9 = vpop.f32.mrb[15].mxu0 }
 0x281   : > { %v948_v10 = vadd.f32 %v2968_v5, %v947_v9 }
 0x282   : > { %971 = vst [vmem:[%s3928_s11 + $0x78] sm:$0xff] %v953_v8 }
 0x283   : > { %970 = vst [vmem:[%s3928_s11 + $0x70] sm:$0xff] %v948_v10 }
 0x2e8   : > { %v4377_v11 = vpop.f32.mrb[0].mxu1 }
 0x2e9   : > { %5315 = vst [vmem:[#allocation31_spill] sm:$0xff] %v4377_v11  ;;  %v4379_v12 = vpop.f32.mrb[1].mxu1  ;;  %1409 = vrot.lane.b32.xlu1 %v4377_v11, %s3800_s26 }
 0x2ea   : > { %5316 = vst [vmem:[#allocation32_spill] sm:$0xff] %v4379_v12  ;;  %v4383_v13 = vpop.f32.mrb[2].mxu1 }
 0x2eb   : > { %5317 = vst [vmem:[#allocation33_spill] sm:$0xff] %v4383_v13  ;;  %v4385_v16 = vpop.f32.mrb[3].mxu1  ;;  %1411 = vrot.lane.b32.xlu0 %v4383_v13, %s3800_s26 }
 0x2ec   : > { %5318 = vst [vmem:[#allocation34_spill] sm:$0xff] %v4385_v16 }
 0x2ed   : > { %1405 = vrot.lane.b32.xlu1 %v4379_v12, %s3800_s26 }
 0x2ef   : > { %1407 = vrot.lane.b32.xlu0 %v4385_v16, %s3800_s26 }
 0x2f0   : > { %v4393_v5 = vpop.f32.mrb[4].mxu1 }
 0x2f1   : > { %5319 = vst [vmem:[#allocation35_spill] sm:$0xff] %v4393_v5  ;;  %v4395_v19 = vpop.f32.mrb[5].mxu1  ;;  %1417 = vrot.lane.b32.xlu1 %v4393_v5, %s3800_s26 }
 0x2f2   : > { %5320 = vst [vmem:[#allocation36_spill] sm:$0xff] %v4395_v19  ;;  %v4399_v20 = vpop.f32.mrb[6].mxu1 }
 0x2f3   : > { %5321 = vst [vmem:[#allocation37_spill] sm:$0xff] %v4399_v20  ;;  %v4401_v22 = vpop.f32.mrb[7].mxu1  ;;  %1419 = vrot.lane.b32.xlu0 %v4399_v20, %s3800_s26 }
 0x2f4   : > { %5322 = vst [vmem:[#allocation38_spill] sm:$0xff] %v4401_v22 }
 0x2f5   : > { %1413 = vrot.lane.b32.xlu1 %v4395_v19, %s3800_s26 }
 0x2f7   : > { %1415 = vrot.lane.b32.xlu0 %v4401_v22, %s3800_s26 }
 0x2f8   : > { %v4409_v25 = vpop.f32.mrb[8].mxu1 }
 0x2f9   : > { %5323 = vst [vmem:[#allocation39_spill] sm:$0xff] %v4409_v25  ;;  %v4411_v27 = vpop.f32.mrb[9].mxu1  ;;  %1425 = vrot.lane.b32.xlu1 %v4409_v25, %s3800_s26 }
 0x2fa   : > { %5324 = vst [vmem:[#allocation40_spill] sm:$0xff] %v4411_v27  ;;  %v4415_v30 = vpop.f32.mrb[10].mxu1 }
 0x2fb   : > { %5325 = vst [vmem:[#allocation41_spill] sm:$0xff] %v4415_v30  ;;  %v4417_v32 = vpop.f32.mrb[11].mxu1  ;;  %1427 = vrot.lane.b32.xlu0 %v4415_v30, %s3800_s26 }
 0x2fc   : > { %5326 = vst [vmem:[#allocation42_spill] sm:$0xff] %v4417_v32 }
 0x2fd   : > { %1421 = vrot.lane.b32.xlu1 %v4411_v27, %s3800_s26 }
 0x2ff   : > { %1423 = vrot.lane.b32.xlu0 %v4417_v32, %s3800_s26 }
 0x300   : > { %v4425_v35 = vpop.f32.mrb[12].mxu1 }
 0x301   : > { %5327 = vst [vmem:[#allocation43_spill] sm:$0xff] %v4425_v35  ;;  %v4427_v36 = vpop.f32.mrb[13].mxu1  ;;  %1433 = vrot.lane.b32.xlu1 %v4425_v35, %s3800_s26 }
 0x302   : > { %5328 = vst [vmem:[#allocation44_spill] sm:$0xff] %v4427_v36  ;;  %v4431_v37 = vpop.f32.mrb[14].mxu1 }
 0x303   : > { %5329 = vst [vmem:[#allocation45_spill] sm:$0xff] %v4431_v37  ;;  %v4433_v40 = vpop.f32.mrb[15].mxu1  ;;  %1435 = vrot.lane.b32.xlu0 %v4431_v37, %s3800_s26  ;;  %v3358_v41 = vpop.f32.mrb[16].mxu0 }
 0x304   : > { %5330 = vst [vmem:[#allocation46_spill] sm:$0xff] %v4433_v40  ;;  %v1519_v42 = vpop.f32.mrb[17].mxu0  ;;  %v1615_v37 = vpop.permute.xlu1 %1614 }
 0x305   : > { %1429 = vrot.lane.b32.xlu1 %v4427_v36, %s3800_s26  ;;  %v1617_v36 = vpop.permute.xlu0 %1616 }
 0x307   : > { %1431 = vrot.lane.b32.xlu0 %v4433_v40, %s3800_s26  ;;  %v3361_v45 = vpop.f32.mrb[18].mxu0 }
 0x308   : > { %v1529_v46 = vpop.f32.mrb[19].mxu0  ;;  %v1619_v40 = vpop.permute.xlu1 %1618 }
 0x309   : > { %1642 = vrot.lane.b32.xlu1 %v948_v10, %s3799_s22  ;;  %v1621_v25 = vpop.permute.xlu0 %1620 }
 0x30b   : > { %1644 = vrot.lane.b32.xlu0 %v953_v8, %s3799_s22  ;;  %v4443_v47 = vpop.f32.mrb[20].mxu0 }
 0x30c   : > { %v4445_v50 = vpop.f32.mrb[21].mxu0  ;;  %v1623_v30 = vpop.permute.xlu1 %1622 }
 0x30d   : > { %v4463_v27 = vpop.permute.xlu0 %1624 }
 0x30f   : > { %v3367_v51 = vpop.f32.mrb[22].mxu0 }
 0x310   : > { %v1549_v6 = vpop.f32.mrb[23].mxu0  ;;  %v1627_v32 = vpop.permute.xlu1 %1626 }
 0x311   : > { %v1629_v5 = vpop.permute.xlu0 %1628 }
 0x313   : > { %v4447_v7 = vpop.f32.mrb[24].mxu0 }
 0x314   : > { %v4449_v9 = vpop.f32.mrb[25].mxu0  ;;  %v4465_v20 = vpop.permute.xlu1 %1630 }
 0x315   : > { %v4467_v19 = vpop.permute.xlu0 %1632 }
 0x317   : > { %v4451_v31 = vpop.f32.mrb[26].mxu0 }
 0x318   : > { %v4453_v54 = vpop.f32.mrb[27].mxu0  ;;  %v4469_v22 = vpop.permute.xlu1 %1634 }
 0x319   : > { %v4471_v11 = vpop.permute.xlu0 %1636 }
 0x31b   : > { %v4455_v21 = vpop.f32.mrb[28].mxu0 }
 0x31c   : > { %v4457_v35 = vpop.f32.mrb[29].mxu0  ;;  %v4473_v13 = vpop.permute.xlu1 %1638 }
 0x31d   : > { %v4475_v12 = vpop.permute.xlu0 %1640 }
 0x31f   : > { %v4459_v10 = vpop.f32.mrb[30].mxu0 }
 0x320   : > { %v4461_v8 = vpop.f32.mrb[31].mxu0 }
 0x35b   : > { %v1410_v16 = vpop.permute.xlu1 %1409 }
 0x35c   : > { %v1530_v4 = vadd.f32 %v1529_v46, %v1410_v16 }
 0x35d   : > { %v1412_v3 = vpop.permute.xlu0 %1411 }
 0x35e   : > { %v1664_v1 = vadd.f32 %v1619_v40, %v1530_v4  ;;  %v1535_v2 = vadd.f32 %v3361_v45, %v1412_v3 }
 0x35f   : > { %v1406_v61 = vpop.permute.xlu1 %1405 }
 0x360   : > { %v1696_v0 = vmul.f32 0.2, %v1664_v1  ;;  %v1665_v63 = vadd.f32 %v1621_v25, %v1535_v2  ;;  %v1520_v53 = vadd.f32 %v1519_v42, %v1406_v61  ;;  %vm1680_vm9 = vcmp.gt.f32.partialorder %v1664_v1, 0.0 }
 0x361   : > { %v1408_v56 = vpop.permute.xlu0 %1407 }
 0x362   : > { %v1697_v62 = vmul.f32 0.2, %v1665_v63  ;;  %v1662_v57 = vadd.f32 %v1615_v37, %v1520_v53  ;;  %v1525_v60 = vadd.f32 %v3358_v41, %v1408_v56  ;;  %v1712_v59 = vsel %vm1680_vm9, %v1664_v1, %v1696_v0 }
 0x363   : > { %v1418_v52 = vpop.permute.xlu1 %1417  ;;  %v4479_v55 = vsel %vm1728_vm10, %v1712_v59, -1e+30  ;;  %vm1681_vm8 = vcmp.gt.f32.partialorder %v1665_v63, 0.0  ;;  %vm1730_vm10 = vcmp.ge.s32.totalorder %v4095_v24, 0 }
 0x364   : > { %v1694_v3 = vmul.f32 0.2, %v1662_v57  ;;  %v1663_v4 = vadd.f32 %v1617_v36, %v1525_v60  ;;  %v1550_v14 = vadd.f32 %v1549_v6, %v1418_v52  ;;  %1786 = vperm.xlu1 %3599, %v4479_v55   ;;  %v1713_v61 = vsel %vm1681_vm8, %v1665_v63, %v1697_v62 }
 0x365   : > { %v1420_v2 = vpop.permute.xlu0 %1419  ;;  %v4483_v16 = vsel %vm1729_vm7, %v1713_v61, -1e+30  ;;  %vm1678_vm6 = vcmp.gt.f32.partialorder %v1662_v57, 0.0  ;;  %vm1732_vm8 = vcmp.ge.s32.totalorder %v4107_v29, 0  ;;  %vm1733_vm7 = vcmp.ge.s32.totalorder %v4104_v28, 0 }
 0x366   : > { %v1695_v17 = vmul.f32 0.2, %v1663_v4  ;;  %v1668_v53 = vadd.f32 %v1627_v32, %v1550_v14  ;;  %v1555_v56 = vadd.f32 %v3367_v51, %v1420_v2  ;;  %1791 = vperm.xlu0 %3598, %v4483_v16   ;;  %v1710_v59 = vsel %vm1678_vm6, %v1662_v57, %v1694_v3 }
 0x367   : > { %v1414_v0 = vpop.permute.xlu1 %1413  ;;  %v4489_v60 = vsel %vm1726_vm3, %v1710_v59, -1e+30  ;;  %vm1679_vm9 = vcmp.gt.f32.partialorder %v1663_v4, 0.0 }
 0x368   : > { %v1700_v52 = vmul.f32 0.2, %v1668_v53  ;;  %v1669_v62 = vadd.f32 %v1629_v5, %v1555_v56  ;;  %v1540_v63 = vadd.f32 %v4445_v50, %v1414_v0  ;;  %1776 = vperm.xlu1 %3599, %v4489_v60   ;;  %v1711_v1 = vsel %vm1679_vm9, %v1663_v4, %v1695_v17 }
 0x369   : > { %v1416_v25 = vpop.permute.xlu0 %1415  ;;  %v4496_v32 = vsel %vm1727_vm5, %v1711_v1, -1e+30  ;;  %vm1684_vm6 = vcmp.gt.f32.partialorder %v1668_v53, 0.0  ;;  %vm1731_vm9 = vcmp.ge.s32.totalorder %v4092_v23, 0 }
 0x36a   : > { %v1701_v15 = vmul.f32 0.2, %v1669_v62  ;;  %v1666_v57 = vadd.f32 %v1623_v30, %v1540_v63  ;;  %v1545_v36 = vadd.f32 %v4443_v47, %v1416_v25  ;;  %1781 = vperm.xlu0 %3598, %v4496_v32   ;;  %v1716_v5 = vsel %vm1684_vm6, %v1668_v53, %v1700_v52 }
 0x36b   : > { %v1426_v37 = vpop.permute.xlu1 %1425  ;;  %v4503_v40 = vsel %vm1732_vm8, %v1716_v5, -1e+30  ;;  %vm1685_vm3 = vcmp.gt.f32.partialorder %v1669_v62, 0.0  ;;  %vm1736_vm6 = vcmp.ge.s32.totalorder %v4131_v39, 0 }
 0x36c   : > { %v1698_v18 = vmul.f32 0.2, %v1666_v57  ;;  %v1667_v41 = vadd.f32 %v4463_v27, %v1545_v36  ;;  %v1570_v42 = vadd.f32 %v4453_v54, %v1426_v37  ;;  %1806 = vperm.xlu1 %3599, %v4503_v40   ;;  %v1717_v30 = vsel %vm1685_vm3, %v1669_v62, %v1701_v15 }
 0x36d   : > { %v1428_v45 = vpop.permute.xlu0 %1427  ;;  %v4511_v46 = vsel %vm1733_vm7, %v1717_v30, -1e+30  ;;  %vm1682_vm5 = vcmp.gt.f32.partialorder %v1666_v57, 0.0  ;;  %vm1737_vm3 = vcmp.ge.s32.totalorder %v4128_v38, 0 }
 0x36e   : > { %v1699_v29 = vmul.f32 0.2, %v1667_v41  ;;  %v1672_v47 = vadd.f32 %v4469_v22, %v1570_v42  ;;  %v1575_v50 = vadd.f32 %v4451_v31, %v1428_v45  ;;  %1811 = vperm.xlu0 %3598, %v4511_v46   ;;  %v1714_v27 = vsel %vm1682_vm5, %v1666_v57, %v1698_v18  ;;  %v4580_v45 = vld [vmem:[%s367_s21] ss:$0 sm:$0xff] }
 0x36f   : > { %v1422_v54 = vpop.permute.xlu1 %1421  ;;  %v4519_v51 = vsel %vm1730_vm10, %v1714_v27, -1e+30  ;;  %vm1683_vm8 = vcmp.gt.f32.partialorder %v1667_v41, 0.0  ;;  %vm1734_vm5 = vcmp.ge.s32.totalorder %v4119_v34, 0  ;;  %5333 = vst [vmem:[#allocation48_spill] sm:$0xff] %v4580_v45 }
 0x370   : > { %v1704_v28 = vmul.f32 0.2, %v1672_v47  ;;  %v1673_v6 = vadd.f32 %v4471_v11, %v1575_v50  ;;  %v1560_v3 = vadd.f32 %v4449_v9, %v1422_v54  ;;  %1796 = vperm.xlu1 %3599, %v4519_v51   ;;  %v1715_v22 = vsel %vm1683_vm8, %v1667_v41, %v1699_v29 }
 0x371   : > { %v1424_v31 = vpop.permute.xlu0 %1423  ;;  %v4527_v4 = vsel %vm1731_vm9, %v1715_v22, -1e+30  ;;  %vm1688_vm7 = vcmp.gt.f32.partialorder %v1672_v47, 0.0 }
 0x372   : > { %v1705_v24 = vmul.f32 0.2, %v1673_v6  ;;  %v1670_v14 = vadd.f32 %v4465_v20, %v1560_v3  ;;  %v1565_v61 = vadd.f32 %v4447_v7, %v1424_v31  ;;  %1801 = vperm.xlu0 %3598, %v4527_v4   ;;  %v1720_v11 = vsel %vm1688_vm7, %v1672_v47, %v1704_v28 }
 0x373   : > { %v1434_v9 = vpop.permute.xlu1 %1433  ;;  %v4535_v2 = vsel %vm1736_vm6, %v1720_v11, -1e+30  ;;  %vm1689_vm10 = vcmp.gt.f32.partialorder %v1673_v6, 0.0  ;;  %vm1735_vm6 = vcmp.ge.s32.totalorder %v4116_v33, 0  ;;  %vm1738_vm7 = vcmp.ge.s32.totalorder %v4143_v44, 0 }
 0x374   : > { %v1702_v23 = vmul.f32 0.2, %v1670_v14  ;;  %v1671_v17 = vadd.f32 %v4467_v19, %v1565_v61  ;;  %1826 = vperm.xlu1 %3599, %v4535_v2   ;;  %v1721_v38 = vsel %vm1689_vm10, %v1673_v6, %v1705_v24  ;;  %vm1686_vm9 = vcmp.gt.f32.partialorder %v1670_v14, 0.0 }
 0x375   : > { %v1436_v20 = vpop.permute.xlu0 %1435  ;;  %v4540_v53 = vsel %vm1737_vm3, %v1721_v38, -1e+30  ;;  %v1590_v62 = vadd.f32 %v4461_v8, %v1434_v9  ;;  %vm1739_vm10 = vcmp.ge.s32.totalorder %v4140_v43, 0  ;;  %v5334_v47 = vmov 0 }
 0x376   : > { %v1703_v7 = vmul.f32 0.2, %v1671_v17  ;;  %1831 = vperm.xlu0 %3598, %v4540_v53   ;;  %v1718_v56 = vsel %vm1686_vm9, %v1670_v14, %v1702_v23  ;;  %vm1687_vm8 = vcmp.gt.f32.partialorder %v1671_v17, 0.0  ;;  %v1595_v33 = vadd.f32 %v4459_v10, %v1436_v20 }
 0x377   : > { %v1430_v39 = vpop.permute.xlu1 %1429  ;;  %v4544_v59 = vsel %vm1734_vm5, %v1718_v56, -1e+30 }
 0x378   : > { %v1580_v19 = vadd.f32 %v4457_v35, %v1430_v39  ;;  %1816 = vperm.xlu1 %3599, %v4544_v59   ;;  %v1719_v0 = vsel %vm1687_vm8, %v1671_v17, %v1703_v7  ;;  %vm1740_vm8 = vcmp.ge.s32.totalorder %v4155_v49, 0  ;;  %v5331_v49 = vlaneseq }
 0x379   : > { %v1432_v34 = vpop.permute.xlu0 %1431  ;;  %v4548_v52 = vsel %vm1735_vm6, %v1719_v0, -1e+30 }
 0x37a   : > { %v1674_v63 = vadd.f32 %v4473_v13, %v1580_v19  ;;  %v1585_v1 = vadd.f32 %v4455_v21, %v1432_v34  ;;  %1821 = vperm.xlu0 %3598, %v4548_v52   ;;  %v4573_v30 = vshrl.u32 %v5331_v49, 7 }
 0x37b   : > { %v1643_v25 = vpop.permute.xlu1 %1642 }
 0x37c   : > { %v1706_v35 = vmul.f32 0.2, %v1674_v63  ;;  %v1675_v15 = vadd.f32 %v4475_v12, %v1585_v1  ;;  %v1676_v57 = vadd.f32 %v1643_v25, %v1590_v62  ;;  %vm1690_vm3 = vcmp.gt.f32.partialorder %v1674_v63, 0.0  ;;  %5332 = vst [vmem:[#allocation47_spill] sm:$0xff] %v4573_v30 }
 0x37d   : > { %v1645_v36 = vpop.permute.xlu0 %1644  ;;  %v4583_v29 = vadd.s32 16, %v4573_v30 }
 0x37e   : > { %v1707_v8 = vmul.f32 0.2, %v1675_v15  ;;  %v1708_v5 = vmul.f32 0.2, %v1676_v57  ;;  %v1677_v13 = vadd.f32 %v1645_v36, %v1595_v33  ;;  %v1722_v37 = vsel %vm1690_vm3, %v1674_v63, %v1706_v35  ;;  %v5345_v36 = vld [vmem:[#allocation25_spill] sm:$0xff] }
 0x37f   : > { %v4558_v21 = vsel %vm1738_vm7, %v1722_v37, -1e+30  ;;  %vm1691_vm5 = vcmp.gt.f32.partialorder %v1675_v15, 0.0  ;;  %vm1692_vm9 = vcmp.gt.f32.partialorder %v1676_v57, 0.0  ;;  %vm1741_vm3 = vcmp.ge.s32.totalorder %v4152_v48, 0 }
 0x380   : > { %v1709_v44 = vmul.f32 0.2, %v1677_v13  ;;  %1836 = vperm.xlu1 %3599, %v4558_v21   ;;  %v1723_v12 = vsel %vm1691_vm5, %v1675_v15, %v1707_v8  ;;  %v1724_v10 = vsel %vm1692_vm9, %v1676_v57, %v1708_v5  ;;  %vm1693_vm6 = vcmp.gt.f32.partialorder %v1677_v13, 0.0 }
 0x381   : > { %v4562_v18 = vsel %vm1739_vm10, %v1723_v12, -1e+30  ;;  %v4566_v41 = vsel %vm1740_vm8, %v1724_v10, -1e+30  ;;  %vm1214_vm7 = vcmp.eq.s32.totalorder %v4583_v29, %v4580_v45  ;;  %v4588_v48 = vadd.s32 24, %v4573_v30  ;;  %v5351_v10 = vld [vmem:[#allocation28_spill] sm:$0xff] }
 0x382   : > { %1841 = vperm.xlu0 %3598, %v4562_v18   ;;  %v1725_v43 = vsel %vm1693_vm6, %v1677_v13, %v1709_v44  ;;  %vm5346_vm9 = vcmp.eq.s32.totalorder %v4186_v26, %v5345_v36  ;;  %v5347_v13 = vld [vmem:[#allocation26_spill] sm:$0xff]  ;;  %v5349_v44 = vld [vmem:[#allocation23_spill] sm:$0xff] }
 0x383   : > { %v4569_v42 = vsel %vm1741_vm3, %v1725_v43, -1e+30  ;;  %vm1215_vm10 = vcmp.eq.s32.totalorder %v4588_v48, %v4580_v45  ;;  %vm5348_vm8 = vcmp.eq.s32.totalorder %v4186_v26, %v5347_v13  ;;  %vm5350_vm6 = vcmp.eq.s32.totalorder %v4186_v26, %v5349_v44 }
 0x384   : > { %1846 = vperm.xlu1 %3599, %v4566_v41   ;;  %vm4592_vm5 = vmpackc.low %vm1215_vm10, %vm1214_vm7  ;;  %vm5352_vm3 = vcmp.eq.s32.totalorder %v4186_v26, %v5351_v10 }
 0x385   : > { %v5335_v47 = vsel %vm4592_vm5, 4294967295, %v5334_v47 }
 0x386   : > { %1851 = vperm.xlu0 %3598, %v4569_v42   ;;  %5336 = vst [vmem:[#allocation49_spill] sm:$0xff] %v5335_v47  ;;  %v4845_v47 = vld [vmem:[#allocation5 + $0x70] sm:$0xff] }
 0x3e3   : > { %v1787_v50 = vpop.permute.xlu1 %1786 }
 0x3e4   : > { %v1856_v17 = vsel %vm1058_vm13, %v1787_v50, -1e+30 }
 0x3e5   : > { %v1792_v27 = vpop.permute.xlu0 %1791 }
 0x3e6   : > { %v1857_v25 = vsel %vm1059_vm14, %v1792_v27, -1e+30 }
 0x3e7   : > { %v1777_v54 = vpop.permute.xlu1 %1776 }
 0x3e8   : > { %v1854_v15 = vsel %vm1056_vm12, %v1777_v54, -1e+30 }
 0x3e9   : > { %v1782_v28 = vpop.permute.xlu0 %1781 }
 0x3ea   : > { %v1855_v20 = vsel %vm1057_vm11, %v1782_v28, -1e+30 }
 0x3eb   : > { %v1807_v6 = vpop.permute.xlu1 %1806 }
 0x3ec   : > { %v1860_v56 = vsel %vm1062_vm1, %v1807_v6, -1e+30  ;;  %v5353_v6 = vld [vmem:[#allocation27_spill] sm:$0xff] }
 0x3ed   : > { %v1812_v3 = vpop.permute.xlu0 %1811  ;;  %v1872_v49 = vmax.f32 %v1856_v17, %v1860_v56  ;;  %vm5354_vm12 = vcmp.eq.s32.totalorder %v4186_v26, %v5353_v6 }
 0x3ee   : > { %v1861_v0 = vsel %vm1063_vm2, %v1812_v3, -1e+30 }
 0x3ef   : > { %v1797_v22 = vpop.permute.xlu1 %1796  ;;  %v1873_v50 = vmax.f32 %v1857_v25, %v1861_v0 }
 0x3f0   : > { %v1858_v62 = vsel %vm1060_vm15, %v1797_v22, -1e+30  ;;  %v5355_v22 = vld [vmem:[#allocation29_spill] sm:$0xff] }
 0x3f1   : > { %v1802_v31 = vpop.permute.xlu0 %1801  ;;  %v1870_v27 = vmax.f32 %v1854_v15, %v1858_v62  ;;  %vm5356_vm7 = vcmp.eq.s32.totalorder %v4186_v26, %v5355_v22 }
 0x3f2   : > { %v1859_v9 = vsel %vm1061_vm0, %v1802_v31, -1e+30 }
 0x3f3   : > { %v1827_v24 = vpop.permute.xlu1 %1826  ;;  %v1871_v57 = vmax.f32 %v1855_v20, %v1859_v9  ;;  %v5357_v20 = vld [vmem:[#allocation30_spill] sm:$0xff] }
 0x3f4   : > { %v1864_v8 = vsel %vm5346_vm9, %v1827_v24, -1e+30  ;;  %vm5358_vm10 = vcmp.eq.s32.totalorder %v4186_v26, %v5357_v20 }
 0x3f5   : > { %v1832_v14 = vpop.permute.xlu0 %1831  ;;  %v1876_v24 = vmax.f32 %v1872_v49, %v1864_v8 }
 0x3f6   : > { %v1865_v37 = vsel %vm5348_vm8, %v1832_v14, -1e+30  ;;  %vm1891_vm8 = vcmp.eq.s32.totalorder %v4573_v30, %v4186_v26 }
 0x3f7   : > { %v1817_v61 = vpop.permute.xlu1 %1816  ;;  %v1877_v14 = vmax.f32 %v1873_v50, %v1865_v37  ;;  %v4656_v50 = vadd.s32 32, %v4573_v30 }
 0x3f8   : > { %v1862_v12 = vsel %vm5350_vm6, %v1817_v61, -1e+30  ;;  %vm1893_vm6 = vcmp.eq.s32.totalorder %v4583_v29, %v4186_v26  ;;  %v4666_v29 = vadd.s32 48, %v4573_v30 }
 0x3f9   : > { %v1822_v11 = vpop.permute.xlu0 %1821  ;;  %v1874_v61 = vmax.f32 %v1870_v27, %v1862_v12  ;;  %5360 = vst [vmem:[#allocation16_spill] sm:$0xff] %v4656_v50  ;;  %v4659_v27 = vadd.s32 40, %v4573_v30 }
 0x3fa   : > { %v1863_v1 = vsel %vm1065_vm4, %v1822_v11, -1e+30  ;;  %5362 = vst [vmem:[#allocation22_spill] sm:$0xff] %v4666_v29 }
 0x3fb   : > { %v1875_v54 = vmax.f32 %v1871_v57, %v1863_v1  ;;  %5361 = vst [vmem:[#allocation21_spill] sm:$0xff] %v4659_v27 }
 0x3ff   : > { %v1837_v39 = vpop.permute.xlu1 %1836 }
 0x400   : > { %v1866_v3 = vsel %vm5354_vm12, %v1837_v39, -1e+30  ;;  %vm1895_vm12 = vcmp.eq.s32.totalorder %v4656_v50, %v4186_v26 }
 0x401   : > { %v1842_v5 = vpop.permute.xlu0 %1841  ;;  %v1878_v56 = vmax.f32 %v1874_v61, %v1866_v3 }
 0x402   : > { %v1867_v43 = vsel %vm5352_vm3, %v1842_v5, -1e+30  ;;  %v4645_v5 = vadd.s32 8, %v4573_v30  ;;  %vm1894_vm3 = vcmp.eq.s32.totalorder %v4588_v48, %v4186_v26  ;;  %v4669_v48 = vadd.s32 56, %v4573_v30 }
 0x403   : > { %v1847_v28 = vpop.permute.xlu1 %1846  ;;  %v1879_v11 = vmax.f32 %v1875_v54, %v1867_v43 }
 0x404   : > { %v1868_v31 = vsel %vm5356_vm7, %v1847_v28, -1e+30  ;;  %5359 = vst [vmem:[#allocation18_spill] sm:$0xff] %v4645_v5  ;;  %vm1892_vm9 = vcmp.eq.s32.totalorder %v4645_v5, %v4186_v26  ;;  %vm1896_vm7 = vcmp.eq.s32.totalorder %v4659_v27, %v4186_v26  ;;  %5363 = vst [vmem:[#allocation20_spill] sm:$0xff] %v4669_v48  ;;  %v4827_v5 = vld [vmem:[#allocation5 + $0x68] sm:$0xff] }
 0x405   : > { %v1852_v9 = vpop.permute.xlu0 %1851  ;;  %v1880_v0 = vmax.f32 %v1876_v24, %v1868_v31  ;;  %v1882_v1 = vmax.f32 %v1878_v56, %v1879_v11  ;;  %v4676_v24 = vadd.s32 64, %v4573_v30 }
 0x406   : > { %v1869_v17 = vsel %vm5358_vm10, %v1852_v9, -1e+30  ;;  %vm1897_vm10 = vcmp.eq.s32.totalorder %v4666_v29, %v4186_v26  ;;  %v4686_v9 = vadd.s32 80, %v4573_v30  ;;  %v4807_v29 = vld [vmem:[#allocation5 + $0x58] sm:$0xff] }
 0x407   : > { %v1881_v62 = vmax.f32 %v1877_v14, %v1869_v17  ;;  %5364 = vst [vmem:[#allocation24_spill] sm:$0xff] %v4676_v24  ;;  %v4679_v14 = vadd.s32 72, %v4573_v30  ;;  %v4689_v17 = vadd.s32 88, %v4573_v30  ;;  %5374 = vst [vmem:[#allocation50_spill] sm:$0xff] %v4807_v29 }
 0x408   : > { %5366 = vst [vmem:[#allocation17_spill] sm:$0xff] %v4686_v9 }
 0x409   : > { %v1883_v25 = vmax.f32 %v1880_v0, %v1881_v62  ;;  %5365 = vst [vmem:[#allocation19_spill] sm:$0xff] %v4679_v14  ;;  %5367 = vst [vmem:[#allocation25_spill] sm:$0xff] %v4689_v17  ;;  %v4696_v62 = vadd.s32 96, %v4573_v30 }
 0x40b   : > { %v1884_v35 = vmax.f32 %v1882_v1, %v1883_v25  ;;  %5368 = vst [vmem:[#allocation26_spill] sm:$0xff] %v4696_v62  ;;  %v4699_v1 = vadd.s32 104, %v4573_v30 }
 0x40d   : > { %v1885_v39 = vrot.slane %v1884_v35, 4  ;;  %5369 = vst [vmem:[#allocation23_spill] sm:$0xff] %v4699_v1 }
 0x40f   : > { %v1886_v15 = vmax.f32 %v1884_v35, %v1885_v39  ;;  %v4706_v39 = vadd.s32 112, %v4573_v30 }
 0x411   : > { %v1887_v57 = vrot.slane %v1886_v15, 2  ;;  %5370 = vst [vmem:[#allocation28_spill] sm:$0xff] %v4706_v39 }
 0x413   : > { %v1888_v8 = vmax.f32 %v1886_v15, %v1887_v57  ;;  %v4709_v15 = vadd.s32 120, %v4573_v30 }
 0x415   : > { %v1889_v37 = vrot.slane %v1888_v8, 1  ;;  %5371 = vst [vmem:[#allocation27_spill] sm:$0xff] %v4709_v15 }
 0x417   : > { %v1890_v12 = vmax.f32 %v1888_v8, %v1889_v37 }
 0x419   : > { %v1908_v43 = vsel %vm1892_vm9, %v1890_v12, -1e+30  ;;  %v1907_v49 = vsel %vm1891_vm8, %v1890_v12, -1e+30  ;;  %v1909_v54 = vsel %vm1893_vm6, %v1890_v12, -1e+30  ;;  %vm1898_vm9 = vcmp.eq.s32.totalorder %v4669_v48, %v4186_v26 }
 0x41a   : > { %1925 = vmax.xlane.f32.xlu0 %v1908_v43  ;;  %1923 = vmax.xlane.f32.xlu1 %v1907_v49  ;;  %v1910_v28 = vsel %vm1894_vm3, %v1890_v12, -1e+30  ;;  %v1911_v3 = vsel %vm1895_vm12, %v1890_v12, -1e+30  ;;  %v1912_v31 = vsel %vm1896_vm7, %v1890_v12, -1e+30  ;;  %vm1899_vm8 = vcmp.eq.s32.totalorder %v4676_v24, %v4186_v26 }
 0x41b   : > { %v1913_v61 = vsel %vm1897_vm10, %v1890_v12, -1e+30  ;;  %v1914_v11 = vsel %vm1898_vm9, %v1890_v12, -1e+30  ;;  %vm1900_vm6 = vcmp.eq.s32.totalorder %v4679_v14, %v4186_v26  ;;  %v1915_v56 = vsel %vm1899_vm8, %v1890_v12, -1e+30 }
 0x41c   : > { %v1916_v0 = vsel %vm1900_vm6, %v1890_v12, -1e+30  ;;  %vm1901_vm3 = vcmp.eq.s32.totalorder %v4686_v9, %v4186_v26  ;;  %vm1902_vm12 = vcmp.eq.s32.totalorder %v4689_v17, %v4186_v26  ;;  %vm1903_vm7 = vcmp.eq.s32.totalorder %v4696_v62, %v4186_v26  ;;  %v4715_v49 = vld [vmem:[#allocation5 + $0x8] sm:$0xff]  ;;  %v4825_v14 = vld [vmem:[#allocation5 + $0x60] sm:$0xff] }
 0x41d   : > { %v1917_v25 = vsel %vm1901_vm3, %v1890_v12, -1e+30  ;;  %v1918_v35 = vsel %vm1902_vm12, %v1890_v12, -1e+30  ;;  %vm1904_vm10 = vcmp.eq.s32.totalorder %v4699_v1, %v4186_v26  ;;  %v1919_v57 = vsel %vm1903_vm7, %v1890_v12, -1e+30 }
 0x41e   : > { %1927 = vmax.xlane.f32.xlu0 %v1909_v54  ;;  %1929 = vmax.xlane.f32.xlu1 %v1910_v28  ;;  %v1920_v8 = vsel %vm1904_vm10, %v1890_v12, -1e+30  ;;  %vm1905_vm9 = vcmp.eq.s32.totalorder %v4706_v39, %v4186_v26  ;;  %vm1906_vm8 = vcmp.eq.s32.totalorder %v4709_v15, %v4186_v26  ;;  %v4717_v54 = vld [vmem:[#allocation5] sm:$0xff]  ;;  %vm2557_vm6 = vcmask 7168   ;;  %v4767_v39 = vld [vmem:[#allocation5 + $0x38] sm:$0xff]  ;;  %v4787_v9 = vld [vmem:[#allocation5 + $0x48] sm:$0xff] }
 0x41f   : > { %v1921_v37 = vsel %vm1905_vm9, %v1890_v12, -1e+30  ;;  %v1922_v43 = vsel %vm1906_vm8, %v1890_v12, -1e+30  ;;  %v4805_v1 = vld [vmem:[#allocation5 + $0x50] sm:$0xff] }
 0x420   : > { %5373 = vst [vmem:[#allocation30_spill] sm:$0xff] %v4805_v1 }
 0x422   : > { %1931 = vmax.xlane.f32.xlu0 %v1911_v3  ;;  %1933 = vmax.xlane.f32.xlu1 %v1912_v31 }
 0x426   : > { %1935 = vmax.xlane.f32.xlu0 %v1913_v61  ;;  %1937 = vmax.xlane.f32.xlu1 %v1914_v11  ;;  %v4725_v11 = vld [vmem:[#allocation5 + $0x10] sm:$0xff] }
 0x42a   : > { %1939 = vmax.xlane.f32.xlu0 %v1915_v56  ;;  %1941 = vmax.xlane.f32.xlu1 %v1916_v0  ;;  %v4727_v56 = vld [vmem:[#allocation5 + $0x18] sm:$0xff]  ;;  %v4785_v0 = vld [vmem:[#allocation5 + $0x40] sm:$0xff] }
 0x42e   : > { %1943 = vmax.xlane.f32.xlu0 %v1917_v25  ;;  %1945 = vmax.xlane.f32.xlu1 %v1918_v35 }
 0x432   : > { %1947 = vmax.xlane.f32.xlu0 %v1919_v57  ;;  %1949 = vmax.xlane.f32.xlu1 %v1920_v8 }
 0x436   : > { %1951 = vmax.xlane.f32.xlu0 %v1921_v37  ;;  %1953 = vmax.xlane.f32.xlu1 %v1922_v43  ;;  %v4745_v43 = vld [vmem:[#allocation5 + $0x20] sm:$0xff] }
 0x4a7   : > { %v1926_v28 = vpop.xlane.xlu0 %1925  ;;  %v1924_v3 = vpop.xlane.xlu1 %1923 }
 0x4a8   : > { %v4720_v31 = vmax.f32 %v4715_v49, %v1926_v28  ;;  %v4723_v61 = vmax.f32 %v4717_v54, %v1924_v3  ;;  %v4747_v28 = vld [vmem:[#allocation5 + $0x28] sm:$0xff]  ;;  %v4765_v3 = vld [vmem:[#allocation5 + $0x30] sm:$0xff] }
 0x4aa   : > { %2559 = vst.msk [vmem:[#allocation5 + $0x8] sm:$0xff] %vm2557_vm6, %v4720_v31  ;;  %2558 = vst.msk [vmem:[#allocation5] sm:$0xff] %vm2557_vm6, %v4723_v61  ;;  %v3504_v25 = vpack.c.bf16 %v4720_v31, %v4723_v61 }
 0x4ab   : > { %v1928_v35 = vpop.xlane.xlu0 %1927  ;;  %v1930_v57 = vpop.xlane.xlu1 %1929 }
 0x4ac   : > { %v4740_v8 = vmax.f32 %v4725_v11, %v1928_v35  ;;  %v4743_v37 = vmax.f32 %v4727_v56, %v1930_v57  ;;  %3505 = vmatprep.subr.bf16.mxu1 %v3504_v25 }
 0x4ad   : > { %3507 = vmatpush3.bf16.msra.mxu1 %v3504_v25 }
 0x4ae   : > { %2560 = vst.msk [vmem:[#allocation5 + $0x10] sm:$0xff] %vm2557_vm6, %v4740_v8  ;;  %2561 = vst.msk [vmem:[#allocation5 + $0x18] sm:$0xff] %vm2557_vm6, %v4743_v37  ;;  %v3508_v35 = vpack.c.bf16 %v4743_v37, %v4740_v8 }
 0x4af   : > { %v1932_v25 = vpop.xlane.xlu0 %1931  ;;  %v1934_v57 = vpop.xlane.xlu1 %1933 }
 0x4b0   : > { %v4760_v12 = vmax.f32 %v4745_v43, %v1932_v25  ;;  %v4763_v15 = vmax.f32 %v4747_v28, %v1934_v57  ;;  %3509 = vmatprep.subr.bf16.mxu1 %v3508_v35 }
 0x4b1   : > { %3511 = vmatpush3.bf16.msra.mxu1 %v3508_v35 }
 0x4b2   : > { %2562 = vst.msk [vmem:[#allocation5 + $0x20] sm:$0xff] %vm2557_vm6, %v4760_v12  ;;  %2563 = vst.msk [vmem:[#allocation5 + $0x28] sm:$0xff] %vm2557_vm6, %v4763_v15  ;;  %v3512_v25 = vpack.c.bf16 %v4763_v15, %v4760_v12 }
 0x4b3   : > { %v1936_v35 = vpop.xlane.xlu0 %1935  ;;  %v1938_v57 = vpop.xlane.xlu1 %1937 }
 0x4b4   : > { %v4780_v62 = vmax.f32 %v4765_v3, %v1936_v35  ;;  %v4783_v17 = vmax.f32 %v4767_v39, %v1938_v57  ;;  %3513 = vmatprep.subr.bf16.mxu1 %v3512_v25 }
 0x4b5   : > { %3515 = vmatpush3.bf16.msra.mxu1 %v3512_v25 }
 0x4b6   : > { %2564 = vst.msk [vmem:[#allocation5 + $0x30] sm:$0xff] %vm2557_vm6, %v4780_v62  ;;  %2565 = vst.msk [vmem:[#allocation5 + $0x38] sm:$0xff] %vm2557_vm6, %v4783_v17  ;;  %v3516_v35 = vpack.c.bf16 %v4783_v17, %v4780_v62 }
 0x4b7   : > { %v1940_v25 = vpop.xlane.xlu0 %1939  ;;  %v1942_v57 = vpop.xlane.xlu1 %1941 }
 0x4b8   : > { %v4800_v24 = vmax.f32 %v4785_v0, %v1940_v25  ;;  %v4803_v48 = vmax.f32 %v4787_v9, %v1942_v57  ;;  %3517 = vmatprep.subr.bf16.mxu1 %v3516_v35 }
 0x4b9   : > { %3519 = vmatpush3.bf16.msra.mxu1 %v3516_v35 }
 0x4ba   : > { %5372 = vst [vmem:[#allocation29_spill] sm:$0xff] %v4803_v48  ;;  %2566 = vst.msk [vmem:[#allocation5 + $0x40] sm:$0xff] %vm2557_vm6, %v4800_v24  ;;  %v3520_v25 = vpack.c.bf16 %v4803_v48, %v4800_v24 }
 0x4bb   : > { %2567 = vst.msk [vmem:[#allocation5 + $0x48] sm:$0xff] %vm2557_vm6, %v4803_v48  ;;  %v1944_v35 = vpop.xlane.xlu0 %1943  ;;  %v1946_v57 = vpop.xlane.xlu1 %1945 }
 0x4bc   : > { %v4820_v27 = vmax.f32 %v4805_v1, %v1944_v35  ;;  %v4823_v50 = vmax.f32 %v4807_v29, %v1946_v57  ;;  %3521 = vmatprep.subr.bf16.mxu1 %v3520_v25  ;;  %v4847_v1 = vld [vmem:[#allocation5 + $0x78] sm:$0xff] }
 0x4bd   : > { %3523 = vmatpush3.bf16.msra.mxu1 %v3520_v25 }
 0x4be   : > { %5375 = vst [vmem:[#allocation51_spill] sm:$0xff] %v4820_v27  ;;  %5376 = vst [vmem:[#allocation52_spill] sm:$0xff] %v4823_v50  ;;  %v3524_v35 = vpack.c.bf16 %v4823_v50, %v4820_v27 }
 0x4bf   : > { %2568 = vst.msk [vmem:[#allocation5 + $0x50] sm:$0xff] %vm2557_vm6, %v4820_v27  ;;  %2569 = vst.msk [vmem:[#allocation5 + $0x58] sm:$0xff] %vm2557_vm6, %v4823_v50  ;;  %v1948_v25 = vpop.xlane.xlu0 %1947  ;;  %v1950_v57 = vpop.xlane.xlu1 %1949 }
 0x4c0   : > { %v4840_v45 = vmax.f32 %v4825_v14, %v1948_v25  ;;  %v4843_v48 = vmax.f32 %v4827_v5, %v1950_v57  ;;  %3525 = vmatprep.subr.bf16.mxu1 %v3524_v35 }
 0x4c1   : > { %3527 = vmatpush3.bf16.msra.mxu1 %v3524_v35 }
 0x4c2   : > { %2570 = vst.msk [vmem:[#allocation5 + $0x60] sm:$0xff] %vm2557_vm6, %v4840_v45  ;;  %2571 = vst.msk [vmem:[#allocation5 + $0x68] sm:$0xff] %vm2557_vm6, %v4843_v48  ;;  %v3528_v25 = vpack.c.bf16 %v4843_v48, %v4840_v45 }
 0x4c3   : > { %v1952_v35 = vpop.xlane.xlu0 %1951  ;;  %v1954_v57 = vpop.xlane.xlu1 %1953 }
 0x4c4   : > { %v4860_v29 = vmax.f32 %v4845_v47, %v1952_v35  ;;  %v4863_v27 = vmax.f32 %v4847_v1, %v1954_v57  ;;  %3529 = vmatprep.subr.bf16.mxu1 %v3528_v25  ;;  %v5377_v57 = vmov 1.0  }
 0x4c5   : > { %3531 = vmatpush3.bf16.msra.mxu1 %v3528_v25 }
 0x4c6   : > { %v1985_v30 = vsub.f32 %v4845_v47, %v4860_v29  ;;  %2572 = vst.msk [vmem:[#allocation5 + $0x70] sm:$0xff] %vm2557_vm6, %v4860_v29  ;;  %v1986_v50 = vsub.f32 %v4847_v1, %v4863_v27  ;;  %2573 = vst.msk [vmem:[#allocation5 + $0x78] sm:$0xff] %vm2557_vm6, %v4863_v27  ;;  %v3532_v35 = vpack.c.bf16 %v4863_v27, %v4860_v29 }
 0x4c8   : > { %3533 = vmatprep.subr.bf16.mxu1 %v3532_v35 }
 0x4c9   : > { %3535 = vmatpush3.bf16.msra.mxu1 %v3532_v35 }
 0x4cc   : > { %3413 = vmatmul.mubr.msk.f32.vlgmr.msra.gmra.mrb[16].mxu1 %vm1057_vm11, %v5377_v57  ;;  %vm5378_vm11 = vcmp.eq.s32.totalorder %v4186_v26, %v5349_v44 }
 0x4cd   : > { %3415 = vmatprep.mubr.msk.f32.mxu1 %vm1058_vm13, %v5377_v57  ;;  %vm5379_vm13 = vcmp.eq.s32.totalorder %v4186_v26, %v5345_v36 }
 0x4d0   : > { %3416 = vmatmul.mubr.msk.f32.gmra.mrb[18].mxu1 %vm1059_vm14, %v5377_v57  ;;  %vm5380_vm14 = vcmp.eq.s32.totalorder %v4186_v26, %v5347_v13 }
 0x4d1   : > { %3418 = vmatprep.mubr.msk.f32.mxu1 %vm1060_vm15, %v5377_v57  ;;  %vm5381_vm15 = vcmp.eq.s32.totalorder %v4186_v26, %v5353_v6 }
 0x4d4   : > { %3419 = vmatmul.mubr.msk.f32.gmra.mrb[20].mxu1 %vm1061_vm0, %v5377_v57  ;;  %vm5382_vm0 = vcmp.eq.s32.totalorder %v4186_v26, %v5351_v10 }
 0x4d5   : > { %3421 = vmatprep.mubr.msk.f32.mxu1 %vm1062_vm1, %v5377_v57  ;;  %vm5383_vm1 = vcmp.eq.s32.totalorder %v4186_v26, %v5355_v22 }
 0x4d8   : > { %3422 = vmatmul.mubr.msk.f32.gmra.mrb[22].mxu1 %vm1063_vm2, %v5377_v57  ;;  %vm5384_vm2 = vcmp.eq.s32.totalorder %v4186_v26, %v5357_v20 }
 0x4d9   : > { %3424 = vmatprep.mubr.msk.f32.mxu1 %vm5378_vm11, %v5377_v57 }
 0x4dc   : > { %3425 = vmatmul.mubr.msk.f32.gmra.mrb[24].mxu1 %vm1065_vm4, %v5377_v57 }
 0x4dd   : > { %3427 = vmatprep.mubr.msk.f32.mxu1 %vm5379_vm13, %v5377_v57 }
 0x4e0   : > { %3428 = vmatmul.mubr.msk.f32.gmra.mrb[26].mxu1 %vm5380_vm14, %v5377_v57 }
 0x4e1   : > { %3430 = vmatprep.mubr.msk.f32.mxu1 %vm5381_vm15, %v5377_v57 }
 0x4e4   : > { %3431 = vmatmul.mubr.msk.f32.gmra.mrb[28].mxu1 %vm5382_vm0, %v5377_v57 }
 0x4e5   : > { %3433 = vmatprep.mubr.msk.f32.mxu1 %vm5383_vm1, %v5377_v57 }
 0x4e8   : > { %3434 = vmatmul.mubr.msk.f32.gmra.mrb[30].mxu1 %vm5384_vm2, %v5377_v57 }
 0x59f   : > { %v3414_v58 = vpop.f32.mrb[16].mxu1 }
 0x5a0   : > { %v2165_v23 = vsub.f32 %v4496_v32, %v3414_v58  ;;  %v2085_v38 = vpop.f32.mrb[17].mxu1 }
 0x5a1   : > { %v2164_v7 = vsub.f32 %v4489_v60, %v2085_v38 }
 0x5a2   : > { %v2182_v19 = vmul.f32 1.442695, %v2165_v23 }
 0x5a3   : > { %v2180_v34 = vmul.f32 1.442695, %v2164_v7  ;;  %v3417_v63 = vpop.f32.mrb[18].mxu1 }
 0x5a4   : > { %3600 = vpow2.f32 %v2182_v19  ;;  %v2167_v33 = vsub.f32 %v4483_v16, %v3417_v63  ;;  %v2095_v36 = vpop.f32.mrb[19].mxu1 }
 0x5a5   : > { %3602 = vpow2.f32 %v2180_v34  ;;  %v2166_v13 = vsub.f32 %v4479_v55, %v2095_v36 }
 0x5a6   : > { %v2186_v44 = vmul.f32 1.442695, %v2167_v33 }
 0x5a7   : > { %v2184_v10 = vmul.f32 1.442695, %v2166_v13  ;;  %v3420_v26 = vpop.f32.mrb[20].mxu1 }
 0x5a8   : > { %3604 = vpow2.f32 %v2186_v44  ;;  %v2169_v6 = vsub.f32 %v4527_v4, %v3420_v26  ;;  %v2105_v32 = vpop.f32.mrb[21].mxu1 }
 0x5a9   : > { %3606 = vpow2.f32 %v2184_v10  ;;  %v2168_v60 = vsub.f32 %v4519_v51, %v2105_v32 }
 0x5aa   : > { %v2190_v22 = vmul.f32 1.442695, %v2169_v6 }
 0x5ab   : > { %v2188_v20 = vmul.f32 1.442695, %v2168_v60  ;;  %v3423_v25 = vpop.f32.mrb[22].mxu1 }
 0x5ac   : > { %3608 = vpow2.f32 %v2190_v22  ;;  %v2171_v16 = vsub.f32 %v4511_v46, %v3423_v25  ;;  %v2115_v35 = vpop.f32.mrb[23].mxu1 }
 0x5ad   : > { %3610 = vpow2.f32 %v2188_v20  ;;  %v2170_v55 = vsub.f32 %v4503_v40, %v2115_v35 }
 0x5ae   : > { %v3601_v57 = vpop.eup %3600  ;;  %v2194_v58 = vmul.f32 1.442695, %v2171_v16 }
 0x5af   : > { %v3603_v23 = vpop.eup %3602  ;;  %v2192_v38 = vmul.f32 1.442695, %v2170_v55  ;;  %2219 = vperm.xlu1 %3599, %v3601_v57   ;;  %v3426_v4 = vpop.f32.mrb[24].mxu1 }
 0x5b0   : > { %3612 = vpow2.f32 %v2194_v58  ;;  %v2173_v7 = vsub.f32 %v4548_v52, %v3426_v4  ;;  %2214 = vperm.xlu0 %3598, %v3603_v23   ;;  %v2125_v51 = vpop.f32.mrb[25].mxu1 }
 0x5b1   : > { %3614 = vpow2.f32 %v2192_v38  ;;  %v2172_v19 = vsub.f32 %v4544_v59, %v2125_v51 }
 0x5b2   : > { %v3605_v34 = vpop.eup %3604  ;;  %v2198_v46 = vmul.f32 1.442695, %v2173_v7 }
 0x5b3   : > { %v3607_v63 = vpop.eup %3606  ;;  %v2196_v33 = vmul.f32 1.442695, %v2172_v19  ;;  %v3429_v36 = vpop.f32.mrb[26].mxu1 }
 0x5b4   : > { %3616 = vpow2.f32 %v2198_v46  ;;  %v2175_v40 = vsub.f32 %v4540_v53, %v3429_v36  ;;  %2229 = vperm.xlu0 %3598, %v3605_v34   ;;  %2224 = vperm.xlu1 %3599, %v3607_v63   ;;  %v2135_v13 = vpop.f32.mrb[27].mxu1 }
 0x5b5   : > { %3618 = vpow2.f32 %v2196_v33  ;;  %v2174_v44 = vsub.f32 %v4535_v2, %v2135_v13 }
 0x5b6   : > { %v3609_v52 = vpop.eup %3608  ;;  %v2202_v10 = vmul.f32 1.442695, %v2175_v40 }
 0x5b7   : > { %v3611_v26 = vpop.eup %3610  ;;  %v2200_v6 = vmul.f32 1.442695, %v2174_v44  ;;  %v3432_v32 = vpop.f32.mrb[28].mxu1 }
 0x5b8   : > { %3620 = vpow2.f32 %v2202_v10  ;;  %v2177_v59 = vsub.f32 %v4562_v18, %v3432_v32  ;;  %2239 = vperm.xlu0 %3598, %v3609_v52   ;;  %2234 = vperm.xlu1 %3599, %v3611_v26   ;;  %v2145_v60 = vpop.f32.mrb[29].mxu1  ;;  %v5396_v52 = vld [vmem:[#allocation48_spill] sm:$0xff]  ;;  %v5397_v10 = vld [vmem:[#allocation47_spill] sm:$0xff] }
 0x5b9   : > { %3622 = vpow2.f32 %v2200_v6  ;;  %v2176_v53 = vsub.f32 %v4558_v21, %v2145_v60  ;;  %v5385_v21 = vsub.f32 %v4715_v49, %v4720_v31  ;;  %v5388_v49 = vsub.f32 %v4727_v56, %v4743_v37  ;;  %v5404_v60 = vld [vmem:[#allocation52_spill] sm:$0xff] }
 0x5ba   : > { %v3613_v22 = vpop.eup %3612  ;;  %v2206_v20 = vmul.f32 1.442695, %v2177_v59  ;;  %v5391_v56 = vsub.f32 %v4765_v3, %v4780_v62  ;;  %v5394_v62 = vld [vmem:[#allocation29_spill] sm:$0xff]  ;;  %vm1212_vm4 = vcmp.eq.s32.totalorder %v5397_v10, %v5396_v52  ;;  %v5399_v6 = vmov 1.0|1.0   ;;  %v5417_v10 = vld [vmem:[#allocation40_spill] sm:$0xff] }
 0x5bb   : > { %v3615_v25 = vpop.eup %3614  ;;  %v2204_v16 = vmul.f32 1.442695, %v2176_v53  ;;  %v3435_v35 = vpop.f32.mrb[30].mxu1  ;;  %v1989_v4 = vmul.f32 1.442695, %v5385_v21  ;;  %v5395_v3 = vsub.f32 %v4787_v9, %v5394_v62  ;;  %v5403_v9 = vld [vmem:[#allocation50_spill] sm:$0xff] }
 0x5bc   : > { %3624 = vpow2.f32 %v2206_v20  ;;  %v2179_v2 = vsub.f32 %v4569_v42, %v3435_v35  ;;  %2249 = vperm.xlu0 %3598, %v3613_v22   ;;  %2244 = vperm.xlu1 %3599, %v3615_v25   ;;  %v2155_v55 = vpop.f32.mrb[31].mxu1  ;;  %v5386_v42 = vsub.f32 %v4717_v54, %v4723_v61  ;;  %v1993_v31 = vmul.f32 1.442695, %v5388_v49  ;;  %v5411_v49 = vld [vmem:[#allocation31_spill] sm:$0xff] }
 0x5bd   : > { %3626 = vpow2.f32 %v2204_v16  ;;  %v2178_v18 = vsub.f32 %v4566_v41, %v2155_v55  ;;  %v5387_v41 = vsub.f32 %v4725_v11, %v4740_v8  ;;  %v5389_v54 = vsub.f32 %v4745_v43, %v4760_v12 }
 0x5be   : > { %v3617_v57 = vpop.eup %3616  ;;  %v2210_v58 = vmul.f32 1.442695, %v2179_v2  ;;  %v1987_v7 = vmul.f32 1.442695, %v5386_v42  ;;  %v5390_v11 = vsub.f32 %v4747_v28, %v4763_v15  ;;  %v1999_v37 = vmul.f32 1.442695, %v5391_v56 }
 0x5bf   : > { %v3619_v23 = vpop.eup %3618  ;;  %v2208_v38 = vmul.f32 1.442695, %v2178_v18  ;;  %v1991_v34 = vmul.f32 1.442695, %v5387_v41  ;;  %v1995_v61 = vmul.f32 1.442695, %v5389_v54  ;;  %v5392_v12 = vsub.f32 %v4767_v39, %v4783_v17 }
 0x5c0   : > { %3628 = vpow2.f32 %v2210_v58  ;;  %2259 = vperm.xlu0 %3598, %v3617_v57   ;;  %2254 = vperm.xlu1 %3599, %v3619_v23   ;;  %v1997_v8 = vmul.f32 1.442695, %v5390_v11  ;;  %v5393_v15 = vsub.f32 %v4785_v0, %v4800_v24  ;;  %v2005_v44 = vmul.f32 1.442695, %v5395_v3  ;;  %v5398_v17 = vld [vmem:[#allocation18_spill] sm:$0xff]  ;;  %v5401_v0 = vld [vmem:[#allocation51_spill] sm:$0xff] }
 0x5c1   : > { %3630 = vpow2.f32 %v2208_v38  ;;  %v2001_v43 = vmul.f32 1.442695, %v5392_v12  ;;  %vm1213_vm3 = vcmp.eq.s32.totalorder %v5398_v17, %v5396_v52  ;;  %v5400_v24 = vld [vmem:[#allocation30_spill] sm:$0xff]  ;;  %v5405_v53 = vsub.f32 %v5403_v9, %v5404_v60  ;;  %v5410_v41 = vld [vmem:[#allocation33_spill] sm:$0xff] }
 0x5c2   : > { %v3621_v51 = vpop.eup %3620  ;;  %3632 = vpow2.f32 %v1989_v4  ;;  %v2003_v28 = vmul.f32 1.442695, %v5393_v15  ;;  %vm3082_vm12 = vmpackc.low %vm1213_vm3, %vm1212_vm4  ;;  %v5402_v32 = vsub.f32 %v5400_v24, %v5401_v0  ;;  %v5406_v16 = vsub.f32 %v4825_v14, %v4840_v45  ;;  %v5409_v4 = vld [vmem:[#allocation32_spill] sm:$0xff]  ;;  %v5414_v12 = vld [vmem:[#allocation37_spill] sm:$0xff] }
 0x5c3   : > { %v3623_v19 = vpop.eup %3622  ;;  %3634 = vpow2.f32 %v1987_v7  ;;  %3452 = vmatprep.mubr.msk.bf16.mxu0 %vm3082_vm12, %v5399_v6  ;;  %v2009_v22 = vmul.f32 1.442695, %v5405_v53  ;;  %v5407_v2 = vsub.f32 %v4827_v5, %v4843_v48  ;;  %v2015_v58 = vmul.f32 1.442695, %v1985_v30  ;;  %v5416_v3 = vld [vmem:[#allocation42_spill] sm:$0xff]  ;;  %v5418_v0 = vld [vmem:[#allocation41_spill] sm:$0xff] }
 0x5c4   : > { %2269 = vperm.xlu0 %3598, %v3621_v51   ;;  %2264 = vperm.xlu1 %3599, %v3623_v19   ;;  %3636 = vpow2.f32 %v1991_v34  ;;  %v2007_v59 = vmul.f32 1.442695, %v5402_v32  ;;  %v2011_v35 = vmul.f32 1.442695, %v5406_v16  ;;  %v2017_v45 = vmul.f32 1.442695, %v1986_v50 }
 0x5c5   : > { %3638 = vpow2.f32 %v1993_v31  ;;  %v2013_v55 = vmul.f32 1.442695, %v5407_v2  ;;  %v5408_v50 = vld [vmem:[#allocation34_spill] sm:$0xff]  ;;  %v5421_v16 = vld [vmem:[#allocation44_spill] sm:$0xff] }
 0x5c6   : > { %v3625_v46 = vpop.eup %3624  ;;  %3640 = vpow2.f32 %v1995_v61  ;;  %v5412_v61 = vld [vmem:[#allocation38_spill] sm:$0xff] }
 0x5c7   : > { %v3627_v63 = vpop.eup %3626  ;;  %3642 = vpow2.f32 %v1997_v8  ;;  %v5413_v8 = vld [vmem:[#allocation36_spill] sm:$0xff] }
 0x5c8   : > { %2279 = vperm.xlu0 %3598, %v3625_v46   ;;  %2274 = vperm.xlu1 %3599, %v3627_v63   ;;  %3644 = vpow2.f32 %v1999_v37 }
 0x5c9   : > { %3646 = vpow2.f32 %v2001_v43 }
 0x5ca   : > { %v3629_v33 = vpop.eup %3628  ;;  %3648 = vpow2.f32 %v2003_v28 }
 0x5cb   : > { %v3631_v36 = vpop.eup %3630  ;;  %3650 = vpow2.f32 %v2005_v44 }
 0x5cc   : > { %2289 = vperm.xlu0 %3598, %v3629_v33   ;;  %2284 = vperm.xlu1 %3599, %v3631_v36   ;;  %v3633_v40 = vpop.eup %3632  ;;  %3652 = vpow2.f32 %v2007_v59  ;;  %v5419_v59 = vld [vmem:[#allocation39_spill] sm:$0xff] }
 0x5cd   : > { %v3635_v13 = vpop.eup %3634  ;;  %3654 = vpow2.f32 %v2009_v22 }
 0x5ce   : > { %v3637_v39 = vpop.eup %3636  ;;  %3656 = vpow2.f32 %v2011_v35 }
 0x5cf   : > { %v3639_v26 = vpop.eup %3638  ;;  %3658 = vpow2.f32 %v2013_v55 }
 0x5d0   : > { %2339 = vperm.xlu0 %3598, %v3633_v40   ;;  %2334 = vperm.xlu1 %3599, %v3635_v13   ;;  %v3641_v20 = vpop.eup %3640  ;;  %3660 = vpow2.f32 %v2015_v58  ;;  %v5415_v40 = vld [vmem:[#allocation35_spill] sm:$0xff] }
 0x5d1   : > { %v3643_v25 = vpop.eup %3642  ;;  %3662 = vpow2.f32 %v2017_v45  ;;  %v5423_v45 = vld [vmem:[#allocation43_spill] sm:$0xff] }
 0x5d2   : > { %v3645_v18 = vpop.eup %3644 }
 0x5d3   : > { %v3647_v57 = vpop.eup %3646 }
 0x5d4   : > { %2349 = vperm.xlu0 %3598, %v3639_v26   ;;  %2344 = vperm.xlu1 %3599, %v3637_v39   ;;  %v3649_v14 = vpop.eup %3648 }
 0x5d5   : > { %v3651_v23 = vpop.eup %3650 }
 0x5d6   : > { %v3653_v5 = vpop.eup %3652 }
 0x5d7   : > { %v3655_v48 = vpop.eup %3654 }
 0x5d8   : > { %2359 = vperm.xlu0 %3598, %v3643_v25   ;;  %2354 = vperm.xlu1 %3599, %v3641_v20   ;;  %v3657_v38 = vpop.eup %3656  ;;  %v5420_v20 = vld [vmem:[#allocation46_spill] sm:$0xff] }
 0x5d9   : > { %v3659_v47 = vpop.eup %3658 }
 0x5da   : > { %v3661_v30 = vpop.eup %3660 }
 0x5db   : > { %v3663_v29 = vpop.eup %3662 }
 0x5dc   : > { %2369 = vperm.xlu0 %3598, %v3647_v57   ;;  %2364 = vperm.xlu1 %3599, %v3645_v18   ;;  %v5422_v57 = vld [vmem:[#allocation45_spill] sm:$0xff] }
 0x5e0   : > { %2379 = vperm.xlu0 %3598, %v3651_v23   ;;  %2374 = vperm.xlu1 %3599, %v3649_v14  }
 0x5e4   : > { %2389 = vperm.xlu0 %3598, %v3655_v48   ;;  %2384 = vperm.xlu1 %3599, %v3653_v5   ;;  %v5424_v5 = vld [vmem:[#allocation16_spill] sm:$0xff]  ;;  %v5425_v48 = vld [vmem:[#allocation21_spill] sm:$0xff] }
 0x5e5   : > { %vm1216_vm7 = vcmp.eq.s32.totalorder %v5424_v5, %v5396_v52  ;;  %vm1217_vm10 = vcmp.eq.s32.totalorder %v5425_v48, %v5396_v52 }
 0x5e6   : > { %vm3086_vm9 = vmpackc.low %vm1217_vm10, %vm1216_vm7 }
 0x5e8   : > { %2399 = vperm.xlu0 %3598, %v3659_v47   ;;  %2394 = vperm.xlu1 %3599, %v3657_v38   ;;  %v5427_v47 = vld [vmem:[#allocation22_spill] sm:$0xff] }
 0x5e9   : > { %vm1218_vm8 = vcmp.eq.s32.totalorder %v5427_v47, %v5396_v52 }
 0x5ec   : > { %2404 = vperm.xlu1 %3599, %v3661_v30   ;;  %2409 = vperm.xlu0 %3598, %v3663_v29   ;;  %v5428_v30 = vld [vmem:[#allocation20_spill] sm:$0xff] }
 0x5ed   : > { %vm1219_vm6 = vcmp.eq.s32.totalorder %v5428_v30, %v5396_v52  ;;  %v5429_v29 = vld [vmem:[#allocation24_spill] sm:$0xff] }
 0x5ee   : > { %vm1220_vm11 = vcmp.eq.s32.totalorder %v5429_v29, %v5396_v52  ;;  %vm3088_vm14 = vmpackc.low %vm1219_vm6, %vm1218_vm8 }
 0x62e   : > { %v2220_v27 = vpop.permute.xlu1 %2219 }
 0x62f   : > { %v2293_v1 = vmul.f32 %v2220_v27, %v5408_v50  ;;  %v2215_v21 = vpop.permute.xlu0 %2214  ;;  %v5430_v27 = vld [vmem:[#allocation19_spill] sm:$0xff]  ;;  %v5431_v50 = vld [vmem:[#allocation17_spill] sm:$0xff] }
 0x630   : > { %v2292_v42 = vmul.f32 %v2215_v21, %v5409_v4  ;;  %vm1221_vm13 = vcmp.eq.s32.totalorder %v5430_v27, %v5396_v52  ;;  %v5433_v21 = vld [vmem:[#allocation26_spill] sm:$0xff]  ;;  %v5434_v4 = vld [vmem:[#allocation23_spill] sm:$0xff] }
 0x631   : > { %vm3090_vm15 = vmpackc.low %vm1221_vm13, %vm1220_vm11  ;;  %vm1224_vm1 = vcmp.eq.s32.totalorder %v5433_v21, %v5396_v52  ;;  %vm1225_vm2 = vcmp.eq.s32.totalorder %v5434_v4, %v5396_v52  ;;  %v2330_v4 = vld [vmem:[#allocation6 + $0x70] sm:$0xff] }
 0x632   : > { %v2308_v7 = vpack.c.bf16 %v2293_v1, %v2292_v42  ;;  %v5432_v1 = vld [vmem:[#allocation25_spill] sm:$0xff]  ;;  %vm3094_vm3 = vmpackc.low %vm1225_vm2, %vm1224_vm1  ;;  %v5435_v42 = vld [vmem:[#allocation28_spill] sm:$0xff] }
 0x633   : > { %v2230_v51 = vpop.permute.xlu0 %2229  ;;  %v2225_v19 = vpop.permute.xlu1 %2224  ;;  %vm1223_vm0 = vcmp.eq.s32.totalorder %v5432_v1, %v5396_v52  ;;  %vm1226_vm12 = vcmp.eq.s32.totalorder %v5435_v42, %v5396_v52 }
 0x634   : > { %v2295_v34 = vmul.f32 %v5410_v41, %v2230_v51  ;;  %v2294_v31 = vmul.f32 %v5411_v49, %v2225_v19  ;;  %3436 = vmatprep.subr.bf16.mxu0 %v2308_v7 }
 0x635   : > { %3437 = vmatpush3.bf16.msra.mxu0 %v2308_v7  ;;  %v5436_v7 = vld [vmem:[#allocation27_spill] sm:$0xff] }
 0x636   : > { %v2309_v46 = vpack.c.bf16 %v2295_v34, %v2294_v31  ;;  %vm1227_vm7 = vcmp.eq.s32.totalorder %v5436_v7, %v5396_v52 }
 0x637   : > { %v2240_v63 = vpop.permute.xlu0 %2239  ;;  %v2235_v54 = vpop.permute.xlu1 %2234  ;;  %vm3096_vm10 = vmpackc.low %vm1227_vm7, %vm1226_vm12 }
 0x638   : > { %v2297_v11 = vmul.f32 %v2240_v63, %v5412_v61  ;;  %v2296_v33 = vmul.f32 %v2235_v54, %v5413_v8  ;;  %3438 = vmatprep.subr.bf16.mxu0 %v2309_v46  ;;  %v2316_v54 = vld [vmem:[#allocation6] sm:$0xff]  ;;  %v2319_v61 = vld [vmem:[#allocation6 + $0x18] sm:$0xff]  ;;  %v2317_v8 = vld [vmem:[#allocation6 + $0x8] sm:$0xff] }
 0x639   : > { %3439 = vmatpush3.bf16.msra.mxu0 %v2309_v46  ;;  %v2318_v46 = vld [vmem:[#allocation6 + $0x10] sm:$0xff] }
 0x63a   : > { %v2310_v36 = vpack.c.bf16 %v2297_v11, %v2296_v33 }
 0x63b   : > { %v2250_v56 = vpop.permute.xlu0 %2249  ;;  %v2245_v37 = vpop.permute.xlu1 %2244 }
 0x63c   : > { %v2299_v43 = vmul.f32 %v5414_v12, %v2250_v56  ;;  %v2298_v13 = vmul.f32 %v5415_v40, %v2245_v37  ;;  %3440 = vmatprep.subr.bf16.mxu0 %v2310_v36 }
 0x63d   : > { %3441 = vmatpush3.bf16.msra.mxu0 %v2310_v36 }
 0x63e   : > { %v2311_v15 = vpack.c.bf16 %v2299_v43, %v2298_v13 }
 0x63f   : > { %v2260_v28 = vpop.permute.xlu0 %2259  ;;  %v2255_v62 = vpop.permute.xlu1 %2254 }
 0x640   : > { %v2301_v44 = vmul.f32 %v2260_v28, %v5416_v3  ;;  %v2300_v17 = vmul.f32 %v2255_v62, %v5417_v10  ;;  %3442 = vmatprep.subr.bf16.mxu0 %v2311_v15  ;;  %v2322_v62 = vld [vmem:[#allocation6 + $0x30] sm:$0xff]  ;;  %v2320_v10 = vld [vmem:[#allocation6 + $0x20] sm:$0xff] }
 0x641   : > { %3443 = vmatpush3.bf16.msra.mxu0 %v2311_v15 }
 0x642   : > { %v2312_v39 = vpack.c.bf16 %v2301_v44, %v2300_v17  ;;  %v2323_v17 = vld [vmem:[#allocation6 + $0x38] sm:$0xff] }
 0x643   : > { %v2270_v26 = vpop.permute.xlu0 %2269  ;;  %v2265_v24 = vpop.permute.xlu1 %2264 }
 0x644   : > { %v2303_v32 = vmul.f32 %v5418_v0, %v2270_v26  ;;  %v2302_v9 = vmul.f32 %v5419_v59, %v2265_v24  ;;  %3444 = vmatprep.subr.bf16.mxu0 %v2312_v39 }
 0x645   : > { %3445 = vmatpush3.bf16.msra.mxu0 %v2312_v39  ;;  %v2321_v39 = vld [vmem:[#allocation6 + $0x28] sm:$0xff] }
 0x646   : > { %v2313_v60 = vpack.c.bf16 %v2303_v32, %v2302_v9 }
 0x647   : > { %v2280_v53 = vpop.permute.xlu0 %2279  ;;  %v2275_v22 = vpop.permute.xlu1 %2274 }
 0x648   : > { %v2305_v25 = vmul.f32 %v2280_v53, %v5420_v20  ;;  %v2304_v35 = vmul.f32 %v2275_v22, %v5421_v16  ;;  %3446 = vmatprep.subr.bf16.mxu0 %v2313_v60 }
 0x649   : > { %3447 = vmatpush3.bf16.msra.mxu0 %v2313_v60 }
 0x64a   : > { %v2314_v2 = vpack.c.bf16 %v2305_v25, %v2304_v35 }
 0x64b   : > { %v2290_v55 = vpop.permute.xlu0 %2289  ;;  %v2285_v18 = vpop.permute.xlu1 %2284 }
 0x64c   : > { %v2307_v58 = vmul.f32 %v5422_v57, %v2290_v55  ;;  %v2306_v14 = vmul.f32 %v5423_v45, %v2285_v18  ;;  %3448 = vmatprep.subr.bf16.mxu0 %v2314_v2  ;;  %v2324_v18 = vld [vmem:[#allocation6 + $0x40] sm:$0xff]  ;;  %v2327_v57 = vld [vmem:[#allocation6 + $0x58] sm:$0xff]  ;;  %v2325_v45 = vld [vmem:[#allocation6 + $0x48] sm:$0xff] }
 0x64d   : > { %3449 = vmatpush3.bf16.msra.mxu0 %v2314_v2  ;;  %v2326_v2 = vld [vmem:[#allocation6 + $0x50] sm:$0xff] }
 0x64e   : > { %v2315_v23 = vpack.c.bf16 %v2307_v58, %v2306_v14 }
 0x64f   : > { %v2335_v51 = vpop.permute.xlu1 %2334  ;;  %v2340_v19 = vpop.permute.xlu0 %2339 }
 0x650   : > { %3450 = vmatprep.subr.bf16.mxu0 %v2315_v23  ;;  %v2412_v36 = vmul.f32 %v2335_v51, %v2316_v54  ;;  %v2413_v43 = vmul.f32 %v2340_v19, %v2317_v8  ;;  %v2328_v51 = vld [vmem:[#allocation6 + $0x60] sm:$0xff]  ;;  %v2331_v19 = vld [vmem:[#allocation6 + $0x78] sm:$0xff] }
 0x651   : > { %3451 = vmatpush3.bf16.msra.mxu0 %v2315_v23 }
 0x653   : > { %v2345_v41 = vpop.permute.xlu1 %2344  ;;  %v2350_v34 = vpop.permute.xlu0 %2349 }
 0x654   : > { %3453 = vmatmul.mubr.msk.bf16.vlgmr.msra.gmra.mrb[32].mxu0 %vm4592_vm5, %v5399_v6  ;;  %vm1222_vm5 = vcmp.eq.s32.totalorder %v5431_v50, %v5396_v52  ;;  %v2414_v33 = vmul.f32 %v2345_v41, %v2318_v46  ;;  %v2415_v37 = vmul.f32 %v2350_v34, %v2319_v61  ;;  %v2329_v34 = vld [vmem:[#allocation6 + $0x68] sm:$0xff] }
 0x655   : > { %3456 = vmatprep.mubr.msk.bf16.mxu0 %vm3086_vm9, %v5399_v6  ;;  %vm3092_vm4 = vmpackc.low %vm1223_vm0, %vm1222_vm5 }
 0x657   : > { %v2355_v49 = vpop.permute.xlu1 %2354  ;;  %v2360_v31 = vpop.permute.xlu0 %2359 }
 0x658   : > { %v2416_v24 = vmul.f32 %v2355_v49, %v2320_v10  ;;  %v2417_v53 = vmul.f32 %v2360_v31, %v2321_v39 }
 0x65b   : > { %v2365_v63 = vpop.permute.xlu1 %2364  ;;  %v2370_v11 = vpop.permute.xlu0 %2369 }
 0x65c   : > { %3457 = vmatmul.mubr.msk.bf16.gmra.mrb[36].mxu0 %vm3088_vm14, %v5399_v6  ;;  %v2418_v26 = vmul.f32 %v2365_v63, %v2322_v62  ;;  %v2419_v59 = vmul.f32 %v2370_v11, %v2323_v17 }
 0x65d   : > { %3460 = vmatprep.mubr.msk.bf16.mxu0 %vm3090_vm15, %v5399_v6 }
 0x65f   : > { %v2380_v3 = vpop.permute.xlu0 %2379 }
 0x660   : > { %v2421_v29 = vmul.f32 %v2380_v3, %v2325_v45 }
 0x663   : > { %v2390_v22 = vpop.permute.xlu0 %2389 }
 0x664   : > { %3461 = vmatmul.mubr.msk.bf16.gmra.mrb[40].mxu0 %vm3092_vm4, %v5399_v6  ;;  %v2423_v38 = vmul.f32 %v2390_v22, %v2327_v57 }
 0x665   : > { %3464 = vmatprep.mubr.msk.bf16.mxu0 %vm3094_vm3, %v5399_v6 }
 0x667   : > { %v2400_v5 = vpop.permute.xlu0 %2399 }
 0x668   : > { %v2425_v11 = vmul.f32 %v2400_v5, %v2329_v34 }
 0x66b   : > { %v2410_v41 = vpop.permute.xlu0 %2409 }
 0x66c   : > { %3465 = vmatmul.mubr.msk.bf16.gmra.mrb[44].mxu0 %vm3096_vm10, %v5399_v6  ;;  %v2375_v6 = vpop.permute.xlu1 %2374  ;;  %v2427_v63 = vmul.f32 %v2410_v41, %v2331_v19 }
 0x66d   : > { %v2420_v23 = vmul.f32 %v2375_v6, %v2324_v18  ;;  %v3801_v6 = vmov (!%p3098_p13), 34  }
 0x66e   : > { %3665 = vset.pattern.permute.xlu1 (!%p3098_p13), %v3801_v6  ;;  %3664 = vset.pattern.permute.xlu0 (!%p3098_p13), %v3801_v6 }
 0x670   : > { %v2385_v0 = vpop.permute.xlu1 %2384 }
 0x671   : > { %v2422_v14 = vmul.f32 %v2385_v0, %v2326_v2 }
 0x674   : > { %v2395_v58 = vpop.permute.xlu1 %2394 }
 0x675   : > { %v2424_v31 = vmul.f32 %v2395_v58, %v2328_v51 }
 0x678   : > { %v2405_v42 = vpop.permute.xlu1 %2404 }
 0x679   : > { %v2426_v49 = vmul.f32 %v2405_v42, %v2330_v4 }
 0x727   : > { %v3454_v56 = vpop.f32.mrb[32].mxu0 }
 0x728   : > { %v2527_v52 = vadd.f32 %v3454_v56, %v2414_v33  ;;  %v2462_v12 = vpop.f32.mrb[33].mxu0 }
 0x729   : > { %v2525_v40 = vadd.f32 %v2462_v12, %v2412_v36  ;;  %v3455_v13 = vpop.f32.mrb[34].mxu0 }
 0x72a   : > { %2543 = vst [vmem:[#allocation6 + $0x10] sm:$0xff] %v2527_v52  ;;  %v2528_v15 = vadd.f32 %v3455_v13, %v2415_v37  ;;  %v2465_v28 = vpop.f32.mrb[35].mxu0 }
 0x72b   : > { %2541 = vst [vmem:[#allocation6] sm:$0xff] %v2525_v40  ;;  %v2526_v44 = vadd.f32 %v2465_v28, %v2413_v43 }
 0x72c   : > { %2544 = vst [vmem:[#allocation6 + $0x18] sm:$0xff] %v2528_v15 }
 0x72d   : > { %2542 = vst [vmem:[#allocation6 + $0x8] sm:$0xff] %v2526_v44 }
 0x72f   : > { %v3458_v32 = vpop.f32.mrb[36].mxu0 }
 0x730   : > { %v2531_v9 = vadd.f32 %v3458_v32, %v2418_v26  ;;  %v2478_v60 = vpop.f32.mrb[37].mxu0 }
 0x731   : > { %v2529_v20 = vadd.f32 %v2478_v60, %v2416_v24  ;;  %v3459_v25 = vpop.f32.mrb[38].mxu0  ;;  %v5054_v52 = vld [vmem:[#allocation6 + $0x10] sm:$0xff] (!%p3098_p13) }
 0x732   : > { %2547 = vst [vmem:[#allocation6 + $0x30] sm:$0xff] %v2531_v9  ;;  %v2532_v16 = vadd.f32 %v3459_v25, %v2419_v59  ;;  %v2481_v35 = vpop.f32.mrb[39].mxu0  ;;  %v5056_v12 = vld [vmem:[#allocation6] sm:$0xff] (!%p3098_p13)  ;;  %v2596_v40 = vmax.f32 (!%p3098_p13), %v5054_v52, 1e-30 }
 0x733   : > { %2545 = vst [vmem:[#allocation6 + $0x20] sm:$0xff] %v2529_v20  ;;  %v2530_v55 = vadd.f32 %v2481_v35, %v2417_v53  ;;  %v5058_v43 = vld [vmem:[#allocation6 + $0x18] sm:$0xff] (!%p3098_p13)  ;;  %v2594_v13 = vmax.f32 (!%p3098_p13), %v5056_v12, 1e-30 }
 0x734   : > { %2548 = vst [vmem:[#allocation6 + $0x38] sm:$0xff] %v2532_v16  ;;  %v2597_v15 = vmax.f32 (!%p3098_p13), %v5058_v43, 1e-30  ;;  %v5063_v28 = vld [vmem:[#allocation6 + $0x8] sm:$0xff] (!%p3098_p13)  ;;  %3666 = vrcp.f32 (!%p3098_p13), %v2596_v40 }
 0x735   : > { %2546 = vst [vmem:[#allocation6 + $0x28] sm:$0xff] %v2530_v55  ;;  %v2595_v44 = vmax.f32 (!%p3098_p13), %v5063_v28, 1e-30  ;;  %3668 = vrcp.f32 (!%p3098_p13), %v2594_v13 }
 0x736   : > { %3670 = vrcp.f32 (!%p3098_p13), %v2597_v15 }
 0x737   : > { %v3462_v48 = vpop.f32.mrb[40].mxu0  ;;  %3672 = vrcp.f32 (!%p3098_p13), %v2595_v44 }
 0x738   : > { %v2535_v47 = vadd.f32 %v3462_v48, %v2422_v14  ;;  %v2494_v30 = vpop.f32.mrb[41].mxu0 }
 0x739   : > { %v2533_v27 = vadd.f32 %v2494_v30, %v2420_v23  ;;  %v3463_v50 = vpop.f32.mrb[42].mxu0  ;;  %v5074_v26 = vld [vmem:[#allocation6 + $0x30] sm:$0xff] (!%p3098_p13) }
 0x73a   : > { %2551 = vst [vmem:[#allocation6 + $0x50] sm:$0xff] %v2535_v47  ;;  %v2536_v1 = vadd.f32 %v3463_v50, %v2423_v38  ;;  %v2497_v21 = vpop.f32.mrb[43].mxu0  ;;  %v5067_v3 = vld [vmem:[#allocation6 + $0x20] sm:$0xff] (!%p3098_p13)  ;;  %v2600_v32 = vmax.f32 (!%p3098_p13), %v5074_v26, 1e-30 }
 0x73b   : > { %2549 = vst [vmem:[#allocation6 + $0x40] sm:$0xff] %v2533_v27  ;;  %v2534_v7 = vadd.f32 %v2497_v21, %v2421_v29  ;;  %v2598_v17 = vmax.f32 (!%p3098_p13), %v5067_v3, 1e-30  ;;  %v5072_v39 = vld [vmem:[#allocation6 + $0x38] sm:$0xff] (!%p3098_p13) }
 0x73c   : > { %2552 = vst [vmem:[#allocation6 + $0x58] sm:$0xff] %v2536_v1  ;;  %v5065_v62 = vld [vmem:[#allocation6 + $0x28] sm:$0xff] (!%p3098_p13)  ;;  %v2601_v0 = vmax.f32 (!%p3098_p13), %v5072_v39, 1e-30 }
 0x73d   : > { %2550 = vst [vmem:[#allocation6 + $0x48] sm:$0xff] %v2534_v7  ;;  %v2599_v10 = vmax.f32 (!%p3098_p13), %v5065_v62, 1e-30 }
 0x73e   : > { %v3667_v35 = vpop.eup (!%p3098_p13), %3666 }
 0x73f   : > { %v3466_v46 = vpop.f32.mrb[44].mxu0  ;;  %2577 = sbr.rel (%p3098_p13) target bundleno = 2026 (0x7ea), region = 60  ;;  %3674 = vrcp.f32 (!%p3098_p13), %v2599_v10  ;;  %v3669_v55 = vpop.eup (!%p3098_p13), %3668  ;;  %v2628_v18 = vmul.f32 (!%p3098_p13), %v3667_v35, %v2596_v40 }
 0x740   : > { %v2539_v54 = vadd.f32 %v3466_v46, %v2426_v49  ;;  %v2510_v61 = vpop.f32.mrb[45].mxu0  ;;  %3676 = vrcp.f32 (!%p3098_p13), %v2598_v17  ;;  %v3671_v58 = vpop.eup (!%p3098_p13), %3670  ;;  %v2626_v45 = vmul.f32 (!%p3098_p13), %v3669_v55, %v2594_v13 }
 0x741   : > { %v2537_v8 = vadd.f32 %v2510_v61, %v2424_v31  ;;  %v3467_v33 = vpop.f32.mrb[46].mxu0  ;;  %3678 = vrcp.f32 (!%p3098_p13), %v2601_v0  ;;  %v5086_v22 = vld [vmem:[#allocation6 + $0x50] sm:$0xff] (!%p3098_p13)  ;;  %v3673_v5 = vpop.eup (!%p3098_p13), %3672  ;;  %v2644_v48 = vsub.f32 (!%p3098_p13), 2.0, %v2628_v18  ;;  %v2629_v38 = vmul.f32 (!%p3098_p13), %v3671_v58, %v2597_v15 }
 0x742   : > { %2555 = vst [vmem:[#allocation6 + $0x70] sm:$0xff] %v2539_v54  ;;  %v2540_v36 = vadd.f32 %v3467_v33, %v2427_v63  ;;  %v2513_v56 = vpop.f32.mrb[47].mxu0  ;;  %v5080_v59 = vld [vmem:[#allocation6 + $0x40] sm:$0xff] (!%p3098_p13)  ;;  %3680 = vrcp.f32 (!%p3098_p13), %v2600_v32  ;;  %v2604_v25 = vmax.f32 (!%p3098_p13), %v5086_v22, 1e-30  ;;  %v2642_v29 = vsub.f32 (!%p3098_p13), 2.0, %v2626_v45 }
 0x743   : > { %2553 = vst [vmem:[#allocation6 + $0x60] sm:$0xff] %v2537_v8  ;;  %v2538_v37 = vadd.f32 %v2513_v56, %v2425_v11  ;;  %v2602_v60 = vmax.f32 (!%p3098_p13), %v5080_v59, 1e-30  ;;  %v5084_v53 = vld [vmem:[#allocation6 + $0x58] sm:$0xff] (!%p3098_p13)  ;;  %v2627_v27 = vmul.f32 (!%p3098_p13), %v3673_v5, %v2595_v44  ;;  %v2660_v21 = vmul.f32 (!%p3098_p13), %v3667_v35, %v2644_v48 }
 0x744   : > { %2556 = vst [vmem:[#allocation6 + $0x78] sm:$0xff] %v2540_v36  ;;  %v5076_v24 = vld [vmem:[#allocation6 + $0x48] sm:$0xff] (!%p3098_p13)  ;;  %v2605_v20 = vmax.f32 (!%p3098_p13), %v5084_v53, 1e-30  ;;  %v2645_v4 = vsub.f32 (!%p3098_p13), 2.0, %v2629_v38  ;;  %v2658_v19 = vmul.f32 (!%p3098_p13), %v3669_v55, %v2642_v29 }
 0x745   : > { %2554 = vst [vmem:[#allocation6 + $0x68] sm:$0xff] %v2538_v37  ;;  %v2603_v9 = vmax.f32 (!%p3098_p13), %v5076_v24, 1e-30  ;;  %v2643_v41 = vsub.f32 (!%p3098_p13), 2.0, %v2627_v27  ;;  %2686 = vperm.xlu1 (!%p3098_p13), %3665, %v2660_v21  }
 0x746   : > { %v2661_v31 = vmul.f32 %v3671_v58, %v2645_v4  ;;  %2676 = vperm.xlu0 %3664, %v2658_v19  }
 0x747   : > { %3682 = vrcp.f32 %v2603_v9  ;;  %v2659_v61 = vmul.f32 %v3673_v5, %v2643_v41 }
 0x748   : > { %3684 = vrcp.f32 %v2602_v60 }
 0x749   : > { %3686 = vrcp.f32 %v2605_v20  ;;  %v5097_v23 = vld [vmem:[#allocation6 + $0x70] sm:$0xff]  ;;  %v3675_v30 = vpop.eup %3674  ;;  %2691 = vperm.xlu1 %3665, %v2661_v31   ;;  %v2770_v31 = vld [vmem:[#allocation2] sm:$0xff] }
 0x74a   : > { %v5092_v2 = vld [vmem:[#allocation6 + $0x60] sm:$0xff]  ;;  %3688 = vrcp.f32 %v2604_v25  ;;  %v3677_v1 = vpop.eup %3676  ;;  %v2631_v42 = vmul.f32 %v3675_v30, %v2599_v10  ;;  %v2608_v7 = vmax.f32 %v5097_v23, 1e-30  ;;  %2681 = vperm.xlu0 %3664, %v2659_v61   ;;  %v2773_v61 = vld [vmem:[#allocation2 + $0x18] sm:$0xff] }
 0x74b   : > { %v5094_v57 = vld [vmem:[#allocation6 + $0x78] sm:$0xff]  ;;  %v2606_v47 = vmax.f32 %v5092_v2, 1e-30  ;;  %v3679_v51 = vpop.eup %3678  ;;  %v2630_v34 = vmul.f32 %v3677_v1, %v2598_v17 }
 0x74c   : > { %v5090_v16 = vld [vmem:[#allocation6 + $0x68] sm:$0xff]  ;;  %v2609_v50 = vmax.f32 %v5094_v57, 1e-30  ;;  %v3681_v49 = vpop.eup %3680  ;;  %v2647_v46 = vsub.f32 2.0, %v2631_v42  ;;  %v2633_v63 = vmul.f32 %v3679_v51, %v2601_v0 }
 0x74d   : > { %v2607_v14 = vmax.f32 %v5090_v16, 1e-30  ;;  %v2646_v11 = vsub.f32 2.0, %v2630_v34  ;;  %v2632_v8 = vmul.f32 %v3681_v49, %v2600_v32 }
 0x74e   : > { %v2663_v36 = vmul.f32 %v3675_v30, %v2647_v46  ;;  %v2649_v56 = vsub.f32 2.0, %v2633_v63 }
 0x74f   : > { %3690 = vrcp.f32 %v2607_v14  ;;  %v2662_v40 = vmul.f32 %v3677_v1, %v2646_v11  ;;  %v2648_v13 = vsub.f32 2.0, %v2632_v8 }
 0x750   : > { %3692 = vrcp.f32 %v2606_v47  ;;  %2701 = vperm.xlu1 %3665, %v2663_v36   ;;  %v2665_v10 = vmul.f32 %v3679_v51, %v2649_v56 }
 0x751   : > { %v3683_v54 = vpop.eup %3682  ;;  %3694 = vrcp.f32 %v2609_v50  ;;  %2696 = vperm.xlu0 %3664, %v2662_v40   ;;  %v2664_v32 = vmul.f32 %v3681_v49, %v2648_v13  ;;  %v2775_v40 = vld [vmem:[#allocation2 + $0x28] sm:$0xff] }
 0x752   : > { %v3685_v33 = vpop.eup %3684  ;;  %v2635_v37 = vmul.f32 %v3683_v54, %v2603_v9  ;;  %3696 = vrcp.f32 %v2608_v7 }
 0x753   : > { %v3687_v6 = vpop.eup %3686  ;;  %v2634_v15 = vmul.f32 %v3685_v33, %v2602_v60 }
 0x754   : > { %v3689_v44 = vpop.eup %3688  ;;  %v2651_v17 = vsub.f32 2.0, %v2635_v37  ;;  %v2637_v0 = vmul.f32 %v3687_v6, %v2605_v20  ;;  %2711 = vperm.xlu1 %3665, %v2665_v10  }
 0x755   : > { %v2650_v55 = vsub.f32 2.0, %v2634_v15  ;;  %v2636_v18 = vmul.f32 %v3689_v44, %v2604_v25  ;;  %2706 = vperm.xlu0 %3664, %v2664_v32  }
 0x756   : > { %v2667_v9 = vmul.f32 %v3683_v54, %v2651_v17  ;;  %v2653_v45 = vsub.f32 2.0, %v2637_v0 }
 0x757   : > { %v2666_v60 = vmul.f32 %v3685_v33, %v2650_v55  ;;  %v2652_v38 = vsub.f32 2.0, %v2636_v18  ;;  %v2771_v33 = vld [vmem:[#allocation2 + $0x8] sm:$0xff] }
 0x758   : > { %2721 = vperm.xlu1 %3665, %v2667_v9   ;;  %v2669_v20 = vmul.f32 %v3687_v6, %v2653_v45 }
 0x759   : > { %v3691_v35 = vpop.eup %3690  ;;  %2716 = vperm.xlu0 %3664, %v2666_v60   ;;  %v2668_v21 = vmul.f32 %v3689_v44, %v2652_v38 }
 0x75a   : > { %v3693_v58 = vpop.eup %3692  ;;  %v2639_v5 = vmul.f32 %v3691_v35, %v2607_v14 }
 0x75b   : > { %v3695_v48 = vpop.eup %3694  ;;  %v2638_v30 = vmul.f32 %v3693_v58, %v2606_v47  ;;  %v2772_v47 = vld [vmem:[#allocation2 + $0x10] sm:$0xff] }
 0x75c   : > { %v3697_v29 = vpop.eup %3696  ;;  %v2655_v27 = vsub.f32 2.0, %v2639_v5  ;;  %v2641_v1 = vmul.f32 %v3695_v48, %v2609_v50  ;;  %2731 = vperm.xlu1 %3665, %v2669_v20  }
 0x75d   : > { %v2654_v4 = vsub.f32 2.0, %v2638_v30  ;;  %v2640_v42 = vmul.f32 %v3697_v29, %v2608_v7  ;;  %2726 = vperm.xlu0 %3664, %v2668_v21  }
 0x75e   : > { %v2671_v25 = vmul.f32 %v3691_v35, %v2655_v27  ;;  %v2657_v51 = vsub.f32 2.0, %v2641_v1 }
 0x75f   : > { %v2670_v19 = vmul.f32 %v3693_v58, %v2654_v4  ;;  %v2656_v14 = vsub.f32 2.0, %v2640_v42 }
 0x760   : > { %2741 = vperm.xlu1 %3665, %v2671_v25   ;;  %v2673_v41 = vmul.f32 %v3695_v48, %v2657_v51 }
 0x761   : > { %2736 = vperm.xlu0 %3664, %v2670_v19   ;;  %v2672_v34 = vmul.f32 %v3697_v29, %v2656_v14 }
 0x764   : > { %2751 = vperm.xlu1 %3665, %v2673_v41  }
 0x765   : > { %2746 = vperm.xlu0 %3664, %v2672_v34  }
 0x7c4   : > { %v2687_v49 = vpop.permute.xlu1 %2686 }
 0x7c5   : > { %v2756_v50 = vmul.f32 %v2687_v49, %v5054_v52  ;;  %v2677_v46 = vpop.permute.xlu0 %2676 }
 0x7c6   : > { %v2754_v7 = vmul.f32 %v2677_v46, %v5056_v12  ;;  %v2774_v12 = vld [vmem:[#allocation2 + $0x20] sm:$0xff] }
 0x7c7   : > { %v2788_v63 = vadd.f32 %v2772_v47, %v2756_v50 }
 0x7c8   : > { %v2786_v54 = vadd.f32 %v2770_v31, %v2754_v7  ;;  %v2692_v11 = vpop.permute.xlu1 %2691 }
 0x7c9   : > { %2804 = vst [vmem:[#allocation7 + $0x10] sm:$0xff] %v2788_v63  ;;  %v2757_v8 = vmul.f32 %v2692_v11, %v5058_v43  ;;  %v2682_v36 = vpop.permute.xlu0 %2681  ;;  %v2777_v43 = vld [vmem:[#allocation2 + $0x38] sm:$0xff] }
 0x7ca   : > { %2802 = vst [vmem:[#allocation7] sm:$0xff] %v2786_v54  ;;  %v2755_v56 = vmul.f32 %v2682_v36, %v5063_v28  ;;  %v2776_v28 = vld [vmem:[#allocation2 + $0x30] sm:$0xff] }
 0x7cb   : > { %v2789_v37 = vadd.f32 %v2773_v61, %v2757_v8 }
 0x7cc   : > { %v2787_v6 = vadd.f32 %v2771_v33, %v2755_v56 }
 0x7cd   : > { %2805 = vst [vmem:[#allocation7 + $0x18] sm:$0xff] %v2789_v37 }
 0x7ce   : > { %2803 = vst [vmem:[#allocation7 + $0x8] sm:$0xff] %v2787_v6 }
 0x7cf   : > { %v2702_v52 = vpop.permute.xlu1 %2701 }
 0x7d0   : > { %v2759_v13 = vmul.f32 %v2702_v52, %v5065_v62  ;;  %v2697_v15 = vpop.permute.xlu0 %2696  ;;  %v2779_v62 = vld [vmem:[#allocation2 + $0x48] sm:$0xff] }
 0x7d1   : > { %v2758_v44 = vmul.f32 %v2697_v15, %v5067_v3  ;;  %v2778_v3 = vld [vmem:[#allocation2 + $0x40] sm:$0xff] }
 0x7d2   : > { %v2791_v10 = vadd.f32 %v2775_v40, %v2759_v13 }
 0x7d3   : > { %v2790_v17 = vadd.f32 %v2774_v12, %v2758_v44  ;;  %v2712_v0 = vpop.permute.xlu1 %2711 }
 0x7d4   : > { %2807 = vst [vmem:[#allocation7 + $0x28] sm:$0xff] %v2791_v10  ;;  %v2761_v35 = vmul.f32 %v2712_v0, %v5072_v39  ;;  %v2707_v32 = vpop.permute.xlu0 %2706  ;;  %v2781_v39 = vld [vmem:[#allocation2 + $0x58] sm:$0xff] }
 0x7d5   : > { %2806 = vst [vmem:[#allocation7 + $0x20] sm:$0xff] %v2790_v17  ;;  %v2760_v55 = vmul.f32 %v2707_v32, %v5074_v26  ;;  %v2780_v26 = vld [vmem:[#allocation2 + $0x50] sm:$0xff] }
 0x7d6   : > { %v2793_v18 = vadd.f32 %v2777_v43, %v2761_v35 }
 0x7d7   : > { %v2792_v58 = vadd.f32 %v2776_v28, %v2760_v55  ;;  %v2722_v9 = vpop.permute.xlu1 %2721 }
 0x7d8   : > { %2809 = vst [vmem:[#allocation7 + $0x38] sm:$0xff] %v2793_v18  ;;  %v2763_v45 = vmul.f32 %v2722_v9, %v5076_v24  ;;  %v2717_v5 = vpop.permute.xlu0 %2716  ;;  %v2783_v24 = vld [vmem:[#allocation2 + $0x68] sm:$0xff] }
 0x7d9   : > { %2808 = vst [vmem:[#allocation7 + $0x30] sm:$0xff] %v2792_v58  ;;  %v2762_v48 = vmul.f32 %v2717_v5, %v5080_v59  ;;  %v2782_v59 = vld [vmem:[#allocation2 + $0x60] sm:$0xff] }
 0x7da   : > { %v2795_v60 = vadd.f32 %v2779_v62, %v2763_v45 }
 0x7db   : > { %v2794_v38 = vadd.f32 %v2778_v3, %v2762_v48  ;;  %v2732_v30 = vpop.permute.xlu1 %2731 }
 0x7dc   : > { %2811 = vst [vmem:[#allocation7 + $0x48] sm:$0xff] %v2795_v60  ;;  %v2765_v29 = vmul.f32 %v2732_v30, %v5084_v53  ;;  %v2727_v20 = vpop.permute.xlu0 %2726  ;;  %v2785_v53 = vld [vmem:[#allocation2 + $0x78] sm:$0xff] }
 0x7dd   : > { %2810 = vst [vmem:[#allocation7 + $0x40] sm:$0xff] %v2794_v38  ;;  %v2764_v27 = vmul.f32 %v2727_v20, %v5086_v22  ;;  %v2784_v22 = vld [vmem:[#allocation2 + $0x70] sm:$0xff] }
 0x7de   : > { %v2797_v1 = vadd.f32 %v2781_v39, %v2765_v29 }
 0x7df   : > { %v2796_v21 = vadd.f32 %v2780_v26, %v2764_v27  ;;  %v2742_v4 = vpop.permute.xlu1 %2741 }
 0x7e0   : > { %2813 = vst [vmem:[#allocation7 + $0x58] sm:$0xff] %v2797_v1  ;;  %v2767_v42 = vmul.f32 %v2742_v4, %v5090_v16  ;;  %v2737_v25 = vpop.permute.xlu0 %2736 }
 0x7e1   : > { %2812 = vst [vmem:[#allocation7 + $0x50] sm:$0xff] %v2796_v21  ;;  %v2766_v51 = vmul.f32 %v2737_v25, %v5092_v2 }
 0x7e2   : > { %v2799_v19 = vadd.f32 %v2783_v24, %v2767_v42 }
 0x7e3   : > { %v2798_v14 = vadd.f32 %v2782_v59, %v2766_v51  ;;  %v2752_v41 = vpop.permute.xlu1 %2751 }
 0x7e4   : > { %2815 = vst [vmem:[#allocation7 + $0x68] sm:$0xff] %v2799_v19  ;;  %v2769_v34 = vmul.f32 %v2752_v41, %v5094_v57  ;;  %v2747_v47 = vpop.permute.xlu0 %2746 }
 0x7e5   : > { %2814 = vst [vmem:[#allocation7 + $0x60] sm:$0xff] %v2798_v14  ;;  %v2768_v49 = vmul.f32 %v2747_v47, %v5097_v23 }
 0x7e6   : > { %v2801_v50 = vadd.f32 %v2785_v53, %v2769_v34 }
 0x7e7   : > { %v2800_v31 = vadd.f32 %v2784_v22, %v2768_v49 }
 0x7e8   : > { %2817 = vst [vmem:[#allocation7 + $0x78] sm:$0xff] %v2801_v50 }
 0x7e9   : > { %2816 = vst [vmem:[#allocation7 + $0x70] sm:$0xff] %v2800_v31 }
 0x7ea PF: > { %s3802_s21 = smov [#allocation7]  }
 0x7eb   : > { %s2829_s24 = sshll.u32 %s3802_s21, 4  ;;  %s2830_s24 = int_to_ptr.vmem [resolvable:$true] %s2829_s24 }
 0x7ec   : > { %s3698_s25 = scalar_lea.vmem %s2830_s24, 2048  ;;  %p3705_p4 = scmp.lt.s32.totalorder %s2830_s24, %s2830_s24 }
 0x7ed   : > { %p3699_p0 = scmp.ne.s32.totalorder %s2830_s24, %s3698_s25  ;;  %p3706_p7 = scmp.lt.s32.totalorder %s3698_s25, %s3698_s25 }
 0x7ef   : > { %p3700_p1 = pnand %p3699_p0, %p246_p2  ;;  %p3707_p8 = por %p3706_p7, %p3705_p4 }
 0x7f1   : > { %p3701_p3 = pneg %p3700_p1 }
 0x7f3   : > { %p3708_p9 = pnand %p3707_p8, %p3701_p3 }
 0x7f5   : > { %3711 = shalt.err (!%p3708_p9)
}
 0x7f6   : > { %s3712_s15 = scalar_lea.hbm %s5210_s8, 2048 }
 0x7f7   : > { %p3713_p10 = scmp.ne.s32.totalorder %s5210_s8, %s3712_s15  ;;  %p3718_p13 = scmp.lt.u32.totalorder %s3712_s15, %s5210_s8 }
 0x7f9   : > { %p3714_p11 = pnand %p3713_p10, %p246_p2 }
 0x7fb   : > { %p3715_p12 = pneg %p3714_p11 }
 0x7fd   : > { %p3720_p0 = pnand %p3718_p13, %p3715_p12 }
 0x7ff   : > { %3723 = shalt.err (!%p3720_p0)
}
 0x800   : > { %s3803_s22 = smov 128   ;;  %s3804_s26 = smov 8  }
 0x801   : > { %3539 = dma.vmem_to_hbm [thread:$0]  (%p246_p2), %s2830_s24, 2048, %s5210_s8, [#allocation8], %s3803_s22, %s3803_s22, %s3804_s26  }
 0x802   : > { %s3106_s21 = sshll.u32 %s3877_s13, 11  ;;  %s2845_s25 = sshll.u32 %s3928_s11, 4  ;;  %s5150_s25 = int_to_ptr.vmem [resolvable:$true] %s2845_s25 }
 0x803   : > { %s5148_s15 = scalar_lea.hbm %s5211_s9, %s3106_s21  ;;  %s5437_s14 = sand.u32 1, %s3782_s10  }
 0x804   : > { %s5154_s17 = scalar_lea.sflag [#allocation10], %s5437_s14  ;;  %s3724_s28 = scalar_lea.vmem %s5150_s25, 2048 }
 0x805   : > { %p3725_p1 = scmp.ne.s32.totalorder %s5150_s25, %s3724_s28  ;;  %s3805_s24 = smov [#allocation9]  }
 0x806   : > { %s3728_s11 = sshll.u32 %s3805_s24, 4  ;;  %s3729_s11 = int_to_ptr.vmem [resolvable:$false] %s3728_s11 }
 0x807   : > { %p3726_p3 = pnand %p3725_p1, %p3896_p5  ;;  %s3730_s16 = scalar_lea.vmem %s3729_s11, 4096 }
 0x808   : > { %p3731_p7 = scmp.lt.s32.totalorder %s5150_s25, %s3729_s11  ;;  %p3732_p8 = scmp.lt.s32.totalorder %s3730_s16, %s3724_s28 }
 0x809   : > { %p3727_p4 = pneg %p3726_p3 }
 0x80a   : > { %p3733_p9 = por %p3732_p8, %p3731_p7 }
 0x80c   : > { %p3734_p10 = pnand %p3733_p9, %p3727_p4 }
 0x80e   : > { %3737 = shalt.err (!%p3734_p10)
}
 0x80f   : > { %s3738_s27 = scalar_lea.hbm %s5148_s15, 2048  ;;  %s3742_s18 = scalar_lea.hbm %s5211_s9, 6144 }
 0x810   : > { %p3739_p11 = scmp.ne.s32.totalorder %s5148_s15, %s3738_s27  ;;  %p3743_p0 = scmp.lt.u32.totalorder %s5148_s15, %s5211_s9 }
 0x811   : > { %p3744_p1 = scmp.lt.u32.totalorder %s3742_s18, %s3738_s27  ;;  %p3746_p4 = scmp.lt.u32.totalorder %s3738_s27, %s5148_s15 }
 0x812   : > { %p3740_p12 = pnand %p3739_p11, %p3896_p5 }
 0x813   : > { %p3745_p3 = por %p3744_p1, %p3743_p0 }
 0x814   : > { %p3741_p13 = pneg %p3740_p12 }
 0x815   : > { %p3747_p7 = por %p3746_p4, %p3745_p3 }
 0x817   : > { %p3748_p8 = pnand %p3747_p7, %p3741_p13 }
 0x819   : > { %3751 = shalt.err (!%p3748_p8)
}
 0x81a   : > { %3540 = dma.vmem_to_hbm [thread:$0]  (%p3896_p5), %s5150_s25, 2048, %s5148_s15, %s5154_s17, %s3803_s22, %s3803_s22, %s3804_s26  }
 0x81b   : > { %3769 = dma.done.wait (%p246_p2), [#allocation8], 2048  }
 0x81c   : > { %3771 = vsyncadd (%p246_p2), [#allocation8], 4294965248 }
 0x81d PF: > { %p3550_p9 = scmp.ge.s32.totalorder %s3790_s12, 2  ;;  %s2864_s28 = sand.u32 1, %s3778_s30  }
 0x81e   : > { %s2865_s19 = scalar_lea.sflag [#allocation10], %s2864_s28 }
 0x81f   : > { %p3545_p10 = pnand %p3550_p9, %p3900_p6 }
 0x821   : > { %3773 = dma.done.wait (!%p3545_p10), %s2865_s19, 2048  }
 0x822   : > { %3775 = vsyncadd (!%p3545_p10), %s2865_s19, 4294965248  ;;  %s5438_s12 = sld [smem:[#allocation14_spill]]  ;;  %s5439_s24 = sld [smem:[#allocation13_spill]] }
 0x823   : > { %s5440_s11 = sld [smem:[#allocation15_spill]]  ;;  %s5441_s30 = smov %s3782_s10 }
 0x828   : > { %p21_p5 = scmp.ge.s32.totalorder %s5438_s12, 5   ;;  %s5442_s10 = smov %s5439_s24 }
 0x82a   :  { %23 = sbr.rel (!%p21_p5) target bundleno = 4 (0x4), region = 110 }
 0x831   :  { %2870 = vsyncpa [#allocation8], 1 }
 0x832   :  { %2872 = vsyncpa [#allocation8 + $0x1], 1 }
 0x833   :  { %2873 = vsyncpa [#allocation10], 1 }
 0x834   :  { %2875 = vsyncpa [#allocation10 + $0x1], 1 }

</bundles_post_ra>
